<compile_context>
chip_gen: v7x
topology: tpu7x:2x2x1
jax: 0.10.0
libtpu: 0.0.40
codegen_flags: <defaults>
</compile_context>

<pallas_src>
import jax
import jax.numpy as jnp
from jax.experimental import pallas as pl
from jax.experimental.pallas import tpu as pltpu

# ---------------- scaled-down ViT config ----------------
IMG = 32          # image size (ViT-B/16 uses 224)
PATCH = 16        # patch size (same as ViT-B/16)
CH = 3            # RGB channels
HIDDEN = 32       # hidden dim (768 in ViT-B/16)
HEADS = 4         # attention heads (12 in ViT-B/16)
HEAD_DIM = HIDDEN // HEADS
MLP_DIM = 64      # MLP dim (3072 in ViT-B/16)
LAYERS = 2        # encoder layers (12 in ViT-B/16)
BATCH = 2
N_PATCH = (IMG // PATCH) ** 2
SEQ = N_PATCH + 1       # +1 class token  (= 5)
SEQ_PAD = 8             # padded to the 8-sublane granule
EPS = 1e-6              # torchvision ViT LayerNorm eps
_SCALE = 1.0 / float(HEAD_DIM) ** 0.5
_NEG = -1e30

# MXU operand dtype (f32 accumulate everywhere).  bf16 feeds the MXU natively
# on v5e/v6e/v7x; element-wise math stays f32.
MXU_DTYPE = jnp.bfloat16


# ---------------- in-kernel helpers (pure value functions) ----------------
def _layernorm(x, g, b):
    # One-pass mean / variance: E[x], E[x^2] (review item).
    m = jnp.mean(x, axis=-1, keepdims=True)
    m2 = jnp.mean(x * x, axis=-1, keepdims=True)
    var = jnp.maximum(m2 - m * m, 0.0)
    return (x - m) * jax.lax.rsqrt(var + EPS) * g + b


# ---------------- single fused ViT forward kernel ----------------
def _vit_fused_kernel(*refs):
    """refs = (patches, patch_w, base, attn_bias,
               <16 refs per layer>..., lnf_g, lnf_b, out)."""
    out_ref = refs[-1]
    in_refs = refs[:-1]
    patches_ref, pw_ref, base_ref, bias_ref = in_refs[:4]

    nb = patches_ref.shape[0] // SEQ_PAD     # static batch size
    nrows = nb * SEQ_PAD                     # stacked (image, token) rows

    # Patch embedding (16x16 / stride-16 conv as one matmul).  cls token,
    # conv bias and positional embedding are pre-folded into `base`
    # (zero on pad rows).
    h = jnp.dot(patches_ref[...].astype(MXU_DTYPE), pw_ref[...],
                preferred_element_type=jnp.float32) + base_ref[...]

    # Additive attention bias (0 where same image AND key col < SEQ, -1e30
    # elsewhere) -- precomputed in the wrapper, added once per layer.
    attn_bias = bias_ref[...]                # [nrows, nrows] f32

    def to_heads(t):
        # [nrows, HIDDEN] -> [HEADS, nrows, HEAD_DIM]  (heads = batch dim)
        return jnp.transpose(t.reshape(nrows, HEADS, HEAD_DIM), (1, 0, 2))

    idx = 4
    for _ in range(LAYERS):
        (ln1_g, ln1_b, q_w, q_b, k_w, k_b, v_w, v_b, out_w, out_b,
         ln2_g, ln2_b, fc1_w, fc1_b, fc2_w, fc2_b) = in_refs[idx:idx + 16]
        idx += 16

        # --- attention sub-block: h = h + out_proj(MHA(ln_1(h))) ---
        y = _layernorm(h, ln1_g[...], ln1_b[...])
        yb = y.astype(MXU_DTYPE)
        # 1/sqrt(head_dim) is pre-folded into q_w / q_b (wrapper).
        q = jnp.dot(yb, q_w[...], preferred_element_type=jnp.float32) + q_b[...]
        k = jnp.dot(yb, k_w[...], preferred_element_type=jnp.float32) + k_b[...]
        v = jnp.dot(yb, v_w[...], preferred_element_type=jnp.float32) + v_b[...]

        q3 = to_heads(q).astype(MXU_DTYPE)   # [H, nrows, hd]
        k3 = to_heads(k).astype(MXU_DTYPE)
        v3 = to_heads(v).astype(MXU_DTYPE)

        # One batched score matmul + ONE softmax for all images and heads.
        s = jnp.einsum("hqd,hkd->hqk", q3, k3,
                       preferred_element_type=jnp.float32)   # [H, nrows, nrows]
        s = s + attn_bias                                     # additive mask
        s = s - jnp.max(s, axis=-1, keepdims=True)
        p = jnp.exp(s)
        p = p * pl.reciprocal(jnp.sum(p, axis=-1, keepdims=True), approx=True)

        o3 = jnp.einsum("hqk,hkd->hqd", p.astype(MXU_DTYPE), v3,
                        preferred_element_type=jnp.float32)   # [H, nrows, hd]
        o = jnp.transpose(o3, (1, 0, 2)).reshape(nrows, HIDDEN)
        a = jnp.dot(o.astype(MXU_DTYPE), out_w[...],
                    preferred_element_type=jnp.float32) + out_b[...]
        h = h + a

        # --- MLP sub-block: h = h + MLP(ln_2(h)) ---
        y = _layernorm(h, ln2_g[...], ln2_b[...])
        y = jnp.dot(y.astype(MXU_DTYPE), fc1_w[...],
                    preferred_element_type=jnp.float32) + fc1_b[...]
        # TODO(synk): exact-erf GELU (torchvision default) if parity needed.
        y = jax.nn.gelu(y, approximate=True)
        y = jnp.dot(y.astype(MXU_DTYPE), fc2_w[...],
                    preferred_element_type=jnp.float32) + fc2_b[...]
        h = h + y

    # Final encoder LayerNorm on the class-token rows only; one dense store.
    lnf_g, lnf_b = in_refs[idx], in_refs[idx + 1]
    cls_rows = h.reshape(nb, SEQ_PAD, HIDDEN)[:, 0, :]        # [nb, HIDDEN]
    out_ref[...] = _layernorm(cls_rows, lnf_g[...],
                              lnf_b[...]).astype(out_ref.dtype)


# ---------------- parameter construction (deterministic) ----------------
def init_params(key):
    def nrm(k, shape, scale=0.02):
        return (scale * jax.random.normal(k, shape)).astype(jnp.float32)

    keys = jax.random.split(key, 4 + LAYERS)
    params = {
        # conv_proj as a matmul: [C*P*P, D]  (== flattened PyTorch [D,C,P,P].T)
        "patch_w": nrm(keys[0], (CH * PATCH * PATCH, HIDDEN)),
        "patch_b": jnp.zeros((HIDDEN,), jnp.float32),
        "cls": nrm(keys[1], (1, 1, HIDDEN)),
        "pos": nrm(keys[2], (1, SEQ, HIDDEN)),
        "ln_g": jnp.ones((HIDDEN,), jnp.float32),
        "ln_b": jnp.zeros((HIDDEN,), jnp.float32),
        "layers": [],
    }
    for l in range(LAYERS):
        kk = jax.random.split(keys[4 + l], 4)
        params["layers"].append({
            "ln1_g": jnp.ones((HIDDEN,), jnp.float32),
            "ln1_b": jnp.zeros((HIDDEN,), jnp.float32),
            "qkv_w": nrm(kk[0], (HIDDEN, 3 * HIDDEN)),
            "qkv_b": jnp.zeros((3 * HIDDEN,), jnp.float32),
            "out_w": nrm(kk[1], (HIDDEN, HIDDEN)),
            "out_b": jnp.zeros((HIDDEN,), jnp.float32),
            "ln2_g": jnp.ones((HIDDEN,), jnp.float32),
            "ln2_b": jnp.zeros((HIDDEN,), jnp.float32),
            "fc1_w": nrm(kk[2], (HIDDEN, MLP_DIM)),
            "fc1_b": jnp.zeros((MLP_DIM,), jnp.float32),
            "fc2_w": nrm(kk[3], (MLP_DIM, HIDDEN)),
            "fc2_b": jnp.zeros((HIDDEN,), jnp.float32),
        })
    return params


# ---------------- forward (torchvision ViT semantics, heads = Identity) -------
def vit_forward(x, params):
    B = x.shape[0]
    cpp = CH * PATCH * PATCH
    gsz = IMG // PATCH
    nrows = B * SEQ_PAD

    # ---- layout-only glue: patchify NCHW, scatter into padded sequence slots
    # (row 0 = cls slot, rows >= SEQ = pad; those rows are exactly 0). ----
    p = x.reshape(B, CH, gsz, PATCH, gsz, PATCH).transpose(0, 2, 4, 1, 3, 5)
    p = p.reshape(B, N_PATCH, cpp)
    p_pad = jnp.zeros((B, SEQ_PAD, cpp), jnp.float32)
    p_pad = p_pad.at[:, 1:1 + N_PATCH, :].set(p).reshape(nrows, cpp)

    # ---- parameter-only glue: fold cls token, conv bias and positional
    # embedding into one additive slab (zero on pad rows), broadcast on B. ----
    pos = params["pos"].reshape(SEQ, HIDDEN)
    cls = params["cls"].reshape(1, HIDDEN)
    pb = params["patch_b"].reshape(1, HIDDEN)
    base = jnp.zeros((SEQ_PAD, HIDDEN), jnp.float32)
    base = base.at[0:1].set(cls + pos[0:1])
    base = base.at[1:SEQ].set(pos[1:SEQ] + pb)
    base = jnp.broadcast_to(base[None], (B, SEQ_PAD, HIDDEN)).reshape(nrows, HIDDEN)

    # ---- additive attention bias: key padding + per-image block diagonal ----
    r = jnp.arange(nrows)
    same_img = (r[:, None] // SEQ_PAD) == (r[None, :] // SEQ_PAD)
    real_key = (r[None, :] % SEQ_PAD) < SEQ
    attn_bias = jnp.where(same_img & real_key, 0.0, _NEG).astype(jnp.float32)

    def mxu(wt):
        return wt.astype(MXU_DTYPE)

    inputs = [p_pad, mxu(params["patch_w"]), base, attn_bias]
    for lyr in params["layers"]:
        q_w, k_w, v_w = jnp.split(lyr["qkv_w"], 3, axis=1)
        q_b, k_b, v_b = jnp.split(lyr["qkv_b"], 3)
        inputs += [
            lyr["ln1_g"].reshape(1, HIDDEN), lyr["ln1_b"].reshape(1, HIDDEN),
            mxu(q_w * _SCALE), (q_b * _SCALE).reshape(1, HIDDEN),
            mxu(k_w), k_b.reshape(1, HIDDEN),
            mxu(v_w), v_b.reshape(1, HIDDEN),
            mxu(lyr["out_w"]), lyr["out_b"].reshape(1, HIDDEN),
            lyr["ln2_g"].reshape(1, HIDDEN), lyr["ln2_b"].reshape(1, HIDDEN),
            mxu(lyr["fc1_w"]), lyr["fc1_b"].reshape(1, MLP_DIM),
            mxu(lyr["fc2_w"]), lyr["fc2_b"].reshape(1, HIDDEN),
        ]
    inputs += [params["ln_g"].reshape(1, HIDDEN), params["ln_b"].reshape(1, HIDDEN)]

    # Single fused gridless call: every operand is a full-array VMEM block.
    return pl.pallas_call(
        _vit_fused_kernel,
        out_shape=jax.ShapeDtypeStruct((B, HIDDEN), jnp.float32),
        in_specs=[pl.BlockSpec(memory_space=pltpu.MemorySpace.VMEM)
                  for _ in inputs],
        out_specs=pl.BlockSpec(memory_space=pltpu.MemorySpace.VMEM),
    )(*inputs)


if __name__ == "__main__":
    key = jax.random.PRNGKey(0)
    k_param, k_x = jax.random.split(key)
    params = init_params(k_param)
    x = jax.random.normal(k_x, (BATCH, CH, IMG, IMG), dtype=jnp.float32)  # NCHW

    fwd = jax.jit(vit_forward)
    out = jax.block_until_ready(fwd(x, params))
    assert out.shape == (BATCH, HIDDEN), out.shape
    assert bool(jnp.all(jnp.isfinite(out)))
    print("KERNEL_OK")
</pallas_src>

<mosaic_0001>
module attributes {stable_mosaic.version = 11 : i64} {
  func.func @_vit_fused_kernel(%arg0: memref<16x768xf32, #tpu.memory_space<vmem>>, %arg1: memref<768x32xbf16, #tpu.memory_space<vmem>>, %arg2: memref<16x32xf32, #tpu.memory_space<vmem>>, %arg3: memref<16x16xf32, #tpu.memory_space<vmem>>, %arg4: memref<1x32xf32, #tpu.memory_space<vmem>>, %arg5: memref<1x32xf32, #tpu.memory_space<vmem>>, %arg6: memref<32x32xbf16, #tpu.memory_space<vmem>>, %arg7: memref<1x32xf32, #tpu.memory_space<vmem>>, %arg8: memref<32x32xbf16, #tpu.memory_space<vmem>>, %arg9: memref<1x32xf32, #tpu.memory_space<vmem>>, %arg10: memref<32x32xbf16, #tpu.memory_space<vmem>>, %arg11: memref<1x32xf32, #tpu.memory_space<vmem>>, %arg12: memref<32x32xbf16, #tpu.memory_space<vmem>>, %arg13: memref<1x32xf32, #tpu.memory_space<vmem>>, %arg14: memref<1x32xf32, #tpu.memory_space<vmem>>, %arg15: memref<1x32xf32, #tpu.memory_space<vmem>>, %arg16: memref<32x64xbf16, #tpu.memory_space<vmem>>, %arg17: memref<1x64xf32, #tpu.memory_space<vmem>>, %arg18: memref<64x32xbf16, #tpu.memory_space<vmem>>, %arg19: memref<1x32xf32, #tpu.memory_space<vmem>>, %arg20: memref<1x32xf32, #tpu.memory_space<vmem>>, %arg21: memref<1x32xf32, #tpu.memory_space<vmem>>, %arg22: memref<32x32xbf16, #tpu.memory_space<vmem>>, %arg23: memref<1x32xf32, #tpu.memory_space<vmem>>, %arg24: memref<32x32xbf16, #tpu.memory_space<vmem>>, %arg25: memref<1x32xf32, #tpu.memory_space<vmem>>, %arg26: memref<32x32xbf16, #tpu.memory_space<vmem>>, %arg27: memref<1x32xf32, #tpu.memory_space<vmem>>, %arg28: memref<32x32xbf16, #tpu.memory_space<vmem>>, %arg29: memref<1x32xf32, #tpu.memory_space<vmem>>, %arg30: memref<1x32xf32, #tpu.memory_space<vmem>>, %arg31: memref<1x32xf32, #tpu.memory_space<vmem>>, %arg32: memref<32x64xbf16, #tpu.memory_space<vmem>>, %arg33: memref<1x64xf32, #tpu.memory_space<vmem>>, %arg34: memref<64x32xbf16, #tpu.memory_space<vmem>>, %arg35: memref<1x32xf32, #tpu.memory_space<vmem>>, %arg36: memref<1x32xf32, #tpu.memory_space<vmem>>, %arg37: memref<1x32xf32, #tpu.memory_space<vmem>>, %arg38: memref<2x32xf32, #tpu.memory_space<vmem>>) attributes {dimension_semantics = [], scalar_prefetch = 0 : i64, scratch_operands = 0 : i64, tpu.core_type = #tpu.core_type<tc>} {
    %c0 = arith.constant 0 : index
    %c0_0 = arith.constant 0 : index
    %0 = vector.load %arg0[%c0, %c0_0] : memref<16x768xf32, #tpu.memory_space<vmem>>, vector<16x768xf32>
    %1 = arith.truncf %0 : vector<16x768xf32> to vector<16x768xbf16>
    %c0_1 = arith.constant 0 : index
    %c0_2 = arith.constant 0 : index
    %2 = vector.load %arg1[%c0_1, %c0_2] : memref<768x32xbf16, #tpu.memory_space<vmem>>, vector<768x32xbf16>
    %cst = arith.constant dense<0.000000e+00> : vector<16x32xf32>
    %3 = tpu.matmul %1, %2, %cst {dimension_numbers = #tpu.dot_dimension_numbers<[1], [0], [0], [1], [0, 0, 1, 1], [], []>} : vector<16x768xbf16>, vector<768x32xbf16>, vector<16x32xf32> -> vector<16x32xf32>
    %c0_3 = arith.constant 0 : index
    %c0_4 = arith.constant 0 : index
    %4 = vector.load %arg2[%c0_3, %c0_4] : memref<16x32xf32, #tpu.memory_space<vmem>>, vector<16x32xf32>
    %5 = arith.addf %3, %4 : vector<16x32xf32>
    %c0_5 = arith.constant 0 : index
    %c0_6 = arith.constant 0 : index
    %6 = vector.load %arg3[%c0_5, %c0_6] : memref<16x16xf32, #tpu.memory_space<vmem>>, vector<16x16xf32>
    %c0_7 = arith.constant 0 : index
    %c0_8 = arith.constant 0 : index
    %7 = vector.load %arg4[%c0_7, %c0_8] : memref<1x32xf32, #tpu.memory_space<vmem>>, vector<1x32xf32>
    %c0_9 = arith.constant 0 : index
    %c0_10 = arith.constant 0 : index
    %8 = vector.load %arg5[%c0_9, %c0_10] : memref<1x32xf32, #tpu.memory_space<vmem>>, vector<1x32xf32>
    %cst_11 = arith.constant dense<0.000000e+00> : vector<16xf32>
    %9 = vector.multi_reduction <add>, %5, %cst_11 [1] : vector<16x32xf32> to vector<16xf32>
    %10 = vector.shape_cast %9 : vector<16xf32> to vector<16x1xf32>
    %cst_12 = arith.constant 3.200000e+01 : f32
    %11 = vector.broadcast %cst_12 : f32 to vector<16x1xf32>
    %12 = arith.divf %10, %11 : vector<16x1xf32>
    %13 = arith.mulf %5, %5 : vector<16x32xf32>
    %cst_13 = arith.constant dense<0.000000e+00> : vector<16xf32>
    %14 = vector.multi_reduction <add>, %13, %cst_13 [1] : vector<16x32xf32> to vector<16xf32>
    %15 = vector.shape_cast %14 : vector<16xf32> to vector<16x1xf32>
    %cst_14 = arith.constant 3.200000e+01 : f32
    %16 = vector.broadcast %cst_14 : f32 to vector<16x1xf32>
    %17 = arith.divf %15, %16 : vector<16x1xf32>
    %18 = arith.mulf %12, %12 : vector<16x1xf32>
    %19 = arith.subf %17, %18 : vector<16x1xf32>
    %cst_15 = arith.constant 0.000000e+00 : f32
    %20 = vector.broadcast %cst_15 : f32 to vector<16x1xf32>
    %21 = arith.maximumf %19, %20 : vector<16x1xf32>
    %22 = vector.broadcast %12 : vector<16x1xf32> to vector<16x32xf32>
    %23 = arith.subf %5, %22 : vector<16x32xf32>
    %cst_16 = arith.constant 9.99999997E-7 : f32
    %24 = vector.broadcast %cst_16 : f32 to vector<16x1xf32>
    %25 = arith.addf %21, %24 : vector<16x1xf32>
    %26 = math.rsqrt %25 : vector<16x1xf32>
    %27 = vector.broadcast %26 : vector<16x1xf32> to vector<16x32xf32>
    %28 = arith.mulf %23, %27 : vector<16x32xf32>
    %29 = vector.broadcast %7 : vector<1x32xf32> to vector<16x32xf32>
    %30 = arith.mulf %28, %29 : vector<16x32xf32>
    %31 = vector.broadcast %8 : vector<1x32xf32> to vector<16x32xf32>
    %32 = arith.addf %30, %31 : vector<16x32xf32>
    %33 = arith.truncf %32 : vector<16x32xf32> to vector<16x32xbf16>
    %c0_17 = arith.constant 0 : index
    %c0_18 = arith.constant 0 : index
    %34 = vector.load %arg6[%c0_17, %c0_18] : memref<32x32xbf16, #tpu.memory_space<vmem>>, vector<32x32xbf16>
    %cst_19 = arith.constant dense<0.000000e+00> : vector<16x32xf32>
    %35 = tpu.matmul %33, %34, %cst_19 {dimension_numbers = #tpu.dot_dimension_numbers<[1], [0], [0], [1], [0, 0, 1, 1], [], []>} : vector<16x32xbf16>, vector<32x32xbf16>, vector<16x32xf32> -> vector<16x32xf32>
    %c0_20 = arith.constant 0 : index
    %c0_21 = arith.constant 0 : index
    %36 = vector.load %arg7[%c0_20, %c0_21] : memref<1x32xf32, #tpu.memory_space<vmem>>, vector<1x32xf32>
    %37 = vector.broadcast %36 : vector<1x32xf32> to vector<16x32xf32>
    %38 = arith.addf %35, %37 : vector<16x32xf32>
    %c0_22 = arith.constant 0 : index
    %c0_23 = arith.constant 0 : index
    %39 = vector.load %arg8[%c0_22, %c0_23] : memref<32x32xbf16, #tpu.memory_space<vmem>>, vector<32x32xbf16>
    %cst_24 = arith.constant dense<0.000000e+00> : vector<16x32xf32>
    %40 = tpu.matmul %33, %39, %cst_24 {dimension_numbers = #tpu.dot_dimension_numbers<[1], [0], [0], [1], [0, 0, 1, 1], [], []>} : vector<16x32xbf16>, vector<32x32xbf16>, vector<16x32xf32> -> vector<16x32xf32>
    %c0_25 = arith.constant 0 : index
    %c0_26 = arith.constant 0 : index
    %41 = vector.load %arg9[%c0_25, %c0_26] : memref<1x32xf32, #tpu.memory_space<vmem>>, vector<1x32xf32>
    %42 = vector.broadcast %41 : vector<1x32xf32> to vector<16x32xf32>
    %43 = arith.addf %40, %42 : vector<16x32xf32>
    %c0_27 = arith.constant 0 : index
    %c0_28 = arith.constant 0 : index
    %44 = vector.load %arg10[%c0_27, %c0_28] : memref<32x32xbf16, #tpu.memory_space<vmem>>, vector<32x32xbf16>
    %cst_29 = arith.constant dense<0.000000e+00> : vector<16x32xf32>
    %45 = tpu.matmul %33, %44, %cst_29 {dimension_numbers = #tpu.dot_dimension_numbers<[1], [0], [0], [1], [0, 0, 1, 1], [], []>} : vector<16x32xbf16>, vector<32x32xbf16>, vector<16x32xf32> -> vector<16x32xf32>
    %c0_30 = arith.constant 0 : index
    %c0_31 = arith.constant 0 : index
    %46 = vector.load %arg11[%c0_30, %c0_31] : memref<1x32xf32, #tpu.memory_space<vmem>>, vector<1x32xf32>
    %47 = vector.broadcast %46 : vector<1x32xf32> to vector<16x32xf32>
    %48 = arith.addf %45, %47 : vector<16x32xf32>
    %49 = vector.shape_cast %38 : vector<16x32xf32> to vector<16x4x8xf32>
    %50 = tpu.transpose %49, [1, 0, 2] : vector<16x4x8xf32> -> vector<4x16x8xf32>
    %51 = arith.truncf %50 : vector<4x16x8xf32> to vector<4x16x8xbf16>
    %52 = vector.shape_cast %43 : vector<16x32xf32> to vector<16x4x8xf32>
    %53 = tpu.transpose %52, [1, 0, 2] : vector<16x4x8xf32> -> vector<4x16x8xf32>
    %54 = arith.truncf %53 : vector<4x16x8xf32> to vector<4x16x8xbf16>
    %55 = vector.shape_cast %48 : vector<16x32xf32> to vector<16x4x8xf32>
    %56 = tpu.transpose %55, [1, 0, 2] : vector<16x4x8xf32> -> vector<4x16x8xf32>
    %57 = arith.truncf %56 : vector<4x16x8xf32> to vector<4x16x8xbf16>
    "tpu.trace_start"() <{level = 10 : i32, message = "hqd,hkd->hqk"}> : () -> ()
    %cst_32 = arith.constant dense<0.000000e+00> : vector<4x16x16xf32>
    %58 = tpu.matmul %51, %54, %cst_32 {dimension_numbers = #tpu.dot_dimension_numbers<[2], [2], [1], [1], [0, 0, 0, 1, 1, 1], [0], [0]>} : vector<4x16x8xbf16>, vector<4x16x8xbf16>, vector<4x16x16xf32> -> vector<4x16x16xf32>
    "tpu.trace_stop"() : () -> ()
    %59 = vector.shape_cast %6 : vector<16x16xf32> to vector<1x16x16xf32>
    %60 = vector.broadcast %59 : vector<1x16x16xf32> to vector<4x16x16xf32>
    %61 = arith.addf %58, %60 : vector<4x16x16xf32>
    %cst_33 = arith.constant dense<0xFF800000> : vector<4x16xf32>
    %62 = vector.multi_reduction <maximumf>, %61, %cst_33 [2] : vector<4x16x16xf32> to vector<4x16xf32>
    %63 = vector.shape_cast %62 : vector<4x16xf32> to vector<4x16x1xf32>
    %64 = vector.broadcast %63 : vector<4x16x1xf32> to vector<4x16x16xf32>
    %65 = arith.subf %61, %64 : vector<4x16x16xf32>
    %66 = math.exp %65 : vector<4x16x16xf32>
    %cst_34 = arith.constant dense<0.000000e+00> : vector<4x16xf32>
    %67 = vector.multi_reduction <add>, %66, %cst_34 [2] : vector<4x16x16xf32> to vector<4x16xf32>
    %68 = vector.shape_cast %67 : vector<4x16xf32> to vector<4x16x1xf32>
    %69 = tpu.reciprocal %68 {approx = true} : vector<4x16x1xf32> -> vector<4x16x1xf32>
    %70 = vector.broadcast %69 : vector<4x16x1xf32> to vector<4x16x16xf32>
    %71 = arith.mulf %66, %70 : vector<4x16x16xf32>
    %72 = arith.truncf %71 : vector<4x16x16xf32> to vector<4x16x16xbf16>
    "tpu.trace_start"() <{level = 10 : i32, message = "hqk,hkd->hqd"}> : () -> ()
    %cst_35 = arith.constant dense<0.000000e+00> : vector<4x16x8xf32>
    %73 = tpu.matmul %72, %57, %cst_35 {dimension_numbers = #tpu.dot_dimension_numbers<[2], [1], [1], [2], [0, 0, 0, 1, 1, 2], [0], [0]>} : vector<4x16x16xbf16>, vector<4x16x8xbf16>, vector<4x16x8xf32> -> vector<4x16x8xf32>
    "tpu.trace_stop"() : () -> ()
    %74 = tpu.transpose %73, [1, 0, 2] : vector<4x16x8xf32> -> vector<16x4x8xf32>
    %75 = vector.shape_cast %74 : vector<16x4x8xf32> to vector<16x32xf32>
    %76 = arith.truncf %75 : vector<16x32xf32> to vector<16x32xbf16>
    %c0_36 = arith.constant 0 : index
    %c0_37 = arith.constant 0 : index
    %77 = vector.load %arg12[%c0_36, %c0_37] : memref<32x32xbf16, #tpu.memory_space<vmem>>, vector<32x32xbf16>
    %cst_38 = arith.constant dense<0.000000e+00> : vector<16x32xf32>
    %78 = tpu.matmul %76, %77, %cst_38 {dimension_numbers = #tpu.dot_dimension_numbers<[1], [0], [0], [1], [0, 0, 1, 1], [], []>} : vector<16x32xbf16>, vector<32x32xbf16>, vector<16x32xf32> -> vector<16x32xf32>
    %c0_39 = arith.constant 0 : index
    %c0_40 = arith.constant 0 : index
    %79 = vector.load %arg13[%c0_39, %c0_40] : memref<1x32xf32, #tpu.memory_space<vmem>>, vector<1x32xf32>
    %80 = vector.broadcast %79 : vector<1x32xf32> to vector<16x32xf32>
    %81 = arith.addf %78, %80 : vector<16x32xf32>
    %82 = arith.addf %5, %81 : vector<16x32xf32>
    %c0_41 = arith.constant 0 : index
    %c0_42 = arith.constant 0 : index
    %83 = vector.load %arg14[%c0_41, %c0_42] : memref<1x32xf32, #tpu.memory_space<vmem>>, vector<1x32xf32>
    %c0_43 = arith.constant 0 : index
    %c0_44 = arith.constant 0 : index
    %84 = vector.load %arg15[%c0_43, %c0_44] : memref<1x32xf32, #tpu.memory_space<vmem>>, vector<1x32xf32>
    %cst_45 = arith.constant dense<0.000000e+00> : vector<16xf32>
    %85 = vector.multi_reduction <add>, %82, %cst_45 [1] : vector<16x32xf32> to vector<16xf32>
    %86 = vector.shape_cast %85 : vector<16xf32> to vector<16x1xf32>
    %cst_46 = arith.constant 3.200000e+01 : f32
    %87 = vector.broadcast %cst_46 : f32 to vector<16x1xf32>
    %88 = arith.divf %86, %87 : vector<16x1xf32>
    %89 = arith.mulf %82, %82 : vector<16x32xf32>
    %cst_47 = arith.constant dense<0.000000e+00> : vector<16xf32>
    %90 = vector.multi_reduction <add>, %89, %cst_47 [1] : vector<16x32xf32> to vector<16xf32>
    %91 = vector.shape_cast %90 : vector<16xf32> to vector<16x1xf32>
    %cst_48 = arith.constant 3.200000e+01 : f32
    %92 = vector.broadcast %cst_48 : f32 to vector<16x1xf32>
    %93 = arith.divf %91, %92 : vector<16x1xf32>
    %94 = arith.mulf %88, %88 : vector<16x1xf32>
    %95 = arith.subf %93, %94 : vector<16x1xf32>
    %cst_49 = arith.constant 0.000000e+00 : f32
    %96 = vector.broadcast %cst_49 : f32 to vector<16x1xf32>
    %97 = arith.maximumf %95, %96 : vector<16x1xf32>
    %98 = vector.broadcast %88 : vector<16x1xf32> to vector<16x32xf32>
    %99 = arith.subf %82, %98 : vector<16x32xf32>
    %cst_50 = arith.constant 9.99999997E-7 : f32
    %100 = vector.broadcast %cst_50 : f32 to vector<16x1xf32>
    %101 = arith.addf %97, %100 : vector<16x1xf32>
    %102 = math.rsqrt %101 : vector<16x1xf32>
    %103 = vector.broadcast %102 : vector<16x1xf32> to vector<16x32xf32>
    %104 = arith.mulf %99, %103 : vector<16x32xf32>
    %105 = vector.broadcast %83 : vector<1x32xf32> to vector<16x32xf32>
    %106 = arith.mulf %104, %105 : vector<16x32xf32>
    %107 = vector.broadcast %84 : vector<1x32xf32> to vector<16x32xf32>
    %108 = arith.addf %106, %107 : vector<16x32xf32>
    %109 = arith.truncf %108 : vector<16x32xf32> to vector<16x32xbf16>
    %c0_51 = arith.constant 0 : index
    %c0_52 = arith.constant 0 : index
    %110 = vector.load %arg16[%c0_51, %c0_52] : memref<32x64xbf16, #tpu.memory_space<vmem>>, vector<32x64xbf16>
    %cst_53 = arith.constant dense<0.000000e+00> : vector<16x64xf32>
    %111 = tpu.matmul %109, %110, %cst_53 {dimension_numbers = #tpu.dot_dimension_numbers<[1], [0], [0], [1], [0, 0, 1, 1], [], []>} : vector<16x32xbf16>, vector<32x64xbf16>, vector<16x64xf32> -> vector<16x64xf32>
    %c0_54 = arith.constant 0 : index
    %c0_55 = arith.constant 0 : index
    %112 = vector.load %arg17[%c0_54, %c0_55] : memref<1x64xf32, #tpu.memory_space<vmem>>, vector<1x64xf32>
    %113 = vector.broadcast %112 : vector<1x64xf32> to vector<16x64xf32>
    %114 = arith.addf %111, %113 : vector<16x64xf32>
    %115 = arith.mulf %114, %114 : vector<16x64xf32>
    %116 = arith.mulf %114, %115 : vector<16x64xf32>
    %cst_56 = arith.constant 4.471500e-02 : f32
    %117 = vector.broadcast %cst_56 : f32 to vector<16x64xf32>
    %118 = arith.mulf %117, %116 : vector<16x64xf32>
    %119 = arith.addf %114, %118 : vector<16x64xf32>
    %cst_57 = arith.constant 0.797884583 : f32
    %120 = vector.broadcast %cst_57 : f32 to vector<16x64xf32>
    %121 = arith.mulf %120, %119 : vector<16x64xf32>
    %122 = math.tanh %121 : vector<16x64xf32>
    %cst_58 = arith.constant 1.000000e+00 : f32
    %123 = vector.broadcast %cst_58 : f32 to vector<16x64xf32>
    %124 = arith.addf %123, %122 : vector<16x64xf32>
    %cst_59 = arith.constant 5.000000e-01 : f32
    %125 = vector.broadcast %cst_59 : f32 to vector<16x64xf32>
    %126 = arith.mulf %125, %124 : vector<16x64xf32>
    %127 = arith.mulf %114, %126 : vector<16x64xf32>
    %128 = arith.truncf %127 : vector<16x64xf32> to vector<16x64xbf16>
    %c0_60 = arith.constant 0 : index
    %c0_61 = arith.constant 0 : index
    %129 = vector.load %arg18[%c0_60, %c0_61] : memref<64x32xbf16, #tpu.memory_space<vmem>>, vector<64x32xbf16>
    %cst_62 = arith.constant dense<0.000000e+00> : vector<16x32xf32>
    %130 = tpu.matmul %128, %129, %cst_62 {dimension_numbers = #tpu.dot_dimension_numbers<[1], [0], [0], [1], [0, 0, 1, 1], [], []>} : vector<16x64xbf16>, vector<64x32xbf16>, vector<16x32xf32> -> vector<16x32xf32>
    %c0_63 = arith.constant 0 : index
    %c0_64 = arith.constant 0 : index
    %131 = vector.load %arg19[%c0_63, %c0_64] : memref<1x32xf32, #tpu.memory_space<vmem>>, vector<1x32xf32>
    %132 = vector.broadcast %131 : vector<1x32xf32> to vector<16x32xf32>
    %133 = arith.addf %130, %132 : vector<16x32xf32>
    %134 = arith.addf %82, %133 : vector<16x32xf32>
    %c0_65 = arith.constant 0 : index
    %c0_66 = arith.constant 0 : index
    %135 = vector.load %arg20[%c0_65, %c0_66] : memref<1x32xf32, #tpu.memory_space<vmem>>, vector<1x32xf32>
    %c0_67 = arith.constant 0 : index
    %c0_68 = arith.constant 0 : index
    %136 = vector.load %arg21[%c0_67, %c0_68] : memref<1x32xf32, #tpu.memory_space<vmem>>, vector<1x32xf32>
    %cst_69 = arith.constant dense<0.000000e+00> : vector<16xf32>
    %137 = vector.multi_reduction <add>, %134, %cst_69 [1] : vector<16x32xf32> to vector<16xf32>
    %138 = vector.shape_cast %137 : vector<16xf32> to vector<16x1xf32>
    %cst_70 = arith.constant 3.200000e+01 : f32
    %139 = vector.broadcast %cst_70 : f32 to vector<16x1xf32>
    %140 = arith.divf %138, %139 : vector<16x1xf32>
    %141 = arith.mulf %134, %134 : vector<16x32xf32>
    %cst_71 = arith.constant dense<0.000000e+00> : vector<16xf32>
    %142 = vector.multi_reduction <add>, %141, %cst_71 [1] : vector<16x32xf32> to vector<16xf32>
    %143 = vector.shape_cast %142 : vector<16xf32> to vector<16x1xf32>
    %cst_72 = arith.constant 3.200000e+01 : f32
    %144 = vector.broadcast %cst_72 : f32 to vector<16x1xf32>
    %145 = arith.divf %143, %144 : vector<16x1xf32>
    %146 = arith.mulf %140, %140 : vector<16x1xf32>
    %147 = arith.subf %145, %146 : vector<16x1xf32>
    %cst_73 = arith.constant 0.000000e+00 : f32
    %148 = vector.broadcast %cst_73 : f32 to vector<16x1xf32>
    %149 = arith.maximumf %147, %148 : vector<16x1xf32>
    %150 = vector.broadcast %140 : vector<16x1xf32> to vector<16x32xf32>
    %151 = arith.subf %134, %150 : vector<16x32xf32>
    %cst_74 = arith.constant 9.99999997E-7 : f32
    %152 = vector.broadcast %cst_74 : f32 to vector<16x1xf32>
    %153 = arith.addf %149, %152 : vector<16x1xf32>
    %154 = math.rsqrt %153 : vector<16x1xf32>
    %155 = vector.broadcast %154 : vector<16x1xf32> to vector<16x32xf32>
    %156 = arith.mulf %151, %155 : vector<16x32xf32>
    %157 = vector.broadcast %135 : vector<1x32xf32> to vector<16x32xf32>
    %158 = arith.mulf %156, %157 : vector<16x32xf32>
    %159 = vector.broadcast %136 : vector<1x32xf32> to vector<16x32xf32>
    %160 = arith.addf %158, %159 : vector<16x32xf32>
    %161 = arith.truncf %160 : vector<16x32xf32> to vector<16x32xbf16>
    %c0_75 = arith.constant 0 : index
    %c0_76 = arith.constant 0 : index
    %162 = vector.load %arg22[%c0_75, %c0_76] : memref<32x32xbf16, #tpu.memory_space<vmem>>, vector<32x32xbf16>
    %cst_77 = arith.constant dense<0.000000e+00> : vector<16x32xf32>
    %163 = tpu.matmul %161, %162, %cst_77 {dimension_numbers = #tpu.dot_dimension_numbers<[1], [0], [0], [1], [0, 0, 1, 1], [], []>} : vector<16x32xbf16>, vector<32x32xbf16>, vector<16x32xf32> -> vector<16x32xf32>
    %c0_78 = arith.constant 0 : index
    %c0_79 = arith.constant 0 : index
    %164 = vector.load %arg23[%c0_78, %c0_79] : memref<1x32xf32, #tpu.memory_space<vmem>>, vector<1x32xf32>
    %165 = vector.broadcast %164 : vector<1x32xf32> to vector<16x32xf32>
    %166 = arith.addf %163, %165 : vector<16x32xf32>
    %c0_80 = arith.constant 0 : index
    %c0_81 = arith.constant 0 : index
    %167 = vector.load %arg24[%c0_80, %c0_81] : memref<32x32xbf16, #tpu.memory_space<vmem>>, vector<32x32xbf16>
    %cst_82 = arith.constant dense<0.000000e+00> : vector<16x32xf32>
    %168 = tpu.matmul %161, %167, %cst_82 {dimension_numbers = #tpu.dot_dimension_numbers<[1], [0], [0], [1], [0, 0, 1, 1], [], []>} : vector<16x32xbf16>, vector<32x32xbf16>, vector<16x32xf32> -> vector<16x32xf32>
    %c0_83 = arith.constant 0 : index
    %c0_84 = arith.constant 0 : index
    %169 = vector.load %arg25[%c0_83, %c0_84] : memref<1x32xf32, #tpu.memory_space<vmem>>, vector<1x32xf32>
    %170 = vector.broadcast %169 : vector<1x32xf32> to vector<16x32xf32>
    %171 = arith.addf %168, %170 : vector<16x32xf32>
    %c0_85 = arith.constant 0 : index
    %c0_86 = arith.constant 0 : index
    %172 = vector.load %arg26[%c0_85, %c0_86] : memref<32x32xbf16, #tpu.memory_space<vmem>>, vector<32x32xbf16>
    %cst_87 = arith.constant dense<0.000000e+00> : vector<16x32xf32>
    %173 = tpu.matmul %161, %172, %cst_87 {dimension_numbers = #tpu.dot_dimension_numbers<[1], [0], [0], [1], [0, 0, 1, 1], [], []>} : vector<16x32xbf16>, vector<32x32xbf16>, vector<16x32xf32> -> vector<16x32xf32>
    %c0_88 = arith.constant 0 : index
    %c0_89 = arith.constant 0 : index
    %174 = vector.load %arg27[%c0_88, %c0_89] : memref<1x32xf32, #tpu.memory_space<vmem>>, vector<1x32xf32>
    %175 = vector.broadcast %174 : vector<1x32xf32> to vector<16x32xf32>
    %176 = arith.addf %173, %175 : vector<16x32xf32>
    %177 = vector.shape_cast %166 : vector<16x32xf32> to vector<16x4x8xf32>
    %178 = tpu.transpose %177, [1, 0, 2] : vector<16x4x8xf32> -> vector<4x16x8xf32>
    %179 = arith.truncf %178 : vector<4x16x8xf32> to vector<4x16x8xbf16>
    %180 = vector.shape_cast %171 : vector<16x32xf32> to vector<16x4x8xf32>
    %181 = tpu.transpose %180, [1, 0, 2] : vector<16x4x8xf32> -> vector<4x16x8xf32>
    %182 = arith.truncf %181 : vector<4x16x8xf32> to vector<4x16x8xbf16>
    %183 = vector.shape_cast %176 : vector<16x32xf32> to vector<16x4x8xf32>
    %184 = tpu.transpose %183, [1, 0, 2] : vector<16x4x8xf32> -> vector<4x16x8xf32>
    %185 = arith.truncf %184 : vector<4x16x8xf32> to vector<4x16x8xbf16>
    "tpu.trace_start"() <{level = 10 : i32, message = "hqd,hkd->hqk"}> : () -> ()
    %cst_90 = arith.constant dense<0.000000e+00> : vector<4x16x16xf32>
    %186 = tpu.matmul %179, %182, %cst_90 {dimension_numbers = #tpu.dot_dimension_numbers<[2], [2], [1], [1], [0, 0, 0, 1, 1, 1], [0], [0]>} : vector<4x16x8xbf16>, vector<4x16x8xbf16>, vector<4x16x16xf32> -> vector<4x16x16xf32>
    "tpu.trace_stop"() : () -> ()
    %187 = vector.shape_cast %6 : vector<16x16xf32> to vector<1x16x16xf32>
    %188 = vector.broadcast %187 : vector<1x16x16xf32> to vector<4x16x16xf32>
    %189 = arith.addf %186, %188 : vector<4x16x16xf32>
    %cst_91 = arith.constant dense<0xFF800000> : vector<4x16xf32>
    %190 = vector.multi_reduction <maximumf>, %189, %cst_91 [2] : vector<4x16x16xf32> to vector<4x16xf32>
    %191 = vector.shape_cast %190 : vector<4x16xf32> to vector<4x16x1xf32>
    %192 = vector.broadcast %191 : vector<4x16x1xf32> to vector<4x16x16xf32>
    %193 = arith.subf %189, %192 : vector<4x16x16xf32>
    %194 = math.exp %193 : vector<4x16x16xf32>
    %cst_92 = arith.constant dense<0.000000e+00> : vector<4x16xf32>
    %195 = vector.multi_reduction <add>, %194, %cst_92 [2] : vector<4x16x16xf32> to vector<4x16xf32>
    %196 = vector.shape_cast %195 : vector<4x16xf32> to vector<4x16x1xf32>
    %197 = tpu.reciprocal %196 {approx = true} : vector<4x16x1xf32> -> vector<4x16x1xf32>
    %198 = vector.broadcast %197 : vector<4x16x1xf32> to vector<4x16x16xf32>
    %199 = arith.mulf %194, %198 : vector<4x16x16xf32>
    %200 = arith.truncf %199 : vector<4x16x16xf32> to vector<4x16x16xbf16>
    "tpu.trace_start"() <{level = 10 : i32, message = "hqk,hkd->hqd"}> : () -> ()
    %cst_93 = arith.constant dense<0.000000e+00> : vector<4x16x8xf32>
    %201 = tpu.matmul %200, %185, %cst_93 {dimension_numbers = #tpu.dot_dimension_numbers<[2], [1], [1], [2], [0, 0, 0, 1, 1, 2], [0], [0]>} : vector<4x16x16xbf16>, vector<4x16x8xbf16>, vector<4x16x8xf32> -> vector<4x16x8xf32>
    "tpu.trace_stop"() : () -> ()
    %202 = tpu.transpose %201, [1, 0, 2] : vector<4x16x8xf32> -> vector<16x4x8xf32>
    %203 = vector.shape_cast %202 : vector<16x4x8xf32> to vector<16x32xf32>
    %204 = arith.truncf %203 : vector<16x32xf32> to vector<16x32xbf16>
    %c0_94 = arith.constant 0 : index
    %c0_95 = arith.constant 0 : index
    %205 = vector.load %arg28[%c0_94, %c0_95] : memref<32x32xbf16, #tpu.memory_space<vmem>>, vector<32x32xbf16>
    %cst_96 = arith.constant dense<0.000000e+00> : vector<16x32xf32>
    %206 = tpu.matmul %204, %205, %cst_96 {dimension_numbers = #tpu.dot_dimension_numbers<[1], [0], [0], [1], [0, 0, 1, 1], [], []>} : vector<16x32xbf16>, vector<32x32xbf16>, vector<16x32xf32> -> vector<16x32xf32>
    %c0_97 = arith.constant 0 : index
    %c0_98 = arith.constant 0 : index
    %207 = vector.load %arg29[%c0_97, %c0_98] : memref<1x32xf32, #tpu.memory_space<vmem>>, vector<1x32xf32>
    %208 = vector.broadcast %207 : vector<1x32xf32> to vector<16x32xf32>
    %209 = arith.addf %206, %208 : vector<16x32xf32>
    %210 = arith.addf %134, %209 : vector<16x32xf32>
    %c0_99 = arith.constant 0 : index
    %c0_100 = arith.constant 0 : index
    %211 = vector.load %arg30[%c0_99, %c0_100] : memref<1x32xf32, #tpu.memory_space<vmem>>, vector<1x32xf32>
    %c0_101 = arith.constant 0 : index
    %c0_102 = arith.constant 0 : index
    %212 = vector.load %arg31[%c0_101, %c0_102] : memref<1x32xf32, #tpu.memory_space<vmem>>, vector<1x32xf32>
    %cst_103 = arith.constant dense<0.000000e+00> : vector<16xf32>
    %213 = vector.multi_reduction <add>, %210, %cst_103 [1] : vector<16x32xf32> to vector<16xf32>
    %214 = vector.shape_cast %213 : vector<16xf32> to vector<16x1xf32>
    %cst_104 = arith.constant 3.200000e+01 : f32
    %215 = vector.broadcast %cst_104 : f32 to vector<16x1xf32>
    %216 = arith.divf %214, %215 : vector<16x1xf32>
    %217 = arith.mulf %210, %210 : vector<16x32xf32>
    %cst_105 = arith.constant dense<0.000000e+00> : vector<16xf32>
    %218 = vector.multi_reduction <add>, %217, %cst_105 [1] : vector<16x32xf32> to vector<16xf32>
    %219 = vector.shape_cast %218 : vector<16xf32> to vector<16x1xf32>
    %cst_106 = arith.constant 3.200000e+01 : f32
    %220 = vector.broadcast %cst_106 : f32 to vector<16x1xf32>
    %221 = arith.divf %219, %220 : vector<16x1xf32>
    %222 = arith.mulf %216, %216 : vector<16x1xf32>
    %223 = arith.subf %221, %222 : vector<16x1xf32>
    %cst_107 = arith.constant 0.000000e+00 : f32
    %224 = vector.broadcast %cst_107 : f32 to vector<16x1xf32>
    %225 = arith.maximumf %223, %224 : vector<16x1xf32>
    %226 = vector.broadcast %216 : vector<16x1xf32> to vector<16x32xf32>
    %227 = arith.subf %210, %226 : vector<16x32xf32>
    %cst_108 = arith.constant 9.99999997E-7 : f32
    %228 = vector.broadcast %cst_108 : f32 to vector<16x1xf32>
    %229 = arith.addf %225, %228 : vector<16x1xf32>
    %230 = math.rsqrt %229 : vector<16x1xf32>
    %231 = vector.broadcast %230 : vector<16x1xf32> to vector<16x32xf32>
    %232 = arith.mulf %227, %231 : vector<16x32xf32>
    %233 = vector.broadcast %211 : vector<1x32xf32> to vector<16x32xf32>
    %234 = arith.mulf %232, %233 : vector<16x32xf32>
    %235 = vector.broadcast %212 : vector<1x32xf32> to vector<16x32xf32>
    %236 = arith.addf %234, %235 : vector<16x32xf32>
    %237 = arith.truncf %236 : vector<16x32xf32> to vector<16x32xbf16>
    %c0_109 = arith.constant 0 : index
    %c0_110 = arith.constant 0 : index
    %238 = vector.load %arg32[%c0_109, %c0_110] : memref<32x64xbf16, #tpu.memory_space<vmem>>, vector<32x64xbf16>
    %cst_111 = arith.constant dense<0.000000e+00> : vector<16x64xf32>
    %239 = tpu.matmul %237, %238, %cst_111 {dimension_numbers = #tpu.dot_dimension_numbers<[1], [0], [0], [1], [0, 0, 1, 1], [], []>} : vector<16x32xbf16>, vector<32x64xbf16>, vector<16x64xf32> -> vector<16x64xf32>
    %c0_112 = arith.constant 0 : index
    %c0_113 = arith.constant 0 : index
    %240 = vector.load %arg33[%c0_112, %c0_113] : memref<1x64xf32, #tpu.memory_space<vmem>>, vector<1x64xf32>
    %241 = vector.broadcast %240 : vector<1x64xf32> to vector<16x64xf32>
    %242 = arith.addf %239, %241 : vector<16x64xf32>
    %243 = arith.mulf %242, %242 : vector<16x64xf32>
    %244 = arith.mulf %242, %243 : vector<16x64xf32>
    %cst_114 = arith.constant 4.471500e-02 : f32
    %245 = vector.broadcast %cst_114 : f32 to vector<16x64xf32>
    %246 = arith.mulf %245, %244 : vector<16x64xf32>
    %247 = arith.addf %242, %246 : vector<16x64xf32>
    %cst_115 = arith.constant 0.797884583 : f32
    %248 = vector.broadcast %cst_115 : f32 to vector<16x64xf32>
    %249 = arith.mulf %248, %247 : vector<16x64xf32>
    %250 = math.tanh %249 : vector<16x64xf32>
    %cst_116 = arith.constant 1.000000e+00 : f32
    %251 = vector.broadcast %cst_116 : f32 to vector<16x64xf32>
    %252 = arith.addf %251, %250 : vector<16x64xf32>
    %cst_117 = arith.constant 5.000000e-01 : f32
    %253 = vector.broadcast %cst_117 : f32 to vector<16x64xf32>
    %254 = arith.mulf %253, %252 : vector<16x64xf32>
    %255 = arith.mulf %242, %254 : vector<16x64xf32>
    %256 = arith.truncf %255 : vector<16x64xf32> to vector<16x64xbf16>
    %c0_118 = arith.constant 0 : index
    %c0_119 = arith.constant 0 : index
    %257 = vector.load %arg34[%c0_118, %c0_119] : memref<64x32xbf16, #tpu.memory_space<vmem>>, vector<64x32xbf16>
    %cst_120 = arith.constant dense<0.000000e+00> : vector<16x32xf32>
    %258 = tpu.matmul %256, %257, %cst_120 {dimension_numbers = #tpu.dot_dimension_numbers<[1], [0], [0], [1], [0, 0, 1, 1], [], []>} : vector<16x64xbf16>, vector<64x32xbf16>, vector<16x32xf32> -> vector<16x32xf32>
    %c0_121 = arith.constant 0 : index
    %c0_122 = arith.constant 0 : index
    %259 = vector.load %arg35[%c0_121, %c0_122] : memref<1x32xf32, #tpu.memory_space<vmem>>, vector<1x32xf32>
    %260 = vector.broadcast %259 : vector<1x32xf32> to vector<16x32xf32>
    %261 = arith.addf %258, %260 : vector<16x32xf32>
    %262 = arith.addf %210, %261 : vector<16x32xf32>
    %263 = vector.shape_cast %262 : vector<16x32xf32> to vector<2x8x32xf32>
    %264 = vector.extract_strided_slice %263 {offsets = [0, 0, 0], sizes = [2, 1, 32], strides = [1, 1, 1]} : vector<2x8x32xf32> to vector<2x1x32xf32>
    %265 = vector.shape_cast %264 : vector<2x1x32xf32> to vector<2x32xf32>
    %c0_123 = arith.constant 0 : index
    %c0_124 = arith.constant 0 : index
    %266 = vector.load %arg36[%c0_123, %c0_124] : memref<1x32xf32, #tpu.memory_space<vmem>>, vector<1x32xf32>
    %c0_125 = arith.constant 0 : index
    %c0_126 = arith.constant 0 : index
    %267 = vector.load %arg37[%c0_125, %c0_126] : memref<1x32xf32, #tpu.memory_space<vmem>>, vector<1x32xf32>
    %cst_127 = arith.constant dense<0.000000e+00> : vector<2xf32>
    %268 = vector.multi_reduction <add>, %265, %cst_127 [1] : vector<2x32xf32> to vector<2xf32>
    %269 = vector.shape_cast %268 : vector<2xf32> to vector<2x1xf32>
    %cst_128 = arith.constant 3.200000e+01 : f32
    %270 = vector.broadcast %cst_128 : f32 to vector<2x1xf32>
    %271 = arith.divf %269, %270 : vector<2x1xf32>
    %272 = arith.mulf %265, %265 : vector<2x32xf32>
    %cst_129 = arith.constant dense<0.000000e+00> : vector<2xf32>
    %273 = vector.multi_reduction <add>, %272, %cst_129 [1] : vector<2x32xf32> to vector<2xf32>
    %274 = vector.shape_cast %273 : vector<2xf32> to vector<2x1xf32>
    %cst_130 = arith.constant 3.200000e+01 : f32
    %275 = vector.broadcast %cst_130 : f32 to vector<2x1xf32>
    %276 = arith.divf %274, %275 : vector<2x1xf32>
    %277 = arith.mulf %271, %271 : vector<2x1xf32>
    %278 = arith.subf %276, %277 : vector<2x1xf32>
    %cst_131 = arith.constant 0.000000e+00 : f32
    %279 = vector.broadcast %cst_131 : f32 to vector<2x1xf32>
    %280 = arith.maximumf %278, %279 : vector<2x1xf32>
    %281 = vector.broadcast %271 : vector<2x1xf32> to vector<2x32xf32>
    %282 = arith.subf %265, %281 : vector<2x32xf32>
    %cst_132 = arith.constant 9.99999997E-7 : f32
    %283 = vector.broadcast %cst_132 : f32 to vector<2x1xf32>
    %284 = arith.addf %280, %283 : vector<2x1xf32>
    %285 = math.rsqrt %284 : vector<2x1xf32>
    %286 = vector.broadcast %285 : vector<2x1xf32> to vector<2x32xf32>
    %287 = arith.mulf %282, %286 : vector<2x32xf32>
    %288 = vector.broadcast %266 : vector<1x32xf32> to vector<2x32xf32>
    %289 = arith.mulf %287, %288 : vector<2x32xf32>
    %290 = vector.broadcast %267 : vector<1x32xf32> to vector<2x32xf32>
    %291 = arith.addf %289, %290 : vector<2x32xf32>
    %c0_133 = arith.constant 0 : index
    %c0_134 = arith.constant 0 : index
    %292 = vector.load %arg38[%c0_133, %c0_134] : memref<2x32xf32, #tpu.memory_space<vmem>>, vector<2x32xf32>
    tpu.vector_store %arg38[%c0_133, %c0_134], %291 {strides = array<i32>} : memref<2x32xf32, #tpu.memory_space<vmem>>, vector<2x32xf32>,
    return
  }
}

</mosaic_0001>

<bundles_post_ra>
// kernel: vit_forward.1
= control target key start
LH: loop header
LB: loop body
LE: loop exit
PB: predicated region body
PF: predicated region fallthrough
CT: control target
= control target key end

     0   :  { %s5945_s6 = smov 1   ;;  %s5946_s10 = smov 2   ;;  %s7103_s0 = inlined_call_operand.smem [shape: u32[39], index: -1, kind: input, shape index: {}] }
   0x1   :  { %s6002_s5 = sld [smem:[%s7103_s0]]   ;;  %s5947_s14 = smov 3  }
   0x2   :  { %s6007_s9 = sld [smem:[%s7103_s0 + %s5945_s6]]   ;;  %s5948_s18 = smov 4  }
   0x3   :  { %s6012_s13 = sld [smem:[%s7103_s0 + %s5946_s10]]   ;;  %s5949_s22 = smov 5  }
   0x4   :  { %s6017_s17 = sld [smem:[%s7103_s0 + %s5947_s14]]   ;;  %s5950_s26 = smov 6  }
   0x5   :  { %s6022_s21 = sld [smem:[%s7103_s0 + %s5948_s18]]   ;;  %s5951_s30 = smov 7  }
   0x6   :  { %s6027_s25 = sld [smem:[%s7103_s0 + %s5949_s22]]   ;;  %s5952_s4 = smov 8  }
   0x7   :  { %s6032_s29 = sld [smem:[%s7103_s0 + %s5950_s26]]   ;;  %s5953_s10 = smov 9  }
   0x8   :  { %s6037_s3 = sld [smem:[%s7103_s0 + %s5951_s30]]   ;;  %s5954_s15 = smov 10  }
   0x9   :  { %s6042_s8 = sld [smem:[%s7103_s0 + %s5952_s4]]   ;;  %s5955_s20 = smov 11  }
   0xa   :  { %s6047_s14 = sld [smem:[%s7103_s0 + %s5953_s10]]   ;;  %s5956_s26 = smov 12  }
   0xb   :  { %s6052_s19 = sld [smem:[%s7103_s0 + %s5954_s15]]   ;;  %s5957_s1 = smov 13  }
   0xc   :  { %s6057_s24 = sld [smem:[%s7103_s0 + %s5955_s20]]   ;;  %s5958_s7 = smov 14  }
   0xd   :  { %s6062_s30 = sld [smem:[%s7103_s0 + %s5956_s26]]   ;;  %s5959_s15 = smov 15  }
   0xe   :  { %s6067_s6 = sld [smem:[%s7103_s0 + %s5957_s1]]   ;;  %s5960_s22 = smov 16  }
   0xf   :  { %s6072_s12 = sld [smem:[%s7103_s0 + %s5958_s7]]   ;;  %s5961_s28 = smov 17  }
  0x10   :  { %s6077_s20 = sld [smem:[%s7103_s0 + %s5959_s15]]   ;;  %s5962_s7 = smov 18  }
  0x11   :  { %s6082_s27 = sld [smem:[%s7103_s0 + %s5960_s22]]   ;;  %s5963_s15 = smov 19  }
  0x12   :  { %s6087_s4 = sld [smem:[%s7103_s0 + %s5961_s28]]   ;;  %s5964_s22 = smov 20  }
  0x13   :  { %s5965_s28 = smov 21  }
  0x15   :  { %7112 = sst [smem:[#allocation5_spill]] %s6072_s12 }
  0x16   :  { %7113 = sst [smem:[#allocation6_spill]] %s6077_s20 }
  0x17   :  { %7114 = sst [smem:[#allocation7_spill]] %s6082_s27 }
  0x18   :  { %7115 = sst [smem:[#allocation8_spill]] %s6087_s4 }
  0x19   :  { %s6092_s12 = sld [smem:[%s7103_s0 + %s5962_s7]]   ;;  %s5966_s7 = smov 22  }
  0x1a   :  { %s6097_s20 = sld [smem:[%s7103_s0 + %s5963_s15]]   ;;  %s5967_s15 = smov 23  }
  0x1b   :  { %s6102_s27 = sld [smem:[%s7103_s0 + %s5964_s22]]   ;;  %s5968_s22 = smov 24  }
  0x1c   :  { %s6107_s4 = sld [smem:[%s7103_s0 + %s5965_s28]]   ;;  %s5969_s28 = smov 25  }
  0x1f   :  { %7116 = sst [smem:[#allocation9_spill]] %s6092_s12 }
  0x20   :  { %7117 = sst [smem:[#allocation10_spill]] %s6097_s20 }
  0x21   :  { %7118 = sst [smem:[#allocation11_spill]] %s6102_s27 }
  0x22   :  { %7119 = sst [smem:[#allocation12_spill]] %s6107_s4 }
  0x23   :  { %s6112_s12 = sld [smem:[%s7103_s0 + %s5966_s7]]   ;;  %s5970_s7 = smov 26  }
  0x24   :  { %s6117_s20 = sld [smem:[%s7103_s0 + %s5967_s15]]   ;;  %s5971_s15 = smov 27  }
  0x25   :  { %s6122_s27 = sld [smem:[%s7103_s0 + %s5968_s22]]   ;;  %s5972_s22 = smov 28  }
  0x26   :  { %s6127_s4 = sld [smem:[%s7103_s0 + %s5969_s28]]   ;;  %s5973_s28 = smov 29  }
  0x29   :  { %7120 = sst [smem:[#allocation13_spill]] %s6112_s12 }
  0x2a   :  { %7121 = sst [smem:[#allocation14_spill]] %s6117_s20 }
  0x2b   :  { %7122 = sst [smem:[#allocation15_spill]] %s6122_s27 }
  0x2c   :  { %7123 = sst [smem:[#allocation16_spill]] %s6127_s4 }
  0x2d   :  { %s6132_s12 = sld [smem:[%s7103_s0 + %s5970_s7]]   ;;  %s5974_s7 = smov 30  }
  0x2e   :  { %s6137_s20 = sld [smem:[%s7103_s0 + %s5971_s15]]   ;;  %s5975_s15 = smov 31  }
  0x2f   :  { %s6142_s27 = sld [smem:[%s7103_s0 + %s5972_s22]]   ;;  %s5976_s22 = smov 32  }
  0x30   :  { %s6147_s4 = sld [smem:[%s7103_s0 + %s5973_s28]]   ;;  %s5977_s28 = smov 33  }
  0x33   :  { %7124 = sst [smem:[#allocation17_spill]] %s6132_s12 }
  0x34   :  { %7125 = sst [smem:[#allocation18_spill]] %s6137_s20 }
  0x35   :  { %7126 = sst [smem:[#allocation19_spill]] %s6142_s27 }
  0x36   :  { %7127 = sst [smem:[#allocation20_spill]] %s6147_s4 }
  0x37   :  { %s6152_s12 = sld [smem:[%s7103_s0 + %s5974_s7]]   ;;  %s5978_s7 = smov 34  }
  0x38   :  { %s6157_s20 = sld [smem:[%s7103_s0 + %s5975_s15]]   ;;  %s5979_s15 = smov 35  }
  0x39   :  { %s6162_s27 = sld [smem:[%s7103_s0 + %s5976_s22]]   ;;  %s5980_s22 = smov 36  }
  0x3a   :  { %s6167_s4 = sld [smem:[%s7103_s0 + %s5977_s28]]   ;;  %s5981_s28 = smov 37  }
  0x3d   :  { %7128 = sst [smem:[#allocation21_spill]] %s6152_s12 }
  0x3e   :  { %7129 = sst [smem:[#allocation22_spill]] %s6157_s20 }
  0x3f   :  { %7130 = sst [smem:[#allocation23_spill]] %s6162_s27 }
  0x40   :  { %7131 = sst [smem:[#allocation24_spill]] %s6167_s4 }
  0x41   :  { %s6172_s12 = sld [smem:[%s7103_s0 + %s5978_s7]]   ;;  %s5982_s7 = smov 38  }
  0x42   :  { %s6177_s20 = sld [smem:[%s7103_s0 + %s5979_s15]]  }
  0x43   :  { %s6182_s27 = sld [smem:[%s7103_s0 + %s5980_s22]]  }
  0x44   :  { %s6187_s4 = sld [smem:[%s7103_s0 + %s5981_s28]]  }
  0x47   :  { %7132 = sst [smem:[#allocation25_spill]] %s6172_s12 }
  0x48   :  { %s6192_s12 = sld [smem:[%s7103_s0 + %s5982_s7]]  }
  0x49   :  { %v5753_v0 = vld [vmem:[%s6007_s9 + $0x40] sm:$0xff]   ;;  %v5757_v4 = vld [vmem:[%s6007_s9 + $0x48] sm:$0xff]   ;;  %v5761_v8 = vld [vmem:[%s6007_s9 + $0x50] sm:$0xff]  }
  0x4a   :  { %v5754_v1 = vld [vmem:[%s6007_s9] sm:$0xff]   ;;  %5336 = vmatprep.subr.bf16.mxu0 %v5753_v0  ;;  %v5758_v5 = vld [vmem:[%s6007_s9 + $0x8] sm:$0xff]   ;;  %v5762_v9 = vld [vmem:[%s6007_s9 + $0x10] sm:$0xff]  }
  0x4b   :  { %v5755_v2 = vld [vmem:[%s6007_s9 + $0xc0] sm:$0xff]   ;;  %5337 = vmatpush3.bf16.msra.mxu0 %v5754_v1  ;;  %v5759_v6 = vld [vmem:[%s6007_s9 + $0xc8] sm:$0xff]   ;;  %v5763_v10 = vld [vmem:[%s6007_s9 + $0xd0] sm:$0xff]  }
  0x4c   :  { %v5756_v3 = vld [vmem:[%s6007_s9 + $0x80] sm:$0xff]   ;;  %5358 = vmatprep.subr.bf16.mxu1 %v5755_v2  ;;  %5338 = vmatprep.subr.bf16.mxu0 %v5757_v4  ;;  %v5760_v7 = vld [vmem:[%s6007_s9 + $0x88] sm:$0xff]   ;;  %v5764_v11 = vld [vmem:[%s6007_s9 + $0x90] sm:$0xff]  }
  0x4d   :  { %5359 = vmatpush3.bf16.msra.mxu1 %v5756_v3  ;;  %v5765_v12 = vld [vmem:[%s6007_s9 + $0x58] sm:$0xff]   ;;  %v5769_v16 = vld [vmem:[%s6007_s9 + $0x60] sm:$0xff]   ;;  %v5773_v20 = vld [vmem:[%s6007_s9 + $0x68] sm:$0xff]  }
  0x4e   :  { %5360 = vmatprep.subr.bf16.mxu1 %v5759_v6  ;;  %v5766_v13 = vld [vmem:[%s6007_s9 + $0x18] sm:$0xff]   ;;  %v5770_v17 = vld [vmem:[%s6007_s9 + $0x20] sm:$0xff]   ;;  %v5774_v21 = vld [vmem:[%s6007_s9 + $0x28] sm:$0xff]  }
  0x4f   :  { %5339 = vmatpush3.bf16.msra.mxu0 %v5758_v5  ;;  %v5767_v14 = vld [vmem:[%s6007_s9 + $0xd8] sm:$0xff]   ;;  %v5771_v18 = vld [vmem:[%s6007_s9 + $0xe0] sm:$0xff]   ;;  %v5775_v22 = vld [vmem:[%s6007_s9 + $0xe8] sm:$0xff]  }
  0x50   :  { %5340 = vmatprep.subr.bf16.mxu0 %v5761_v8  ;;  %v5768_v15 = vld [vmem:[%s6007_s9 + $0x98] sm:$0xff]   ;;  %v5772_v19 = vld [vmem:[%s6007_s9 + $0xa0] sm:$0xff]   ;;  %v5776_v23 = vld [vmem:[%s6007_s9 + $0xa8] sm:$0xff]  }
  0x51   :  { %5361 = vmatpush3.bf16.msra.mxu1 %v5760_v7  ;;  %v5777_v24 = vld [vmem:[%s6007_s9 + $0x70] sm:$0xff]   ;;  %v5781_v28 = vld [vmem:[%s6007_s9 + $0x78] sm:$0xff]   ;;  %v161_v31 = vld [vmem:[%s6002_s5 + $0x8] sm:$0xff] }
  0x52   :  { %5362 = vmatprep.subr.bf16.mxu1 %v5763_v10  ;;  %v5778_v25 = vld [vmem:[%s6007_s9 + $0x30] sm:$0xff]   ;;  %v5782_v29 = vld [vmem:[%s6007_s9 + $0x38] sm:$0xff]   ;;  %v160_v35 = vld [vmem:[%s6002_s5] sm:$0xff] }
  0x53   :  { %5341 = vmatpush3.bf16.msra.mxu0 %v5762_v9  ;;  %v5779_v26 = vld [vmem:[%s6007_s9 + $0xf0] sm:$0xff]   ;;  %v5783_v30 = vld [vmem:[%s6007_s9 + $0xf8] sm:$0xff]   ;;  %v5785_v38 = vld [vmem:[%s6007_s9 + $0x140] sm:$0xff]  }
  0x54   :  { %5342 = vmatprep.subr.bf16.mxu0 %v5765_v12  ;;  %v5780_v27 = vld [vmem:[%s6007_s9 + $0xb0] sm:$0xff]   ;;  %v167_v32 = vld [vmem:[%s6002_s5 + $0x38] sm:$0xff]  ;;  %v169_v40 = vld [vmem:[%s6002_s5 + $0x48] sm:$0xff] }
  0x55   :  { %5363 = vmatpush3.bf16.msra.mxu1 %v5764_v11  ;;  %v173_v33 = vpack.c.bf16 %v167_v32, %v161_v31  ;;  %v5784_v34 = vld [vmem:[%s6007_s9 + $0xb8] sm:$0xff]   ;;  %v166_v36 = vld [vmem:[%s6002_s5 + $0x30] sm:$0xff]  ;;  %v5786_v42 = vld [vmem:[%s6007_s9 + $0x100] sm:$0xff]  }
  0x56   :  { %5364 = vmatprep.subr.bf16.mxu1 %v5767_v14  ;;  %v172_v37 = vpack.c.bf16 %v166_v36, %v160_v35  ;;  %v163_v39 = vld [vmem:[%s6002_s5 + $0x18] sm:$0xff]  ;;  %v162_v43 = vld [vmem:[%s6002_s5 + $0x10] sm:$0xff]  ;;  %v168_v44 = vld [vmem:[%s6002_s5 + $0x40] sm:$0xff] }
  0x57   :  { %5343 = vmatpush3.bf16.msra.mxu0 %v5766_v13  ;;  %596 = vmatprep.mubr.bf16.mxu0 %v173_v33  ;;  %v175_v41 = vpack.c.bf16 %v169_v40, %v163_v39  ;;  %v174_v45 = vpack.c.bf16 %v168_v44, %v162_v43  ;;  %v5787_v46 = vld [vmem:[%s6007_s9 + $0x148] sm:$0xff]   ;;  %v5789_v48 = vld [vmem:[%s6007_s9 + $0x150] sm:$0xff]   ;;  %v5791_v50 = vld [vmem:[%s6007_s9 + $0x158] sm:$0xff]  }
  0x58   :  { %5344 = vmatprep.subr.bf16.mxu0 %v5769_v16  ;;  %v5788_v47 = vld [vmem:[%s6007_s9 + $0x108] sm:$0xff]   ;;  %v5790_v49 = vld [vmem:[%s6007_s9 + $0x110] sm:$0xff]   ;;  %v5792_v51 = vld [vmem:[%s6007_s9 + $0x118] sm:$0xff]  }
  0x59   :  { %5365 = vmatpush3.bf16.msra.mxu1 %v5768_v15  ;;  %637 = vmatprep.mubr.bf16.mxu1 %v175_v41  ;;  %v5793_v52 = vld [vmem:[%s6007_s9 + $0x160] sm:$0xff]   ;;  %v5795_v54 = vld [vmem:[%s6007_s9 + $0x168] sm:$0xff]   ;;  %v171_v57 = vld [vmem:[%s6002_s5 + $0x58] sm:$0xff] }
  0x5a   :  { %5366 = vmatprep.subr.bf16.mxu1 %v5771_v18  ;;  %v5794_v53 = vld [vmem:[%s6007_s9 + $0x120] sm:$0xff]   ;;  %v165_v55 = vld [vmem:[%s6002_s5 + $0x28] sm:$0xff]  ;;  %v5797_v58 = vld [vmem:[%s6007_s9 + $0x170] sm:$0xff]  }
  0x5b   :  { %5345 = vmatpush3.bf16.msra.mxu0 %v5770_v17  ;;  %v5796_v56 = vld [vmem:[%s6007_s9 + $0x128] sm:$0xff]   ;;  %v177_v59 = vpack.c.bf16 %v171_v57, %v165_v55  ;;  %v5798_v60 = vld [vmem:[%s6007_s9 + $0x130] sm:$0xff]   ;;  %v5799_v61 = vld [vmem:[%s6007_s9 + $0x178] sm:$0xff]  }
  0x5c   :  { %5346 = vmatprep.subr.bf16.mxu0 %v5773_v20  ;;  %v5800_v62 = vld [vmem:[%s6007_s9 + $0x138] sm:$0xff]   ;;  %v164_v63 = vld [vmem:[%s6002_s5 + $0x20] sm:$0xff]  ;;  %v170_v0 = vld [vmem:[%s6002_s5 + $0x50] sm:$0xff] }
  0x5d   :  { %5367 = vmatpush3.bf16.msra.mxu1 %v5772_v19  ;;  %v176_v1 = vpack.c.bf16 %v170_v0, %v164_v63 }
  0x5e   :  { %5368 = vmatprep.subr.bf16.mxu1 %v5775_v22 }
  0x5f   :  { %5347 = vmatpush3.bf16.msra.mxu0 %v5774_v21 }
  0x60   :  { %5348 = vmatprep.subr.bf16.mxu0 %v5777_v24 }
  0x61   :  { %5369 = vmatpush3.bf16.msra.mxu1 %v5776_v23 }
  0x62   :  { %5370 = vmatprep.subr.bf16.mxu1 %v5779_v26 }
  0x63   :  { %5349 = vmatpush3.bf16.msra.mxu0 %v5778_v25 }
  0x64   :  { %5350 = vmatprep.subr.bf16.mxu0 %v5781_v28 }
  0x65   :  { %5371 = vmatpush3.bf16.msra.mxu1 %v5780_v27 }
  0x66   :  { %5372 = vmatprep.subr.bf16.mxu1 %v5783_v30 }
  0x67   :  { %5351 = vmatpush3.bf16.msra.mxu0 %v5782_v29 }
  0x68   :  { %5380 = vmatprep.subr.bf16.mxu0 %v5785_v38 }
  0x69   :  { %5373 = vmatpush3.bf16.msra.mxu1 %v5784_v34 }
  0x6a   :  { %597 = vmatmul.mubr.bf16.vlgmr.msra.gmra.mrb[0].mxu0 %v172_v37 }
  0x6b   :  { %5381 = vmatpush3.bf16.msra.mxu0 %v5786_v42  ;;  %678 = vmatprep.mubr.bf16.mxu0 %v177_v59 }
  0x6c   :  { %638 = vmatmul.mubr.bf16.vlgmr.msra.gmra.mrb[0].mxu1 %v174_v45  ;;  %5382 = vmatprep.subr.bf16.mxu0 %v5787_v46 }
  0x6f   :  { %5383 = vmatpush3.bf16.msra.mxu0 %v5788_v47 }
  0x70   :  { %5384 = vmatprep.subr.bf16.mxu0 %v5789_v48 }
  0x73   :  { %5385 = vmatpush3.bf16.msra.mxu0 %v5790_v49 }
  0x74   :  { %5386 = vmatprep.subr.bf16.mxu0 %v5791_v50 }
  0x77   :  { %5387 = vmatpush3.bf16.msra.mxu0 %v5792_v51 }
  0x78   :  { %5388 = vmatprep.subr.bf16.mxu0 %v5793_v52 }
  0x7b   :  { %5389 = vmatpush3.bf16.msra.mxu0 %v5794_v53 }
  0x7c   :  { %5390 = vmatprep.subr.bf16.mxu0 %v5795_v54 }
  0x7f   :  { %5391 = vmatpush3.bf16.msra.mxu0 %v5796_v56 }
  0x80   :  { %5392 = vmatprep.subr.bf16.mxu0 %v5797_v58 }
  0x83   :  { %5393 = vmatpush3.bf16.msra.mxu0 %v5798_v60 }
  0x84   :  { %5394 = vmatprep.subr.bf16.mxu0 %v5799_v61 }
  0x87   :  { %5395 = vmatpush3.bf16.msra.mxu0 %v5800_v62 }
  0x8a   :  { %679 = vmatmul.mubr.bf16.vlgmr.msra.gmra.mrb[4].mxu0 %v176_v1 }
  0x8b   :  { %82 = vsyncpa [#allocation3], 0  ;;  %v274_v3 = vld [vmem:[%s6012_s13] sm:$0xff]  ;;  %v275_v8 = vld [vmem:[%s6012_s13 + $0x8] sm:$0xff]  ;;  %vm691_vm0 = vcmask 261120   ;;  %v5983_v35 = vmov 0.0  }
  0x8c   :  { %v5801_v34 = vld [vmem:[%s6032_s29] sm:$0xff]   ;;  %5474 = vmatprep.subr.bf16.mxu1 %v5983_v35  ;;  %vm5984_vm1 = vmmov 0   ;;  %v5802_v36 = vld [vmem:[%s6032_s29 + $0x8] sm:$0xff]   ;;  %5516 = vmatprep.subr.bf16.mxu0 %v5983_v35  ;;  %s5985_s0 = smov 120   ;;  %s5986_s5 = smov 112   ;;  %vm1825_vm2 = vcmask 64512  }
  0x8d   :  { %5478 = vmatprep.mubr.msk.bf16.mxu1 %vm5984_vm1, %v5983_v35  ;;  %5475 = vmatpush3.bf16.msra.mxu1 %v5801_v34  ;;  %v5226_v56 = vld [vmem:[%s6022_s21] ss:$0 sm:$0xff]  ;;  %s5987_s9 = smov 104   ;;  %vm2014_vm3 = vcmask 130048   ;;  %s5990_s13 = smov 16   ;;  %vm2583_vm4 = vcmask 195584  }
  0x8e   :  { %5476 = vmatprep.subr.bf16.mxu1 %v5983_v35  ;;  %5518 = vmatprep.mubr.msk.bf16.mxu0 %vm5984_vm1, %v5983_v35  ;;  %v5227_v61 = vld [vmem:[%s6027_s25] ss:$0 sm:$0xff]  ;;  %s5991_s21 = smov 8   ;;  %s5992_s25 = smov 24   ;;  %vm2832_vm5 = vcmask 523264   ;;  %vm5068_vm6 = vcmask 1041409  }
  0x8f   :  { %v5803_v1 = vld [vmem:[%s6042_s8] sm:$0xff]   ;;  %s7133_s29 = sld [smem:[#allocation7_spill]]  ;;  %s7141_s15 = sld [smem:[#allocation11_spill]]  ;;  %vm5071_vm7 = vcmask 254976  }
  0x90   :  { %s7142_s16 = sld [smem:[#allocation12_spill]]  ;;  %s7143_s18 = sld [smem:[#allocation15_spill]] }
  0x91   :  { %5477 = vmatpush3.bf16.msra.mxu1 %v5802_v36  ;;  %s7144_s22 = sld [smem:[#allocation14_spill]]  ;;  %s7145_s23 = sld [smem:[#allocation16_spill]] }
  0x92   :  { %5482 = vmatprep.subr.bf16.mxu1 %v5983_v35  ;;  %s7147_s26 = sld [smem:[#allocation19_spill]]  ;;  %s7148_s28 = sld [smem:[#allocation20_spill]] }
  0x93   :  { %s7149_s1 = sld [smem:[#allocation23_spill]]  ;;  %s7150_s2 = sld [smem:[#allocation21_spill]] }
  0x94   :  { %s7151_s7 = sld [smem:[#allocation22_spill]]  ;;  %s7152_s10 = sld [smem:[#allocation25_spill]] }
  0x95   :  { %s7153_s11 = sld [smem:[#allocation24_spill]] }
 0x13d   :  { %v5352_v2 = vpop.f32.mrb[0].mxu0 }
 0x13e   :  { %v5353_v4 = vpop.f32.mrb[1].mxu0 }
 0x13f   :  { %v5354_v5 = vadd.f32 %v5353_v4, %v5352_v2  ;;  %v5355_v6 = vpop.f32.mrb[2].mxu0  ;;  %v5374_v7 = vpop.f32.mrb[0].mxu1  ;;  %v5805_v4 = vld [vmem:[%s6052_s19] sm:$0xff]  }
 0x140   :  { %v5356_v9 = vpop.f32.mrb[3].mxu0  ;;  %v5375_v12 = vpop.f32.mrb[1].mxu1 }
 0x141   :  { %v599_v10 = vadd.f32 %v5354_v5, %v274_v3  ;;  %v5357_v11 = vadd.f32 %v5356_v9, %v5355_v6  ;;  %v5376_v13 = vadd.f32 %v5375_v12, %v5374_v7  ;;  %v5377_v14 = vpop.f32.mrb[2].mxu1  ;;  %v5804_v3 = vld [vmem:[%s6042_s8 + $0x8] sm:$0xff]   ;;  %v5228_v6 = vld [vmem:[%s6037_s3] ss:$0 sm:$0xff]  ;;  %s7134_s3 = sld [smem:[#allocation5_spill]]  ;;  %s7135_s8 = sld [smem:[#allocation6_spill]] }
 0x142   :  { %v5378_v16 = vpop.f32.mrb[3].mxu1  ;;  %v5806_v5 = vld [vmem:[%s6052_s19 + $0x8] sm:$0xff]   ;;  %s7137_s19 = sld [smem:[#allocation8_spill]] }
 0x143   :  { %v602_v15 = vadd.f32 %v5357_v11, %v275_v8  ;;  %v640_v17 = vadd.f32 %v5376_v13, %v599_v10  ;;  %v5379_v18 = vadd.f32 %v5378_v16, %v5377_v14  ;;  %v5232_v13 = vld [vmem:[%s6047_s14] ss:$0 sm:$0xff]  ;;  %s7136_s14 = sld [smem:[#allocation9_spill]] }
 0x145   :  { %v643_v19 = vadd.f32 %v5379_v18, %v602_v15 }
 0x15d   :  { %v5396_v20 = vpop.f32.mrb[4].mxu0 }
 0x15e   :  { %v5397_v21 = vpop.f32.mrb[5].mxu0 }
 0x15f   :  { %v5398_v22 = vadd.f32 %v5397_v21, %v5396_v20  ;;  %v5399_v23 = vpop.f32.mrb[6].mxu0 }
 0x160   :  { %v5400_v24 = vpop.f32.mrb[7].mxu0 }
 0x161   :  { %v6256_v25 = vadd.f32 %v5398_v22, %v640_v17  ;;  %v5401_v26 = vadd.f32 %v5400_v24, %v5399_v23  ;;  %v5988_v24 = vmov 1983009808  }
 0x163   :  { %v6258_v27 = vadd.f32 %v5401_v26, %v643_v19  ;;  %v692_v28 = vsel %vm691_vm0, %v6256_v25, 0.0  ;;  %v701_v29 = vmul.f32 %v6256_v25, %v6256_v25  ;;  %v960_v26 = vunpack.c.l.s4 %v5988_v24 }
 0x164   :  { %693 = vadd.xlane.f32.xlu0 %v692_v28  ;;  %v962_v28 = vlaneseq }
 0x165   :  { %v703_v30 = vsel %vm691_vm0, %v701_v29, 0.0  ;;  %v702_v31 = vmul.f32 %v6258_v27, %v6258_v27  ;;  %v695_v32 = vsel %vm691_vm0, %v6258_v27, 0.0 }
 0x166   :  { %704 = vadd.xlane.f32.xlu1 %v703_v30  ;;  %v963_v34 = vshrl.u32 %v962_v28, 7 }
 0x167   :  { %v706_v33 = vsel %vm691_vm0, %v702_v31, 0.0  ;;  %v5989_v31 = vmov 1934713408  }
 0x168   :  { %696 = vadd.xlane.f32.xlu0 %v695_v32  ;;  %v992_v32 = vunpack.c.l.s4 %v5989_v31 }
 0x16a   :  { %707 = vadd.xlane.f32.xlu1 %v706_v33  ;;  %v961_v33 = vunpack.c.0.s8 %v960_v26 }
 0x1f1   :  { %v694_v37 = vpop.xlane.xlu0 %693 }
 0x1f2   :  { %v699_v38 = vmul.f32 0.03125, %v694_v37 }
 0x1f3   :  { %v705_v39 = vpop.xlane.xlu1 %704 }
 0x1f4   :  { %v711_v40 = vmul.f32 %v699_v38, %v699_v38  ;;  %v709_v41 = vmul.f32 0.03125, %v705_v39  ;;  %v717_v53 = vsub.f32 %v6256_v25, %v699_v38  ;;  %v993_v38 = vunpack.c.0.s8 %v992_v32 }
 0x1f5   :  { %v697_v42 = vpop.xlane.xlu0 %696  ;;  %v6336_v39 = vsub.s32 %v961_v33, %v963_v34 }
 0x1f6   :  { %v713_v43 = vsub.f32 %v709_v41, %v711_v40  ;;  %v700_v44 = vmul.f32 0.03125, %v697_v42 }
 0x1f7   :  { %v708_v45 = vpop.xlane.xlu1 %707 }
 0x1f8   :  { %v715_v46 = vmax.f32 %v713_v43, 0.0  ;;  %v712_v47 = vmul.f32 %v700_v44, %v700_v44  ;;  %v710_v48 = vmul.f32 0.03125, %v708_v45  ;;  %v718_v57 = vsub.f32 %v6258_v27, %v700_v44 }
 0x1fa   :  { %v719_v49 = vadd.f32 1e-06, %v715_v46  ;;  %v714_v50 = vsub.f32 %v710_v48, %v712_v47  ;;  %v6338_v46 = vsub.s32 %v993_v38, %v963_v34 }
 0x1fc   :  { %5829 = vrsqrt.f32 %v719_v49  ;;  %v716_v51 = vmax.f32 %v714_v50, 0.0 }
 0x1fe   :  { %v720_v52 = vadd.f32 1e-06, %v716_v51 }
 0x200   :  { %5831 = vrsqrt.f32 %v720_v52 }
 0x206   :  { %v5830_v54 = vpop.eup %5829 }
 0x207   :  { %v723_v55 = vmul.f32 %v5830_v54, %v717_v53 }
 0x209   :  { %v731_v60 = vmul.f32 %v5226_v56, %v723_v55 }
 0x20a   :  { %v5832_v58 = vpop.eup %5831 }
 0x20b   :  { %v724_v59 = vmul.f32 %v5832_v58, %v718_v57  ;;  %v739_v63 = vadd.f32 %v5227_v61, %v731_v60 }
 0x20d   :  { %v732_v62 = vmul.f32 %v5226_v56, %v724_v59 }
 0x20f   :  { %v740_v0 = vadd.f32 %v5227_v61, %v732_v62 }
 0x211   :  { %v741_v2 = vpack.c.bf16 %v740_v0, %v739_v63 }
 0x213   :  { %5479 = vmatmul.mubr.msk.bf16.vlgmr.msra.gmra.mrb[4].mxu1 %vm691_vm0, %v741_v2 }
 0x214   :  { %5483 = vmatpush3.bf16.msra.mxu1 %v5803_v1  ;;  %5486 = vmatprep.mubr.msk.bf16.mxu1 %vm5984_vm1, %v5983_v35 }
 0x215   :  { %5484 = vmatprep.subr.bf16.mxu1 %v5983_v35 }
 0x218   :  { %5485 = vmatpush3.bf16.msra.mxu1 %v5804_v3 }
 0x219   :  { %5490 = vmatprep.subr.bf16.mxu1 %v5983_v35 }
 0x21b   :  { %5487 = vmatmul.mubr.msk.bf16.vlgmr.msra.gmra.mrb[8].mxu1 %vm691_vm0, %v741_v2 }
 0x21c   :  { %5491 = vmatpush3.bf16.msra.mxu1 %v5805_v4  ;;  %5494 = vmatprep.mubr.msk.bf16.mxu1 %vm5984_vm1, %v5983_v35 }
 0x21d   :  { %5492 = vmatprep.subr.bf16.mxu1 %v5983_v35 }
 0x220   :  { %5493 = vmatpush3.bf16.msra.mxu1 %v5806_v5 }
 0x221   :  { %5498 = vmatprep.subr.bf16.mxu1 %v5983_v35 }
 0x223   :  { %5495 = vmatmul.mubr.msk.bf16.vlgmr.msra.gmra.mrb[12].mxu1 %vm691_vm0, %v741_v2 }
 0x224   :  { %5500 = vmatprep.mubr.msk.bf16.mxu1 %vm5984_vm1, %v5983_v35 }
 0x2e6   :  { %v802_v7 = vpop.f32.mrb[4].mxu1 }
 0x2e7   :  { %v6302_v8 = vadd.f32 %v5228_v6, %v802_v7  ;;  %v5480_v9 = vpop.f32.mrb[5].mxu1 }
 0x2e8   :  { %v805_v10 = vpop.f32.mrb[6].mxu1 }
 0x2e9   :  { %v6304_v11 = vadd.f32 %v5228_v6, %v805_v10  ;;  %939 = vrot.lane.b32.xlu0 %v6302_v8, %s5985_s0  ;;  %v5481_v12 = vpop.f32.mrb[7].mxu1 }
 0x2eb   :  { %941 = vrot.lane.b32.xlu1 %v6304_v11, %s5985_s0 }
 0x2ee   :  { %v866_v14 = vpop.f32.mrb[8].mxu1 }
 0x2ef   :  { %v867_v15 = vadd.f32 %v5232_v13, %v866_v14  ;;  %v5488_v16 = vpop.f32.mrb[9].mxu1 }
 0x2f0   :  { %v869_v17 = vpop.f32.mrb[10].mxu1 }
 0x2f1   :  { %1241 = vrot.lane.b32.xlu1 %v867_v15, %s5986_s5  ;;  %1235 = vrot.lane.b32.xlu0 %v867_v15, %s5985_s0  ;;  %v5489_v18 = vpop.f32.mrb[11].mxu1  ;;  %v6313_v19 = vadd.f32 %v5232_v13, %v869_v17 }
 0x2f5   :  { %1247 = vrot.lane.b32.xlu0 %v867_v15, %s5987_s9  ;;  %1237 = vrot.lane.b32.xlu1 %v6313_v19, %s5985_s0 }
 0x2f6   :  { %v6318_v20 = vpop.f32.mrb[12].mxu1 }
 0x2f7   :  { %v5496_v21 = vpop.f32.mrb[13].mxu1 }
 0x2f8   :  { %v6320_v22 = vpop.f32.mrb[14].mxu1 }
 0x2f9   :  { %945 = vrot.lane.b32.xlu0 %v6302_v8, %s5986_s5  ;;  %1243 = vrot.lane.b32.xlu1 %v6313_v19, %s5986_s5  ;;  %v5497_v23 = vpop.f32.mrb[15].mxu1 }
 0x2fd   :  { %951 = vrot.lane.b32.xlu0 %v6302_v8, %s5987_s9  ;;  %1249 = vrot.lane.b32.xlu1 %v6313_v19, %s5987_s9 }
 0x301   :  { %947 = vrot.lane.b32.xlu1 %v6304_v11, %s5986_s5 }
 0x305   :  { %953 = vrot.lane.b32.xlu1 %v6304_v11, %s5987_s9 }
 0x35b   :  { %v940_v29 = vpop.permute.xlu0 %939 }
 0x35d   :  { %v6334_v30 = vpop.permute.xlu1 %941 }
 0x363   :  { %v1242_v36 = vpop.permute.xlu1 %1241  ;;  %v1236_v37 = vpop.permute.xlu0 %1235 }
 0x364   :  { %v1253_v40 = vcombine.low %v867_v15, %v1242_v36  ;;  %v1254_v41 = vcombine.high %v867_v15, %v1242_v36 }
 0x366   :  { %v1261_v47 = vrot.slane %v1253_v40, %v6336_v39  ;;  %v1268_v48 = vrot.slane %v1254_v41, %v6336_v39 }
 0x367   :  { %v1248_v42 = vpop.permute.xlu0 %1247  ;;  %v1238_v43 = vpop.permute.xlu1 %1237 }
 0x368   :  { %v1269_v44 = vcombine.low %v1236_v37, %v1248_v42  ;;  %v1270_v45 = vcombine.high %v1236_v37, %v1248_v42 }
 0x36a   :  { %v1277_v49 = vrot.slane %v1269_v44, %v6336_v39  ;;  %v1284_v50 = vrot.slane %v1270_v45, %v6336_v39 }
 0x36b   :  { %v946_v51 = vpop.permute.xlu0 %945  ;;  %v1244_v52 = vpop.permute.xlu1 %1243 }
 0x36c   :  { %v1285_v53 = vcombine.low %v1261_v47, %v1277_v49  ;;  %v1286_v54 = vcombine.high %v1261_v47, %v1277_v49  ;;  %v1301_v55 = vcombine.low %v1268_v48, %v1284_v50  ;;  %v1302_v56 = vcombine.high %v1268_v48, %v1284_v50 }
 0x36d   :  { %v957_v57 = vcombine.low %v6302_v8, %v946_v51  ;;  %v958_v58 = vcombine.high %v6302_v8, %v946_v51  ;;  %v1321_v59 = vcombine.low %v6313_v19, %v1244_v52  ;;  %v1322_v60 = vcombine.high %v6313_v19, %v1244_v52 }
 0x36e   :  { %v1293_v61 = vrot.slane %v1285_v53, %v6338_v46  ;;  %v1300_v62 = vrot.slane %v1286_v54, %v6338_v46  ;;  %v1309_v63 = vrot.slane %v1301_v55, %v6338_v46  ;;  %v1316_v0 = vrot.slane %v1302_v56, %v6338_v46 }
 0x36f   :  { %v965_v1 = vrot.slane %v957_v57, %v6336_v39  ;;  %v972_v2 = vrot.slane %v958_v58, %v6336_v39  ;;  %v952_v3 = vpop.permute.xlu0 %951  ;;  %v1250_v4 = vpop.permute.xlu1 %1249  ;;  %v1329_v16 = vrot.slane %v1321_v59, %v6336_v39  ;;  %v1336_v17 = vrot.slane %v1322_v60, %v6336_v39 }
 0x370   :  { %v1389_v5 = vcombine.low %v1293_v61, %v1300_v62  ;;  %v5244_v6 = vcombine.high %v1293_v61, %v1300_v62  ;;  %v1405_v7 = vcombine.low %v1309_v63, %v1316_v0  ;;  %v5245_v8 = vcombine.high %v1309_v63, %v1316_v0 }
 0x371   :  { %v973_v9 = vcombine.low %v940_v29, %v952_v3  ;;  %v974_v10 = vcombine.high %v940_v29, %v952_v3  ;;  %v1337_v12 = vcombine.low %v1238_v43, %v1250_v4  ;;  %v1338_v13 = vcombine.high %v1238_v43, %v1250_v4 }
 0x372   :  { %v6355_v14 = vrot.slane %v1389_v5, %v6336_v39  ;;  %v6358_v15 = vrot.slane %v5244_v6, %v6336_v39  ;;  %v6367_v26 = vrot.slane %v1405_v7, %v6336_v39  ;;  %v6370_v28 = vrot.slane %v5245_v8, %v6336_v39 }
 0x373   :  { %v981_v18 = vrot.slane %v973_v9, %v6336_v39  ;;  %v988_v19 = vrot.slane %v974_v10, %v6336_v39  ;;  %v1345_v21 = vrot.slane %v1337_v12, %v6336_v39  ;;  %v1352_v23 = vrot.slane %v1338_v13, %v6336_v39  ;;  %v948_v24 = vpop.permute.xlu1 %947 }
 0x374   :  { %v1025_v29 = vcombine.low %v6304_v11, %v948_v24  ;;  %v1026_v31 = vcombine.high %v6304_v11, %v948_v24  ;;  %v1421_v0 = vcombine.low %v6355_v14, %v6358_v15  ;;  %v1422_v24 = vcombine.high %v6355_v14, %v6358_v15 }
 0x375   :  { %v989_v32 = vcombine.low %v965_v1, %v981_v18  ;;  %v990_v33 = vcombine.high %v965_v1, %v981_v18  ;;  %v1005_v34 = vcombine.low %v972_v2, %v988_v19  ;;  %v1006_v36 = vcombine.high %v972_v2, %v988_v19 }
 0x376   :  { %v1353_v37 = vcombine.low %v1329_v16, %v1345_v21  ;;  %v1354_v38 = vcombine.high %v1329_v16, %v1345_v21  ;;  %v1369_v40 = vcombine.low %v1336_v17, %v1352_v23  ;;  %v1370_v41 = vcombine.high %v1336_v17, %v1352_v23 }
 0x377   :  { %v997_v42 = vrot.slane %v989_v32, %v6338_v46  ;;  %v1004_v43 = vrot.slane %v990_v33, %v6338_v46  ;;  %v1013_v44 = vrot.slane %v1005_v34, %v6338_v46  ;;  %v1020_v45 = vrot.slane %v1006_v36, %v6338_v46  ;;  %v954_v62 = vpop.permute.xlu1 %953 }
 0x378   :  { %v1361_v47 = vrot.slane %v1353_v37, %v6338_v46  ;;  %v1368_v11 = vrot.slane %v1354_v38, %v6338_v46  ;;  %v1377_v48 = vrot.slane %v1369_v40, %v6338_v46  ;;  %v1384_v49 = vrot.slane %v1370_v41, %v6338_v46 }
 0x379   :  { %v1093_v50 = vcombine.low %v997_v42, %v1004_v43  ;;  %v5240_v51 = vcombine.high %v997_v42, %v1004_v43  ;;  %v1109_v52 = vcombine.low %v1013_v44, %v1020_v45  ;;  %v5241_v53 = vcombine.high %v1013_v44, %v1020_v45 }
 0x37a   :  { %v1457_v54 = vcombine.low %v1361_v47, %v1368_v11  ;;  %v5246_v55 = vcombine.high %v1361_v47, %v1368_v11  ;;  %v1473_v56 = vcombine.low %v1377_v48, %v1384_v49  ;;  %v5247_v57 = vcombine.high %v1377_v48, %v1384_v49 }
 0x37b   :  { %v1100_v58 = vrot.slane %v1093_v50, %v6336_v39  ;;  %v1108_v59 = vrot.slane %v5240_v51, %v6336_v39  ;;  %v6385_v60 = vrot.slane %v1109_v52, %v6336_v39  ;;  %v6388_v61 = vrot.slane %v5241_v53, %v6336_v39 }
 0x37c   :  { %v1464_v63 = vrot.slane %v1457_v54, %v6336_v39  ;;  %v1437_v1 = vcombine.low %v6367_v26, %v6370_v28  ;;  %v1472_v3 = vrot.slane %v5246_v55, %v6336_v39  ;;  %v1480_v4 = vrot.slane %v1473_v56, %v6336_v39 }
 0x37d   :  { %v1125_v2 = vcombine.low %v1100_v58, %v1108_v59  ;;  %v1488_v5 = vrot.slane %v5247_v57, %v6336_v39  ;;  %v1126_v6 = vcombine.high %v1100_v58, %v1108_v59  ;;  %v1141_v7 = vcombine.low %v6385_v60, %v6388_v61 }
 0x37e   :  { %v1041_v8 = vcombine.low %v6334_v30, %v954_v62  ;;  %v1042_v9 = vcombine.high %v6334_v30, %v954_v62  ;;  %v1142_v12 = vcombine.high %v6385_v60, %v6388_v61  ;;  %v1033_v13 = vrot.slane %v1025_v29, %v6336_v39 }
 0x37f   :  { %v6403_v10 = vrot.slane %v1125_v2, %v6338_v46  ;;  %v1040_v16 = vrot.slane %v1026_v31, %v6336_v39  ;;  %v1429_v19 = vrot.slane %v1421_v0, %v6338_v46  ;;  %v1445_v21 = vrot.slane %v1437_v1, %v6338_v46 }
 0x380   :  { %v1049_v17 = vrot.slane %v1041_v8, %v6336_v39  ;;  %v1056_v18 = vrot.slane %v1042_v9, %v6336_v39  ;;  %v1489_v30 = vcombine.low %v1464_v63, %v1472_v3  ;;  %v1505_v23 = vcombine.low %v1480_v4, %v1488_v5 }
 0x381   :  { %v1438_v32 = vcombine.high %v6367_v26, %v6370_v28  ;;  %v1453_v36 = vcombine.low %v1429_v19, %v1445_v21  ;;  %v1436_v40 = vrot.slane %v1422_v24, %v6338_v46  ;;  %v1490_v43 = vcombine.high %v1464_v63, %v1472_v3 }
 0x382   :  { %v1057_v33 = vcombine.low %v1033_v13, %v1049_v17  ;;  %v1058_v29 = vcombine.high %v1033_v13, %v1049_v17  ;;  %v1073_v34 = vcombine.low %v1040_v16, %v1056_v18  ;;  %v1074_v31 = vcombine.high %v1040_v16, %v1056_v18 }
 0x383   :  { %v1497_v37 = vrot.slane %v1489_v30, %v6338_v46  ;;  %v1513_v38 = vrot.slane %v1505_v23, %v6338_v46  ;;  %v1452_v28 = vrot.slane %v1438_v32, %v6338_v46  ;;  %v1506_v44 = vcombine.high %v1480_v4, %v1488_v5 }
 0x384   :  { %v1065_v41 = vrot.slane %v1057_v33, %v6338_v46  ;;  %v1072_v42 = vrot.slane %v1058_v29, %v6338_v46  ;;  %v1081_v14 = vrot.slane %v1073_v34, %v6338_v46  ;;  %v1088_v15 = vrot.slane %v1074_v31, %v6338_v46 }
 0x385   :  { %v1521_v26 = vcombine.low %v1497_v37, %v1513_v38  ;;  %v1140_v49 = vrot.slane %v1126_v6, %v6338_v46  ;;  %v1504_v51 = vrot.slane %v1490_v43, %v6338_v46  ;;  %v1520_v52 = vrot.slane %v1506_v44, %v6338_v46 }
 0x386   :  { %v1161_v45 = vcombine.low %v1065_v41, %v1072_v42  ;;  %v5242_v47 = vcombine.high %v1065_v41, %v1072_v42  ;;  %v1177_v11 = vcombine.low %v1081_v14, %v1088_v15  ;;  %v5243_v48 = vcombine.high %v1081_v14, %v1088_v15  ;;  %v688_v41 = vld [vmem:[%s6017_s17 + $0x8] sm:$0xff] }
 0x387   :  { %v1525_v50 = vpack.c.bf16 %v1521_v26, %v1453_v36  ;;  %v1149_v57 = vrot.slane %v1141_v7, %v6338_v46  ;;  %v1456_v59 = vcombine.high %v1436_v40, %v1452_v28  ;;  %v1524_v60 = vcombine.high %v1504_v51, %v1520_v52 }
 0x388   :  { %v1168_v53 = vrot.slane %v1161_v45, %v6336_v39  ;;  %v1176_v54 = vrot.slane %v5242_v47, %v6336_v39  ;;  %v1184_v55 = vrot.slane %v1177_v11, %v6336_v39  ;;  %v1192_v56 = vrot.slane %v5243_v48, %v6336_v39 }
 0x389   :  { %v1830_v58 = vsel %vm1825_vm2, %v1525_v50, 0  ;;  %v1156_v1 = vrot.slane %v1142_v12, %v6338_v46  ;;  %v1528_v2 = vpack.c.bf16 %v1524_v60, %v1456_v59  ;;  %v1454_v3 = vcombine.high %v1429_v19, %v1445_v21 }
 0x38a   :  { %v1193_v61 = vcombine.low %v1168_v53, %v1176_v54  ;;  %v1194_v62 = vcombine.high %v1168_v53, %v1176_v54  ;;  %v1209_v63 = vcombine.low %v1184_v55, %v1192_v56  ;;  %v1210_v0 = vcombine.high %v1184_v55, %v1192_v56  ;;  %5499 = vmatpush3.bf16.xpose.msra.mxu1 %v1830_v58 }
 0x38b   :  { %5504 = vmatprep.subr.bf16.mxu1 %v5983_v35  ;;  %v1522_v4 = vcombine.high %v1497_v37, %v1513_v38  ;;  %v1971_v9 = vsel %vm1825_vm2, %v1528_v2, 0  ;;  %v1157_v13 = vcombine.low %v6403_v10, %v1149_v57  ;;  %v1160_v18 = vcombine.high %v1140_v49, %v1156_v1 }
 0x38c   :  { %v1201_v5 = vrot.slane %v1193_v61, %v6338_v46  ;;  %v1208_v6 = vrot.slane %v1194_v62, %v6338_v46  ;;  %v1217_v7 = vrot.slane %v1209_v63, %v6338_v46  ;;  %v1224_v8 = vrot.slane %v1210_v0, %v6338_v46  ;;  %5517 = vmatpush3.bf16.xpose.msra.mxu0 %v1971_v9 }
 0x38d   :  { %v1526_v17 = vpack.c.bf16 %v1522_v4, %v1454_v3  ;;  %5528 = vmatprep.subr.bf16.mxu0 %v5983_v35  ;;  %v1523_v23 = vcombine.low %v1504_v51, %v1520_v52  ;;  %v1455_v32 = vcombine.low %v1436_v40, %v1452_v28  ;;  %v1158_v33 = vcombine.high %v6403_v10, %v1149_v57  ;;  %v687_v10 = vld [vmem:[%s6017_s17] sm:$0xff] }
 0x38e   :  { %v1225_v16 = vcombine.low %v1201_v5, %v1217_v7  ;;  %v1228_v12 = vcombine.high %v1208_v6, %v1224_v8  ;;  %v1226_v24 = vcombine.high %v1201_v5, %v1217_v7  ;;  %v1227_v36 = vcombine.low %v1208_v6, %v1224_v8  ;;  %v5236_v3 = vld [vmem:[%s6057_s24] ss:$0 sm:$0xff]  ;;  %s7138_s24 = sld [smem:[#allocation10_spill]] }
 0x38f   :  { %v1877_v30 = vsel %vm1825_vm2, %v1526_v17, 0  ;;  %v1527_v29 = vpack.c.bf16 %v1523_v23, %v1455_v32  ;;  %v1159_v37 = vcombine.low %v1140_v49, %v1156_v1  ;;  %v6474_v4 = vadd.f32 %v5236_v3, %v6320_v22 }
 0x390   :  { %v1229_v19 = vpack.c.bf16 %v1225_v16, %v1157_v13  ;;  %v1232_v21 = vpack.c.bf16 %v1228_v12, %v1160_v18  ;;  %v1230_v34 = vpack.c.bf16 %v1226_v24, %v1158_v33  ;;  %v6479_v5 = vadd.f32 %v5236_v3, %v6318_v20 }
 0x391   :  { %v1924_v31 = vsel %vm1825_vm2, %v1527_v29, 0  ;;  %v1231_v38 = vpack.c.bf16 %v1227_v36, %v1159_v37 }
 0x392   :  { %5501 = vmatmul.mubr.msk.bf16.vlgmr.msra.gmra.mrb[16].mxu1 %vm1825_vm2, %v1229_v19 }
 0x393   :  { %5505 = vmatpush3.bf16.xpose.msra.mxu1 %v1877_v30  ;;  %5506 = vmatprep.mubr.msk.bf16.mxu1 %vm5984_vm1, %v5983_v35 }
 0x394   :  { %5510 = vmatprep.subr.bf16.mxu1 %v5983_v35  ;;  %5519 = vmatmul.mubr.msk.bf16.vlgmr.msra.gmra.mrb[8].mxu0 %vm1825_vm2, %v1232_v21 }
 0x395   :  { %5530 = vmatprep.mubr.msk.bf16.mxu0 %vm5984_vm1, %v5983_v35 }
 0x39a   :  { %5507 = vmatmul.mubr.msk.bf16.vlgmr.msra.gmra.mrb[20].mxu1 %vm1825_vm2, %v1230_v34 }
 0x39b   :  { %5511 = vmatpush3.bf16.xpose.msra.mxu1 %v1924_v31  ;;  %5512 = vmatprep.mubr.msk.bf16.mxu1 %vm5984_vm1, %v5983_v35 }
 0x39c   :  { %5522 = vmatprep.subr.bf16.mxu1 %v5983_v35 }
 0x3a2   :  { %5513 = vmatmul.mubr.msk.bf16.vlgmr.msra.gmra.mrb[24].mxu1 %vm1825_vm2, %v1231_v38 }
 0x3a3   :  { %5524 = vmatprep.mubr.msk.bf16.mxu1 %vm5984_vm1, %v5983_v35 }
 0x465   :  { %v1866_v40 = vpop.f32.mrb[16].mxu1 }
 0x466   :  { %v1867_v42 = vadd.f32 %v1866_v40, %v687_v10  ;;  %v5502_v14 = vpop.f32.mrb[17].mxu1 }
 0x467   :  { %v1869_v15 = vpop.f32.mrb[18].mxu1  ;;  %v2007_v26 = vpop.f32.mrb[8].mxu0 }
 0x468   :  { %v1870_v28 = vadd.f32 %v1869_v15, %v688_v41  ;;  %v5503_v43 = vpop.f32.mrb[19].mxu1  ;;  %v2015_v44 = vsel %vm2014_vm3, %v1867_v42, -inf  ;;  %v5520_v45 = vpop.f32.mrb[9].mxu0  ;;  %v2008_v63 = vadd.f32 %v2007_v26, %v687_v10 }
 0x469   :  { %2016 = vmax.xlane.f32.xlu0 %v2015_v44  ;;  %v2010_v47 = vpop.f32.mrb[10].mxu0 }
 0x46a   :  { %v2018_v11 = vsel %vm2014_vm3, %v1870_v28, -inf  ;;  %v6464_v48 = vadd.f32 %v2010_v47, %v688_v41  ;;  %v5521_v49 = vpop.f32.mrb[11].mxu0  ;;  %v2033_v2 = vsel %vm2014_vm3, %v2008_v63, -inf }
 0x46b   :  { %2019 = vmax.xlane.f32.xlu1 %v2018_v11 }
 0x46c   :  { %v2036_v53 = vsel %vm2014_vm3, %v6464_v48, -inf }
 0x46d   :  { %v1913_v50 = vpop.f32.mrb[20].mxu1 }
 0x46e   :  { %v1914_v51 = vadd.f32 %v1913_v50, %v687_v10  ;;  %v5508_v52 = vpop.f32.mrb[21].mxu1 }
 0x46f   :  { %2037 = vmax.xlane.f32.xlu1 %v2036_v53  ;;  %v1916_v54 = vpop.f32.mrb[22].mxu1 }
 0x470   :  { %v1917_v55 = vadd.f32 %v1916_v54, %v688_v41  ;;  %v5509_v56 = vpop.f32.mrb[23].mxu1  ;;  %v2021_v57 = vsel %vm2014_vm3, %v1914_v51, -inf }
 0x471   :  { %2022 = vmax.xlane.f32.xlu0 %v2021_v57 }
 0x472   :  { %v2024_v58 = vsel %vm2014_vm3, %v1917_v55, -inf }
 0x475   :  { %2025 = vmax.xlane.f32.xlu0 %v2024_v58  ;;  %v1960_v59 = vpop.f32.mrb[24].mxu1 }
 0x476   :  { %v1961_v60 = vadd.f32 %v1960_v59, %v687_v10  ;;  %v5514_v61 = vpop.f32.mrb[25].mxu1 }
 0x477   :  { %v1963_v62 = vpop.f32.mrb[26].mxu1 }
 0x478   :  { %v5515_v0 = vpop.f32.mrb[27].mxu1  ;;  %v2027_v1 = vsel %vm2014_vm3, %v1961_v60, -inf  ;;  %v1964_v6 = vadd.f32 %v1963_v62, %v688_v41 }
 0x479   :  { %2028 = vmax.xlane.f32.xlu0 %v2027_v1 }
 0x47a   :  { %v2030_v7 = vsel %vm2014_vm3, %v1964_v6, -inf }
 0x47d   :  { %2034 = vmax.xlane.f32.xlu0 %v2033_v2 }
 0x480   :  { %1533 = vrot.lane.b32.xlu1 %v6474_v4, %s5985_s0 }
 0x484   :  { %1537 = vrot.lane.b32.xlu1 %v6479_v5, %s5986_s5 }
 0x493   :  { %1531 = vrot.lane.b32.xlu0 %v6479_v5, %s5985_s0 }
 0x497   :  { %1543 = vrot.lane.b32.xlu0 %v6479_v5, %s5987_s9 }
 0x4a8   :  { %2031 = vmax.xlane.f32.xlu1 %v2030_v7 }
 0x4b9   :  { %1539 = vrot.lane.b32.xlu1 %v6474_v4, %s5986_s5 }
 0x4f6   :  { %v2017_v22 = vpop.xlane.xlu0 %2016 }
 0x4f7   :  { %v2039_v8 = vsub.f32 %v1867_v42, %v2017_v22 }
 0x4f8   :  { %v2020_v20 = vpop.xlane.xlu1 %2019 }
 0x4f9   :  { %v2047_v9 = vmul.f32 1.442695, %v2039_v8  ;;  %v2040_v13 = vsub.f32 %v1870_v28, %v2020_v20 }
 0x4fb   :  { %5833 = vpow2.f32 %v2047_v9  ;;  %v2049_v16 = vmul.f32 1.442695, %v2040_v13 }
 0x4fc   :  { %v2038_v24 = vpop.xlane.xlu1 %2037 }
 0x4fd   :  { %5835 = vpow2.f32 %v2049_v16  ;;  %v2046_v36 = vsub.f32 %v6464_v48, %v2038_v24 }
 0x4fe   :  { %v2023_v12 = vpop.xlane.xlu0 %2022 }
 0x4ff   :  { %v2041_v17 = vsub.f32 %v1914_v51, %v2023_v12  ;;  %v2061_v41 = vmul.f32 1.442695, %v2046_v36 }
 0x500   :  { %v1534_v48 = vpop.permute.xlu1 %1533 }
 0x501   :  { %v2051_v18 = vmul.f32 1.442695, %v2041_v17 }
 0x502   :  { %v2026_v19 = vpop.xlane.xlu0 %2025 }
 0x503   :  { %5837 = vpow2.f32 %v2051_v18  ;;  %v2042_v21 = vsub.f32 %v1917_v55, %v2026_v19 }
 0x504   :  { %v1538_v49 = vpop.permute.xlu1 %1537 }
 0x505   :  { %v6490_v30 = vpop.eup %5833  ;;  %v2053_v23 = vmul.f32 1.442695, %v2042_v21  ;;  %v1549_v58 = vcombine.low %v6479_v5, %v1538_v49 }
 0x506   :  { %v2029_v32 = vpop.xlane.xlu0 %2028  ;;  %v2063_v33 = vsel %vm2014_vm3, %v6490_v30, 0.0 }
 0x507   :  { %v6494_v29 = vpop.eup %5835  ;;  %5839 = vpow2.f32 %v2053_v23  ;;  %v2043_v34 = vsub.f32 %v1961_v60, %v2029_v32  ;;  %2064 = vadd.xlane.f32.xlu0 %v2063_v33  ;;  %v1550_v60 = vcombine.high %v6479_v5, %v1538_v49  ;;  %v1557_v62 = vrot.slane %v1549_v58, %v6336_v39 }
 0x508   :  { %v2066_v31 = vsel %vm2014_vm3, %v6494_v29, 0.0 }
 0x509   :  { %v2055_v37 = vmul.f32 1.442695, %v2043_v34  ;;  %2067 = vadd.xlane.f32.xlu1 %v2066_v31  ;;  %v1564_v1 = vrot.slane %v1550_v60, %v6336_v39 }
 0x50a   :  { %v2035_v38 = vpop.xlane.xlu0 %2034 }
 0x50b   :  { %5841 = vpow2.f32 %v2055_v37  ;;  %v2045_v10 = vsub.f32 %v2008_v63, %v2035_v38 }
 0x50d   :  { %v6499_v40 = vpop.eup %5837  ;;  %v2059_v42 = vmul.f32 1.442695, %v2045_v10 }
 0x50e   :  { %v2069_v14 = vsel %vm2014_vm3, %v6499_v40, 0.0  ;;  %v1532_v55 = vpop.permute.xlu0 %1531 }
 0x50f   :  { %5843 = vpow2.f32 %v2059_v42  ;;  %2070 = vadd.xlane.f32.xlu0 %v2069_v14 }
 0x510   :  { %5845 = vpow2.f32 %v2061_v41 }
 0x511   :  { %v6503_v15 = vpop.eup %5839 }
 0x512   :  { %v2072_v26 = vsel %vm2014_vm3, %v6503_v15, 0.0  ;;  %v1544_v56 = vpop.permute.xlu0 %1543 }
 0x513   :  { %2073 = vadd.xlane.f32.xlu1 %v2072_v26  ;;  %v1565_v57 = vcombine.low %v1532_v55, %v1544_v56  ;;  %v1566_v59 = vcombine.high %v1532_v55, %v1544_v56 }
 0x515   :  { %v6507_v28 = vpop.eup %5841  ;;  %v1573_v61 = vrot.slane %v1565_v57, %v6336_v39  ;;  %v1580_v63 = vrot.slane %v1566_v59, %v6336_v39 }
 0x516   :  { %v2075_v43 = vsel %vm2014_vm3, %v6507_v28, 0.0 }
 0x517   :  { %2076 = vadd.xlane.f32.xlu0 %v2075_v43  ;;  %v1581_v2 = vcombine.low %v1557_v62, %v1573_v61  ;;  %v1582_v3 = vcombine.high %v1557_v62, %v1573_v61  ;;  %v1598_v7 = vcombine.high %v1564_v1, %v1580_v63 }
 0x519   :  { %v6511_v44 = vpop.eup %5843  ;;  %v1589_v20 = vrot.slane %v1581_v2, %v6338_v46  ;;  %v1596_v9 = vrot.slane %v1582_v3, %v6338_v46  ;;  %v1612_v13 = vrot.slane %v1598_v7, %v6338_v46 }
 0x51a   :  { %v2081_v45 = vsel %vm2014_vm3, %v6511_v44, 0.0  ;;  %v6515_v47 = vpop.eup %5845 }
 0x51b   :  { %2082 = vadd.xlane.f32.xlu0 %v2081_v45  ;;  %v2084_v11 = vsel %vm2014_vm3, %v6515_v47, 0.0  ;;  %v1685_v17 = vcombine.low %v1589_v20, %v1596_v9  ;;  %v5248_v21 = vcombine.high %v1589_v20, %v1596_v9 }
 0x51d   :  { %v1692_v36 = vrot.slane %v1685_v17, %v6336_v39  ;;  %v1700_v41 = vrot.slane %v5248_v21, %v6336_v39 }
 0x51f   :  { %2085 = vadd.xlane.f32.xlu0 %v2084_v11  ;;  %v1718_v61 = vcombine.high %v1692_v36, %v1700_v41 }
 0x521   :  { %v1732_v21 = vrot.slane %v1718_v61, %v6338_v46 }
 0x524   :  { %1545 = vrot.lane.b32.xlu1 %v6474_v4, %s5987_s9 }
 0x535   :  { %v2032_v50 = vpop.xlane.xlu1 %2031 }
 0x536   :  { %v2044_v51 = vsub.f32 %v1964_v6, %v2032_v50  ;;  %v1597_v6 = vcombine.low %v1564_v1, %v1580_v63 }
 0x538   :  { %v2057_v52 = vmul.f32 1.442695, %v2044_v51  ;;  %v1605_v5 = vrot.slane %v1597_v6, %v6338_v46 }
 0x539   :  { %v1540_v0 = vpop.permute.xlu1 %1539 }
 0x53a   :  { %5847 = vpow2.f32 %v2057_v52  ;;  %v1617_v18 = vcombine.low %v6474_v4, %v1540_v0  ;;  %v1618_v19 = vcombine.high %v6474_v4, %v1540_v0  ;;  %v1701_v23 = vcombine.low %v1605_v5, %v1612_v13 }
 0x53b   :  { %v5249_v24 = vcombine.high %v1605_v5, %v1612_v13 }
 0x53c   :  { %v1625_v37 = vrot.slane %v1617_v18, %v6336_v39  ;;  %v1632_v38 = vrot.slane %v1618_v19, %v6336_v39  ;;  %v1708_v42 = vrot.slane %v1701_v23, %v6336_v39 }
 0x53d   :  { %v1716_v14 = vrot.slane %v5249_v24, %v6336_v39 }
 0x53f   :  { %v1733_v55 = vcombine.low %v1708_v42, %v1716_v14  ;;  %v1734_v7 = vcombine.high %v1708_v42, %v1716_v14 }
 0x541   :  { %v1741_v6 = vrot.slane %v1733_v55, %v6338_v46  ;;  %v1748_v23 = vrot.slane %v1734_v7, %v6338_v46 }
 0x544   :  { %v6521_v53 = vpop.eup %5847 }
 0x545   :  { %v2078_v54 = vsel %vm2014_vm3, %v6521_v53, 0.0 }
 0x548   :  { %2079 = vadd.xlane.f32.xlu1 %v2078_v54  ;;  %v1717_v54 = vcombine.low %v1692_v36, %v1700_v41 }
 0x54a   :  { %v1725_v3 = vrot.slane %v1717_v54, %v6338_v46 }
 0x54c   :  { %v1749_v24 = vcombine.low %v1725_v3, %v1741_v6 }
 0x594   :  { %v2065_v22 = vpop.xlane.xlu0 %2064 }
 0x595   :  { %5849 = vrcp.f32 %v2065_v22 }
 0x596   :  { %v2068_v8 = vpop.xlane.xlu1 %2067 }
 0x597   :  { %5851 = vrcp.f32 %v2068_v8 }
 0x59c   :  { %v2071_v16 = vpop.xlane.xlu0 %2070 }
 0x59f   :  { %v5850_v2 = vpop.eup %5849 }
 0x5a0   :  { %v2074_v12 = vpop.xlane.xlu1 %2073  ;;  %v2095_v42 = vmul.f32 %v5850_v2, %v6490_v30 }
 0x5a1   :  { %5853 = vrcp.f32 %v2074_v12  ;;  %v5852_v22 = vpop.eup %5851 }
 0x5a2   :  { %5855 = vrcp.f32 %v2071_v16  ;;  %v2096_v36 = vmul.f32 %v5852_v22, %v6494_v29 }
 0x5a4   :  { %v6537_v32 = vpop.xlane.xlu0 %2076  ;;  %v1546_v33 = vpop.permute.xlu1 %1545 }
 0x5a5   :  { %v1633_v34 = vcombine.low %v1534_v48, %v1546_v33  ;;  %v1634_v31 = vcombine.high %v1534_v48, %v1546_v33 }
 0x5a7   :  { %v1641_v10 = vrot.slane %v1633_v34, %v6336_v39  ;;  %v1648_v4 = vrot.slane %v1634_v31, %v6336_v39  ;;  %v1750_v34 = vcombine.high %v1725_v3, %v1741_v6 }
 0x5a8   :  { %v2083_v26 = vpop.xlane.xlu0 %2082 }
 0x5a9   :  { %v1649_v43 = vcombine.low %v1625_v37, %v1641_v10  ;;  %v1650_v45 = vcombine.high %v1625_v37, %v1641_v10  ;;  %v1665_v11 = vcombine.low %v1632_v38, %v1648_v4  ;;  %v1666_v48 = vcombine.high %v1632_v38, %v1648_v4 }
 0x5ab   :  { %v1657_v49 = vrot.slane %v1649_v43, %v6338_v46  ;;  %v1664_v50 = vrot.slane %v1650_v45, %v6338_v46  ;;  %v1673_v51 = vrot.slane %v1665_v11, %v6338_v46  ;;  %v1680_v52 = vrot.slane %v1666_v48, %v6338_v46  ;;  %v5854_v13 = vpop.eup %5853 }
 0x5ac   :  { %v2086_v60 = vpop.xlane.xlu0 %2085  ;;  %v5856_v19 = vpop.eup %5855  ;;  %v2098_v37 = vmul.f32 %v5854_v13, %v6503_v15  ;;  %v1752_v43 = vcombine.high %v1732_v21, %v1748_v23  ;;  %v2103_v11 = vpack.c.bf16 %v2096_v36, %v2095_v42 }
 0x5ad   :  { %v1753_v56 = vcombine.low %v1657_v49, %v1664_v50  ;;  %v5250_v57 = vcombine.high %v1657_v49, %v1664_v50  ;;  %v1769_v58 = vcombine.low %v1673_v51, %v1680_v52  ;;  %v5251_v59 = vcombine.high %v1673_v51, %v1680_v52 }
 0x5ae   :  { %5857 = vrcp.f32 %v2086_v60  ;;  %v2097_v14 = vmul.f32 %v5856_v19, %v6499_v40 }
 0x5af   :  { %v1760_v62 = vrot.slane %v1753_v56, %v6336_v39  ;;  %v1768_v63 = vrot.slane %v5250_v57, %v6336_v39  ;;  %v1776_v0 = vrot.slane %v1769_v58, %v6336_v39  ;;  %v1784_v1 = vrot.slane %v5251_v59, %v6336_v39 }
 0x5b0   :  { %5859 = vrcp.f32 %v2083_v26  ;;  %v1751_v26 = vcombine.low %v1732_v21, %v1748_v23  ;;  %v2104_v48 = vpack.c.bf16 %v2098_v37, %v2097_v14 }
 0x5b1   :  { %v1785_v8 = vcombine.low %v1760_v62, %v1768_v63  ;;  %v1801_v20 = vcombine.low %v1776_v0, %v1784_v1  ;;  %v1786_v9 = vcombine.high %v1760_v62, %v1768_v63  ;;  %v1802_v5 = vcombine.high %v1776_v0, %v1784_v1 }
 0x5b2   :  { %5861 = vrcp.f32 %v6537_v32 }
 0x5b3   :  { %v1793_v16 = vrot.slane %v1785_v8, %v6338_v46  ;;  %v1809_v12 = vrot.slane %v1801_v20, %v6338_v46  ;;  %v1800_v17 = vrot.slane %v1786_v9, %v6338_v46  ;;  %v1816_v18 = vrot.slane %v1802_v5, %v6338_v46 }
 0x5b5   :  { %v1817_v33 = vcombine.low %v1793_v16, %v1809_v12  ;;  %v1818_v31 = vcombine.high %v1793_v16, %v1809_v12  ;;  %v1819_v4 = vcombine.low %v1800_v17, %v1816_v18  ;;  %v1820_v41 = vcombine.high %v1800_v17, %v1816_v18 }
 0x5b7   :  { %v1821_v38 = vpack.c.bf16 %v1817_v33, %v1749_v24  ;;  %v1822_v10 = vpack.c.bf16 %v1818_v31, %v1750_v34  ;;  %v1823_v29 = vpack.c.bf16 %v1819_v4, %v1751_v26  ;;  %v1824_v15 = vpack.c.bf16 %v1820_v41, %v1752_v43 }
 0x5b8   :  { %v5858_v45 = vpop.eup %5857 }
 0x5b9   :  { %5523 = vmatpush3.bf16.msra.mxu1 %v1821_v38  ;;  %5529 = vmatpush3.bf16.msra.mxu0 %v1822_v10  ;;  %v2102_v30 = vmul.f32 %v5858_v45, %v6515_v47 }
 0x5ba   :  { %5534 = vmatprep.subr.bf16.mxu1 %v5983_v35  ;;  %5540 = vmatprep.subr.bf16.mxu0 %v5983_v35  ;;  %v5860_v49 = vpop.eup %5859 }
 0x5bb   :  { %v2101_v40 = vmul.f32 %v5860_v49, %v6511_v44 }
 0x5bc   :  { %5525 = vmatmul.mubr.msk.bf16.vlgmr.msra.gmra.mrb[28].mxu1 %vm2014_vm3, %v2103_v11  ;;  %5531 = vmatmul.mubr.msk.bf16.vlgmr.msra.gmra.mrb[12].mxu0 %vm2014_vm3, %v2104_v48  ;;  %v5862_v51 = vpop.eup %5861 }
 0x5bd   :  { %5535 = vmatpush3.bf16.msra.mxu1 %v1823_v29  ;;  %5541 = vmatpush3.bf16.msra.mxu0 %v1824_v15  ;;  %v2106_v50 = vpack.c.bf16 %v2102_v30, %v2101_v40  ;;  %v2099_v54 = vmul.f32 %v5862_v51, %v6507_v28 }
 0x5be   :  { %5542 = vmatprep.mubr.msk.bf16.mxu0 %vm5984_vm1, %v5983_v35  ;;  %5536 = vmatprep.mubr.msk.bf16.mxu1 %vm5984_vm1, %v5983_v35 }
 0x5bf   :  { %5546 = vmatprep.subr.bf16.mxu1 %v5983_v35  ;;  %5554 = vmatprep.subr.bf16.mxu0 %v5983_v35 }
 0x5c4   :  { %5543 = vmatmul.mubr.msk.bf16.vlgmr.msra.gmra.mrb[16].mxu0 %vm2014_vm3, %v2106_v50 }
 0x5c5   :  { %5558 = vmatprep.mubr.msk.bf16.mxu0 %vm5984_vm1, %v5983_v35 }
 0x5d5   :  { %v2080_v47 = vpop.xlane.xlu1 %2079 }
 0x5d6   :  { %5863 = vrcp.f32 %v2080_v47 }
 0x5e0   :  { %v5864_v52 = vpop.eup %5863 }
 0x5e1   :  { %v2100_v55 = vmul.f32 %v5864_v52, %v6521_v53 }
 0x5e3   :  { %v2105_v56 = vpack.c.bf16 %v2100_v55, %v2099_v54 }
 0x5e5   :  { %5537 = vmatmul.mubr.msk.bf16.vlgmr.msra.gmra.mrb[32].mxu1 %vm2014_vm3, %v2105_v56 }
 0x5e6   :  { %5550 = vmatprep.mubr.msk.bf16.mxu1 %vm5984_vm1, %v5983_v35 }
 0x68f   :  { %v2144_v44 = vpop.f32.mrb[28].mxu1  ;;  %v2188_v57 = vpop.f32.mrb[12].mxu0 }
 0x690   :  { %v5526_v58 = vpop.f32.mrb[29].mxu1  ;;  %v5532_v59 = vpop.f32.mrb[13].mxu0 }
 0x691   :  { %v2147_v60 = vpop.f32.mrb[30].mxu1  ;;  %v2191_v32 = vpop.f32.mrb[14].mxu0 }
 0x692   :  { %v5527_v61 = vpop.f32.mrb[31].mxu1  ;;  %v5533_v62 = vpop.f32.mrb[15].mxu0 }
 0x697   :  { %v2276_v63 = vpop.f32.mrb[16].mxu0 }
 0x698   :  { %v2299_v0 = vcombine.low %v2188_v57, %v2276_v63  ;;  %v2300_v1 = vcombine.high %v2188_v57, %v2276_v63  ;;  %v5544_v28 = vpop.f32.mrb[17].mxu0 }
 0x699   :  { %v2279_v2 = vpop.f32.mrb[18].mxu0 }
 0x69a   :  { %v2367_v53 = vcombine.low %v2191_v32, %v2279_v2  ;;  %v2368_v3 = vcombine.high %v2191_v32, %v2279_v2  ;;  %v5545_v6 = vpop.f32.mrb[19].mxu0  ;;  %v2307_v9 = vrot.slane %v2299_v0, %v6336_v39  ;;  %v2314_v5 = vrot.slane %v2300_v1, %v6336_v39  ;;  %v5807_v32 = vld [vmem:[%s6062_s30] sm:$0xff]  }
 0x69b   :  { %5547 = vmatpush3.bf16.msra.mxu1 %v5807_v32  ;;  %v5810_v32 = vld [vmem:[%s7133_s29 + $0x8] sm:$0xff]  }
 0x69c   :  { %v2375_v34 = vrot.slane %v2367_v53, %v6336_v39  ;;  %v2382_v31 = vrot.slane %v2368_v3, %v6336_v39  ;;  %5548 = vmatprep.subr.bf16.mxu1 %v5983_v35 }
 0x6b8   :  { %v2232_v7 = vpop.f32.mrb[32].mxu1 }
 0x6b9   :  { %v2283_v22 = vcombine.low %v2144_v44, %v2232_v7  ;;  %v2284_v8 = vcombine.high %v2144_v44, %v2232_v7  ;;  %v5538_v20 = vpop.f32.mrb[33].mxu1 }
 0x6ba   :  { %v2235_v13 = vpop.f32.mrb[34].mxu1 }
 0x6bb   :  { %v2291_v16 = vrot.slane %v2283_v22, %v6336_v39  ;;  %v2298_v12 = vrot.slane %v2284_v8, %v6336_v39  ;;  %v2351_v17 = vcombine.low %v2147_v60, %v2235_v13  ;;  %v2352_v18 = vcombine.high %v2147_v60, %v2235_v13  ;;  %v5539_v19 = vpop.f32.mrb[35].mxu1 }
 0x6bd   :  { %v2315_v21 = vcombine.low %v2291_v16, %v2307_v9  ;;  %v2316_v23 = vcombine.high %v2291_v16, %v2307_v9  ;;  %v2331_v24 = vcombine.low %v2298_v12, %v2314_v5  ;;  %v2332_v33 = vcombine.high %v2298_v12, %v2314_v5 }
 0x6be   :  { %v2359_v36 = vrot.slane %v2351_v17, %v6336_v39  ;;  %v2366_v37 = vrot.slane %v2352_v18, %v6336_v39  ;;  %v5808_v18 = vld [vmem:[%s6062_s30 + $0x8] sm:$0xff]   ;;  %s7139_s30 = sld [smem:[#allocation13_spill]] }
 0x6bf   :  { %v2323_v38 = vrot.slane %v2315_v21, %v6338_v46  ;;  %v2330_v10 = vrot.slane %v2316_v23, %v6338_v46  ;;  %v2339_v4 = vrot.slane %v2331_v24, %v6338_v46  ;;  %v2346_v41 = vrot.slane %v2332_v33, %v6338_v46  ;;  %5549 = vmatpush3.bf16.msra.mxu1 %v5808_v18 }
 0x6c0   :  { %v2383_v42 = vcombine.low %v2359_v36, %v2375_v34  ;;  %v2384_v14 = vcombine.high %v2359_v36, %v2375_v34  ;;  %v2399_v26 = vcombine.low %v2366_v37, %v2382_v31  ;;  %v2400_v43 = vcombine.high %v2366_v37, %v2382_v31  ;;  %5562 = vmatprep.subr.bf16.mxu1 %v5983_v35 }
 0x6c1   :  { %v2419_v45 = vcombine.low %v2323_v38, %v2330_v10  ;;  %v5260_v11 = vcombine.high %v2323_v38, %v2330_v10  ;;  %v2435_v48 = vcombine.low %v2339_v4, %v2346_v41  ;;  %v5261_v29 = vcombine.high %v2339_v4, %v2346_v41 }
 0x6c2   :  { %v2391_v15 = vrot.slane %v2383_v42, %v6338_v46  ;;  %v2398_v49 = vrot.slane %v2384_v14, %v6338_v46  ;;  %v2407_v30 = vrot.slane %v2399_v26, %v6338_v46  ;;  %v2414_v40 = vrot.slane %v2400_v43, %v6338_v46 }
 0x6c3   :  { %v2426_v50 = vrot.slane %v2419_v45, %v6336_v39  ;;  %v2434_v47 = vrot.slane %v5260_v11, %v6336_v39  ;;  %v2442_v51 = vrot.slane %v2435_v48, %v6336_v39  ;;  %v2450_v52 = vrot.slane %v5261_v29, %v6336_v39 }
 0x6c4   :  { %v2487_v54 = vcombine.low %v2391_v15, %v2398_v49  ;;  %v5262_v55 = vcombine.high %v2391_v15, %v2398_v49  ;;  %v2503_v56 = vcombine.low %v2407_v30, %v2414_v40  ;;  %v5263_v44 = vcombine.high %v2407_v30, %v2414_v40  ;;  %v5264_v30 = vld [vmem:[%s6067_s6] ss:$0 sm:$0xff]  ;;  %s7140_s6 = sld [smem:[#allocation17_spill]] }
 0x6c5   :  { %v2452_v57 = vcombine.high %v2426_v50, %v2434_v47  ;;  %v2468_v58 = vcombine.high %v2442_v51, %v2450_v52  ;;  %v2451_v59 = vcombine.low %v2426_v50, %v2434_v47  ;;  %v2467_v60 = vcombine.low %v2442_v51, %v2450_v52 }
 0x6c6   :  { %v2494_v61 = vrot.slane %v2487_v54, %v6336_v39  ;;  %v2502_v62 = vrot.slane %v5262_v55, %v6336_v39  ;;  %v2510_v63 = vrot.slane %v2503_v56, %v6336_v39  ;;  %v2518_v0 = vrot.slane %v5263_v44, %v6336_v39 }
 0x6c7   :  { %v2466_v1 = vrot.slane %v2452_v57, %v6338_v46  ;;  %v2482_v28 = vrot.slane %v2468_v58, %v6338_v46  ;;  %v2459_v2 = vrot.slane %v2451_v59, %v6338_v46  ;;  %v2475_v53 = vrot.slane %v2467_v60, %v6338_v46  ;;  %v5809_v60 = vld [vmem:[%s7133_s29] sm:$0xff]  }
 0x6c8   :  { %v2520_v3 = vcombine.high %v2494_v61, %v2502_v62  ;;  %v2536_v6 = vcombine.high %v2510_v63, %v2518_v0  ;;  %v2519_v7 = vcombine.low %v2494_v61, %v2502_v62  ;;  %v2535_v22 = vcombine.low %v2510_v63, %v2518_v0  ;;  %5555 = vmatpush3.bf16.msra.mxu0 %v5809_v60 }
 0x6c9   :  { %v2485_v8 = vcombine.low %v2466_v1, %v2482_v28  ;;  %v2483_v20 = vcombine.low %v2459_v2, %v2475_v53  ;;  %v2484_v9 = vcombine.high %v2459_v2, %v2475_v53  ;;  %v2486_v5 = vcombine.high %v2466_v1, %v2482_v28  ;;  %5556 = vmatprep.subr.bf16.mxu0 %v5983_v35 }
 0x6ca   :  { %v2534_v13 = vrot.slane %v2520_v3, %v6338_v46  ;;  %v2550_v16 = vrot.slane %v2536_v6, %v6338_v46  ;;  %v2527_v12 = vrot.slane %v2519_v7, %v6338_v46  ;;  %v2543_v17 = vrot.slane %v2535_v22, %v6338_v46 }
 0x6cc   :  { %v2553_v19 = vcombine.low %v2534_v13, %v2550_v16  ;;  %v2552_v21 = vcombine.high %v2527_v12, %v2543_v17  ;;  %v2551_v23 = vcombine.low %v2527_v12, %v2543_v17  ;;  %v2554_v24 = vcombine.high %v2534_v13, %v2550_v16  ;;  %5557 = vmatpush3.bf16.msra.mxu0 %v5810_v32  ;;  %v5268_v17 = vld [vmem:[%s7134_s3] ss:$0 sm:$0xff] }
 0x6cd   :  { %5574 = vmatprep.subr.bf16.mxu0 %v5983_v35 }
 0x6ce   :  { %v5728_v33 = vpack.i.bf16 %v2553_v19, %v2485_v8  ;;  %v5723_v34 = vpack.i.bf16 %v2552_v21, %v2484_v9  ;;  %v5733_v31 = vpack.i.bf16 %v2554_v24, %v2486_v5  ;;  %v5269_v24 = vld [vmem:[%s7135_s8] ss:$0 sm:$0xff] }
 0x6d0   :  { %5729 = vrot.lane.b32.xlu1 %v5728_v33, %s5990_s13  ;;  %5724 = vrot.lane.b32.xlu0 %v5723_v34, %s5991_s21 }
 0x6d4   :  { %5734 = vrot.lane.b32.xlu1 %v5733_v31, %s5992_s25 }
 0x742   :  { %v5730_v36 = vpop.permute.xlu1 %5729  ;;  %v5725_v37 = vpop.permute.xlu0 %5724 }
 0x743   :  { %v5727_v38 = vunpack.i.h.bf16 %v5725_v37  ;;  %v5726_v10 = vunpack.i.l.bf16 %v5725_v37  ;;  %v5732_v4 = vunpack.i.h.bf16 %v5730_v36  ;;  %v5731_v41 = vunpack.i.l.bf16 %v5730_v36  ;;  %v5811_v37 = vld [vmem:[%s7136_s14] sm:$0xff]  }
 0x745   :  { %v2579_v42 = vsel %vm1825_vm2, %v2483_v20, %v5726_v10  ;;  %v2580_v14 = vsel %vm1825_vm2, %v2551_v23, %v5727_v38  ;;  %v5812_v38 = vld [vmem:[%s7136_s14 + $0x8] sm:$0xff]   ;;  %v5813_v10 = vld [vmem:[%s7136_s14 + $0x10] sm:$0xff]  }
 0x746   :  { %v5735_v26 = vpop.permute.xlu1 %5734  ;;  %v2581_v11 = vsel %vm2014_vm3, %v2579_v42, %v5731_v41  ;;  %v2582_v48 = vsel %vm2014_vm3, %v2580_v14, %v5732_v4  ;;  %v5814_v4 = vld [vmem:[%s7136_s14 + $0x18] sm:$0xff]   ;;  %v5270_v41 = vld [vmem:[%s7137_s19] ss:$0 sm:$0xff] }
 0x747   :  { %v5737_v43 = vunpack.i.h.bf16 %v5735_v26  ;;  %v5736_v45 = vunpack.i.l.bf16 %v5735_v26 }
 0x749   :  { %v2584_v29 = vsel %vm2583_vm4, %v2581_v11, %v5736_v45  ;;  %v2585_v15 = vsel %vm2583_vm4, %v2582_v48, %v5737_v43 }
 0x74a   :  { %v2586_v49 = vpack.c.bf16 %v2585_v15, %v2584_v29 }
 0x74c   :  { %5551 = vmatmul.mubr.msk.bf16.vlgmr.msra.gmra.mrb[36].mxu1 %vm691_vm0, %v2586_v49 }
 0x74d   :  { %5570 = vmatprep.mubr.msk.bf16.mxu1 %vm5984_vm1, %v5983_v35  ;;  %5563 = vmatpush3.bf16.msra.mxu1 %v5811_v37 }
 0x74e   :  { %5564 = vmatprep.subr.bf16.mxu1 %v5983_v35 }
 0x751   :  { %5565 = vmatpush3.bf16.msra.mxu1 %v5812_v38 }
 0x752   :  { %5566 = vmatprep.subr.bf16.mxu1 %v5983_v35 }
 0x755   :  { %5567 = vmatpush3.bf16.msra.mxu1 %v5813_v10 }
 0x756   :  { %5568 = vmatprep.subr.bf16.mxu1 %v5983_v35 }
 0x759   :  { %5569 = vmatpush3.bf16.msra.mxu1 %v5814_v4 }
 0x75a   :  { %5590 = vmatprep.subr.bf16.mxu1 %v5983_v35 }
 0x81f   :  { %v2647_v40 = vpop.f32.mrb[36].mxu1 }
 0x820   :  { %v2648_v50 = vadd.f32 %v5264_v30, %v2647_v40  ;;  %v5552_v47 = vpop.f32.mrb[37].mxu1 }
 0x821   :  { %v2650_v51 = vpop.f32.mrb[38].mxu1 }
 0x822   :  { %v6638_v52 = vadd.f32 %v2648_v50, %v6256_v25  ;;  %v2651_v54 = vadd.f32 %v5264_v30, %v2650_v51  ;;  %v5553_v55 = vpop.f32.mrb[39].mxu1 }
 0x824   :  { %v6641_v56 = vadd.f32 %v2651_v54, %v6258_v27  ;;  %v2658_v44 = vsel %vm691_vm0, %v6638_v52, 0.0  ;;  %v2666_v58 = vmul.f32 %v6638_v52, %v6638_v52 }
 0x825   :  { %2659 = vadd.xlane.f32.xlu1 %v2658_v44 }
 0x826   :  { %v2661_v57 = vsel %vm691_vm0, %v6641_v56, 0.0  ;;  %v2668_v25 = vsel %vm691_vm0, %v2666_v58, 0.0  ;;  %v2667_v59 = vmul.f32 %v6641_v56, %v6641_v56 }
 0x827   :  { %2662 = vadd.xlane.f32.xlu0 %v2661_v57 }
 0x828   :  { %v2671_v27 = vsel %vm691_vm0, %v2667_v59, 0.0 }
 0x82b   :  { %2669 = vadd.xlane.f32.xlu0 %v2668_v25 }
 0x82f   :  { %2672 = vadd.xlane.f32.xlu0 %v2671_v27 }
 0x8b2   :  { %v2660_v61 = vpop.xlane.xlu1 %2659 }
 0x8b3   :  { %v2664_v63 = vmul.f32 0.03125, %v2660_v61  ;;  %v5274_v61 = vld [vmem:[%s7138_s24] ss:$0 sm:$0xff] }
 0x8b4   :  { %v2663_v62 = vpop.xlane.xlu0 %2662 }
 0x8b5   :  { %v2676_v1 = vmul.f32 %v2664_v63, %v2664_v63  ;;  %v2665_v28 = vmul.f32 0.03125, %v2663_v62  ;;  %v2682_v13 = vsub.f32 %v6638_v52, %v2664_v63 }
 0x8b7   :  { %v2677_v6 = vmul.f32 %v2665_v28, %v2665_v28  ;;  %v2683_v18 = vsub.f32 %v6641_v56, %v2665_v28 }
 0x8b8   :  { %v2670_v0 = vpop.xlane.xlu0 %2669 }
 0x8b9   :  { %v2674_v2 = vmul.f32 0.03125, %v2670_v0 }
 0x8bb   :  { %v2678_v53 = vsub.f32 %v2674_v2, %v2676_v1 }
 0x8bc   :  { %v2673_v3 = vpop.xlane.xlu0 %2672 }
 0x8bd   :  { %v2680_v7 = vmax.f32 %v2678_v53, 0.0  ;;  %v2675_v22 = vmul.f32 0.03125, %v2673_v3 }
 0x8bf   :  { %v2684_v8 = vadd.f32 1e-06, %v2680_v7  ;;  %v2679_v20 = vsub.f32 %v2675_v22, %v2677_v6 }
 0x8c1   :  { %5865 = vrsqrt.f32 %v2684_v8  ;;  %v2681_v9 = vmax.f32 %v2679_v20, 0.0  ;;  %v5815_v20 = vld [vmem:[%s7139_s30] sm:$0xff]  }
 0x8c3   :  { %v2685_v5 = vadd.f32 1e-06, %v2681_v9  ;;  %v5816_v9 = vld [vmem:[%s7140_s6] sm:$0xff]  }
 0x8c5   :  { %5867 = vrsqrt.f32 %v2685_v5  ;;  %v5817_v5 = vld [vmem:[%s7139_s30 + $0x8] sm:$0xff]  }
 0x8cb   :  { %v5866_v16 = vpop.eup %5865 }
 0x8cc   :  { %v2688_v12 = vmul.f32 %v5866_v16, %v2682_v13  ;;  %v5818_v13 = vld [vmem:[%s7140_s6 + $0x8] sm:$0xff]  }
 0x8ce   :  { %v2696_v23 = vmul.f32 %v5268_v17, %v2688_v12 }
 0x8cf   :  { %v5868_v19 = vpop.eup %5867 }
 0x8d0   :  { %v2689_v21 = vmul.f32 %v5868_v19, %v2683_v18  ;;  %v2704_v34 = vadd.f32 %v5269_v24, %v2696_v23 }
 0x8d2   :  { %v2697_v33 = vmul.f32 %v5268_v17, %v2689_v21 }
 0x8d4   :  { %v2705_v31 = vadd.f32 %v5269_v24, %v2697_v33 }
 0x8d6   :  { %v2706_v36 = vpack.c.bf16 %v2705_v31, %v2704_v34 }
 0x8d8   :  { %5559 = vmatmul.mubr.msk.bf16.vlgmr.msra.gmra.mrb[20].mxu0 %vm691_vm0, %v2706_v36 }
 0x8d9   :  { %5578 = vmatprep.mubr.msk.bf16.mxu0 %vm5984_vm1, %v5983_v35  ;;  %5575 = vmatpush3.bf16.msra.mxu0 %v5815_v20 }
 0x8da   :  { %5576 = vmatprep.subr.bf16.mxu0 %v5983_v35 }
 0x8dd   :  { %5577 = vmatpush3.bf16.msra.mxu0 %v5817_v5 }
 0x8de   :  { %5582 = vmatprep.subr.bf16.mxu0 %v5983_v35 }
 0x9ab   :  { %v2767_v42 = vpop.f32.mrb[20].mxu0 }
 0x9ac   :  { %v2768_v14 = vadd.f32 %v5270_v41, %v2767_v42  ;;  %v5560_v26 = vpop.f32.mrb[21].mxu0 }
 0x9ad   :  { %v2770_v43 = vpop.f32.mrb[22].mxu0 }
 0x9ae   :  { %v2774_v45 = vmul.f32 %v2768_v14, %v2768_v14  ;;  %v2771_v11 = vadd.f32 %v5270_v41, %v2770_v43  ;;  %v5561_v48 = vpop.f32.mrb[23].mxu0 }
 0x9b0   :  { %v2776_v29 = vmul.f32 %v2774_v45, %v2768_v14  ;;  %v2775_v15 = vmul.f32 %v2771_v11, %v2771_v11 }
 0x9b2   :  { %v2778_v49 = vmul.f32 0.044715, %v2776_v29  ;;  %v2777_v30 = vmul.f32 %v2775_v15, %v2771_v11  ;;  %v5281_v29 = vld [vmem:[%s7142_s16] ss:$0 sm:$0xff] }
 0x9b4   :  { %v2780_v40 = vadd.f32 %v2778_v49, %v2768_v14  ;;  %v2779_v50 = vmul.f32 0.044715, %v2777_v30 }
 0x9b6   :  { %v2782_v47 = vmul.f32 0.7978846, %v2780_v40  ;;  %v2781_v51 = vadd.f32 %v2779_v50, %v2771_v11  ;;  %v5819_v40 = vld [vmem:[%s7143_s18] sm:$0xff]  }
 0x9b8   :  { %5869 = vtanh.f32 %v2782_v47  ;;  %v2783_v54 = vmul.f32 0.7978846, %v2781_v51  ;;  %v5820_v47 = vld [vmem:[%s7143_s18 + $0x8] sm:$0xff]   ;;  %v5282_v51 = vld [vmem:[%s7144_s22] ss:$0 sm:$0xff] }
 0x9ba   :  { %5871 = vtanh.f32 %v2783_v54 }
 0x9c2   :  { %v5870_v55 = vpop.eup %5869 }
 0x9c3   :  { %v2786_v44 = vadd.f32 1.0, %v5870_v55 }
 0x9c4   :  { %v5872_v57 = vpop.eup %5871 }
 0x9c5   :  { %v2788_v58 = vmul.f32 0.5, %v2786_v44  ;;  %v2787_v25 = vadd.f32 1.0, %v5872_v57 }
 0x9c7   :  { %v2789_v59 = vmul.f32 0.5, %v2787_v25  ;;  %v2790_v27 = vmul.f32 %v2788_v58, %v2768_v14  ;;  %v5280_v14 = vld [vmem:[%s7141_s15] ss:$0 sm:$0xff] }
 0x9c9   :  { %v2791_v60 = vmul.f32 %v2789_v59, %v2771_v11 }
 0x9cb   :  { %v2792_v32 = vpack.c.bf16 %v2791_v60, %v2790_v27 }
 0x9cd   :  { %5571 = vmatmul.mubr.msk.bf16.vlgmr.msra.gmra.mrb[40].mxu1 %vm2832_vm5, %v2792_v32 }
 0x9ce   :  { %5594 = vmatprep.mubr.msk.bf16.mxu1 %vm5984_vm1, %v5983_v35  ;;  %5591 = vmatpush3.bf16.msra.mxu1 %v5816_v9 }
 0x9cf   :  { %5592 = vmatprep.subr.bf16.mxu1 %v5983_v35 }
 0x9d2   :  { %5593 = vmatpush3.bf16.msra.mxu1 %v5818_v13 }
 0x9d3   :  { %5604 = vmatprep.subr.bf16.mxu1 %v5983_v35 }
 0xaa0   :  { %v2870_v62 = vpop.f32.mrb[40].mxu1 }
 0xaa1   :  { %v2871_v63 = vadd.f32 %v5274_v61, %v2870_v62  ;;  %v5572_v0 = vpop.f32.mrb[41].mxu1 }
 0xaa2   :  { %v2873_v1 = vpop.f32.mrb[42].mxu1 }
 0xaa3   :  { %v6678_v28 = vadd.f32 %v2871_v63, %v6638_v52  ;;  %v2874_v2 = vadd.f32 %v5274_v61, %v2873_v1  ;;  %v5573_v53 = vpop.f32.mrb[43].mxu1  ;;  %v5286_v61 = vld [vmem:[%s7145_s23] ss:$0 sm:$0xff] }
 0xaa5   :  { %v6681_v3 = vadd.f32 %v2874_v2, %v6641_v56  ;;  %v2881_v6 = vsel %vm691_vm0, %v6678_v28, 0.0  ;;  %v2889_v7 = vmul.f32 %v6678_v28, %v6678_v28 }
 0xaa6   :  { %2882 = vadd.xlane.f32.xlu1 %v2881_v6 }
 0xaa7   :  { %v2884_v22 = vsel %vm691_vm0, %v6681_v3, 0.0  ;;  %v2890_v52 = vmul.f32 %v6681_v3, %v6681_v3  ;;  %v2891_v8 = vsel %vm691_vm0, %v2889_v7, 0.0 }
 0xaa8   :  { %2885 = vadd.xlane.f32.xlu0 %v2884_v22 }
 0xaa9   :  { %v2894_v56 = vsel %vm691_vm0, %v2890_v52, 0.0 }
 0xaaa   :  { %2892 = vadd.xlane.f32.xlu1 %v2891_v8 }
 0xaac   :  { %2895 = vadd.xlane.f32.xlu0 %v2894_v56 }
 0xb33   :  { %v2883_v16 = vpop.xlane.xlu1 %2882 }
 0xb34   :  { %v2887_v12 = vmul.f32 0.03125, %v2883_v16 }
 0xb35   :  { %v2886_v17 = vpop.xlane.xlu0 %2885 }
 0xb36   :  { %v2888_v18 = vmul.f32 0.03125, %v2886_v17  ;;  %v2899_v21 = vmul.f32 %v2887_v12, %v2887_v12  ;;  %v2905_v41 = vsub.f32 %v6678_v28, %v2887_v12 }
 0xb37   :  { %v2893_v19 = vpop.xlane.xlu1 %2892 }
 0xb38   :  { %v2897_v23 = vmul.f32 0.03125, %v2893_v19  ;;  %v2900_v33 = vmul.f32 %v2888_v18, %v2888_v18  ;;  %v2906_v26 = vsub.f32 %v6681_v3, %v2888_v18 }
 0xb39   :  { %v2896_v24 = vpop.xlane.xlu0 %2895 }
 0xb3a   :  { %v2901_v34 = vsub.f32 %v2897_v23, %v2899_v21  ;;  %v2898_v31 = vmul.f32 0.03125, %v2896_v24 }
 0xb3c   :  { %v2903_v36 = vmax.f32 %v2901_v34, 0.0  ;;  %v2902_v37 = vsub.f32 %v2898_v31, %v2900_v33 }
 0xb3e   :  { %v2907_v38 = vadd.f32 1e-06, %v2903_v36  ;;  %v2904_v10 = vmax.f32 %v2902_v37, 0.0 }
 0xb40   :  { %5873 = vrsqrt.f32 %v2907_v38  ;;  %v2908_v4 = vadd.f32 1e-06, %v2904_v10 }
 0xb42   :  { %5875 = vrsqrt.f32 %v2908_v4 }
 0xb4a   :  { %v5874_v42 = vpop.eup %5873 }
 0xb4b   :  { %v2911_v43 = vmul.f32 %v5874_v42, %v2905_v41 }
 0xb4c   :  { %v5876_v45 = vpop.eup %5875 }
 0xb4d   :  { %v2912_v11 = vmul.f32 %v5876_v45, %v2906_v26  ;;  %v2919_v48 = vmul.f32 %v5280_v14, %v2911_v43 }
 0xb4f   :  { %v2920_v15 = vmul.f32 %v5280_v14, %v2912_v11  ;;  %v2927_v49 = vadd.f32 %v5281_v29, %v2919_v48 }
 0xb51   :  { %v2928_v30 = vadd.f32 %v5281_v29, %v2920_v15 }
 0xb53   :  { %v2929_v50 = vpack.c.bf16 %v2928_v30, %v2927_v49 }
 0xb55   :  { %5579 = vmatmul.mubr.msk.bf16.vlgmr.msra.gmra.mrb[24].mxu0 %vm691_vm0, %v2929_v50  ;;  %5595 = vmatmul.mubr.msk.bf16.vlgmr.msra.gmra.mrb[44].mxu1 %vm691_vm0, %v2929_v50 }
 0xb56   :  { %5583 = vmatpush3.bf16.msra.mxu0 %v5819_v40  ;;  %5586 = vmatprep.mubr.msk.bf16.mxu0 %vm5984_vm1, %v5983_v35 }
 0xb57   :  { %5584 = vmatprep.subr.bf16.mxu0 %v5983_v35  ;;  %5606 = vmatprep.mubr.msk.bf16.mxu1 %vm5984_vm1, %v5983_v35 }
 0xb5a   :  { %5585 = vmatpush3.bf16.msra.mxu0 %v5820_v47 }
 0xb5b   :  { %5598 = vmatprep.subr.bf16.mxu0 %v5983_v35 }
 0xb5d   :  { %5587 = vmatmul.mubr.msk.bf16.vlgmr.msra.gmra.mrb[28].mxu0 %vm691_vm0, %v2929_v50 }
 0xb5e   :  { %5600 = vmatprep.mubr.msk.bf16.mxu0 %vm5984_vm1, %v5983_v35 }
 0xc28   :  { %v2990_v54 = vpop.f32.mrb[24].mxu0  ;;  %v6719_v55 = vpop.f32.mrb[44].mxu1 }
 0xc29   :  { %v6721_v44 = vadd.f32 %v5282_v51, %v2990_v54  ;;  %v5580_v57 = vpop.f32.mrb[25].mxu0  ;;  %v5596_v58 = vpop.f32.mrb[45].mxu1 }
 0xc2a   :  { %v2993_v25 = vpop.f32.mrb[26].mxu0  ;;  %v6723_v59 = vpop.f32.mrb[46].mxu1 }
 0xc2b   :  { %v6725_v27 = vadd.f32 %v5282_v51, %v2993_v25  ;;  %3127 = vrot.lane.b32.xlu1 %v6721_v44, %s5985_s0  ;;  %v5581_v60 = vpop.f32.mrb[27].mxu0  ;;  %v5597_v32 = vpop.f32.mrb[47].mxu1 }
 0xc2d   :  { %3129 = vrot.lane.b32.xlu0 %v6725_v27, %s5985_s0 }
 0xc30   :  { %v3054_v62 = vpop.f32.mrb[28].mxu0 }
 0xc31   :  { %v3055_v63 = vadd.f32 %v5286_v61, %v3054_v62  ;;  %v5588_v0 = vpop.f32.mrb[29].mxu0 }
 0xc32   :  { %v3057_v1 = vpop.f32.mrb[30].mxu0 }
 0xc33   :  { %v3058_v2 = vadd.f32 %v5286_v61, %v3057_v1  ;;  %3423 = vrot.lane.b32.xlu1 %v3055_v63, %s5985_s0  ;;  %v5589_v53 = vpop.f32.mrb[31].mxu0 }
 0xc35   :  { %3425 = vrot.lane.b32.xlu0 %v3058_v2, %s5985_s0 }
 0xc37   :  { %3429 = vrot.lane.b32.xlu1 %v3055_v63, %s5986_s5 }
 0xc39   :  { %3437 = vrot.lane.b32.xlu0 %v3058_v2, %s5987_s9 }
 0xc3b   :  { %3435 = vrot.lane.b32.xlu1 %v3055_v63, %s5987_s9 }
 0xc3d   :  { %3135 = vrot.lane.b32.xlu0 %v6725_v27, %s5986_s5 }
 0xc3f   :  { %3431 = vrot.lane.b32.xlu1 %v3058_v2, %s5986_s5 }
 0xc41   :  { %3141 = vrot.lane.b32.xlu0 %v6725_v27, %s5987_s9 }
 0xc43   :  { %3133 = vrot.lane.b32.xlu1 %v6721_v44, %s5986_s5 }
 0xc47   :  { %3139 = vrot.lane.b32.xlu1 %v6721_v44, %s5987_s9 }
 0xc9d   :  { %v6746_v6 = vpop.permute.xlu1 %3127 }
 0xc9f   :  { %v3130_v7 = vpop.permute.xlu0 %3129 }
 0xca5   :  { %v3424_v22 = vpop.permute.xlu1 %3423 }
 0xca7   :  { %v3426_v52 = vpop.permute.xlu0 %3425 }
 0xca9   :  { %v3430_v8 = vpop.permute.xlu1 %3429 }
 0xcaa   :  { %v3441_v20 = vcombine.low %v3055_v63, %v3430_v8  ;;  %v3442_v9 = vcombine.high %v3055_v63, %v3430_v8 }
 0xcab   :  { %v3438_v56 = vpop.permute.xlu0 %3437 }
 0xcac   :  { %v3525_v5 = vcombine.low %v3426_v52, %v3438_v56  ;;  %v3526_v13 = vcombine.high %v3426_v52, %v3438_v56  ;;  %v3449_v19 = vrot.slane %v3441_v20, %v6336_v39  ;;  %v3456_v21 = vrot.slane %v3442_v9, %v6336_v39 }
 0xcad   :  { %v3436_v16 = vpop.permute.xlu1 %3435 }
 0xcae   :  { %v3457_v12 = vcombine.low %v3424_v22, %v3436_v16  ;;  %v3458_v17 = vcombine.high %v3424_v22, %v3436_v16  ;;  %v3533_v33 = vrot.slane %v3525_v5, %v6336_v39  ;;  %v3540_v34 = vrot.slane %v3526_v13, %v6336_v39 }
 0xcaf   :  { %v3136_v18 = vpop.permute.xlu0 %3135 }
 0xcb0   :  { %v3465_v23 = vrot.slane %v3457_v12, %v6336_v39  ;;  %v3472_v24 = vrot.slane %v3458_v17, %v6336_v39  ;;  %v3213_v4 = vcombine.low %v6725_v27, %v3136_v18  ;;  %v3214_v41 = vcombine.high %v6725_v27, %v3136_v18 }
 0xcb1   :  { %v3432_v31 = vpop.permute.xlu1 %3431 }
 0xcb2   :  { %v3473_v36 = vcombine.low %v3449_v19, %v3465_v23  ;;  %v3474_v37 = vcombine.high %v3449_v19, %v3465_v23  ;;  %v3489_v38 = vcombine.low %v3456_v21, %v3472_v24  ;;  %v3490_v10 = vcombine.high %v3456_v21, %v3472_v24 }
 0xcb3   :  { %v3509_v42 = vcombine.low %v3058_v2, %v3432_v31  ;;  %v3510_v14 = vcombine.high %v3058_v2, %v3432_v31  ;;  %v3142_v26 = vpop.permute.xlu0 %3141  ;;  %v3221_v60 = vrot.slane %v3213_v4, %v6336_v39  ;;  %v3228_v32 = vrot.slane %v3214_v41, %v6336_v39 }
 0xcb4   :  { %v3481_v43 = vrot.slane %v3473_v36, %v6338_v46  ;;  %v3488_v45 = vrot.slane %v3474_v37, %v6338_v46  ;;  %v3497_v11 = vrot.slane %v3489_v38, %v6338_v46  ;;  %v3504_v48 = vrot.slane %v3490_v10, %v6338_v46 }
 0xcb5   :  { %v3517_v29 = vrot.slane %v3509_v42, %v6336_v39  ;;  %v3524_v15 = vrot.slane %v3510_v14, %v6336_v39  ;;  %v3229_v49 = vcombine.low %v3130_v7, %v3142_v26  ;;  %v3230_v30 = vcombine.high %v3130_v7, %v3142_v26  ;;  %v3134_v54 = vpop.permute.xlu1 %3133 }
 0xcb6   :  { %v3577_v40 = vcombine.low %v3481_v43, %v3488_v45  ;;  %v5298_v50 = vcombine.high %v3481_v43, %v3488_v45  ;;  %v3593_v47 = vcombine.low %v3497_v11, %v3504_v48  ;;  %v5299_v51 = vcombine.high %v3497_v11, %v3504_v48 }
 0xcb7   :  { %v3541_v57 = vcombine.low %v3517_v29, %v3533_v33  ;;  %v3542_v58 = vcombine.high %v3517_v29, %v3533_v33  ;;  %v3557_v25 = vcombine.low %v3524_v15, %v3540_v34  ;;  %v3558_v27 = vcombine.high %v3524_v15, %v3540_v34 }
 0xcb8   :  { %v6769_v1 = vrot.slane %v3577_v40, %v6336_v39  ;;  %v6772_v2 = vrot.slane %v5298_v50, %v6336_v39  ;;  %v3237_v53 = vrot.slane %v3229_v49, %v6336_v39  ;;  %v3244_v7 = vrot.slane %v3230_v30, %v6336_v39 }
 0xcb9   :  { %v3549_v61 = vrot.slane %v3541_v57, %v6338_v46  ;;  %v3556_v62 = vrot.slane %v3542_v58, %v6338_v46  ;;  %v3565_v63 = vrot.slane %v3557_v25, %v6338_v46  ;;  %v3572_v0 = vrot.slane %v3558_v27, %v6338_v46  ;;  %v3140_v16 = vpop.permute.xlu1 %3139 }
 0xcba   :  { %v6777_v22 = vrot.slane %v3593_v47, %v6336_v39  ;;  %v6780_v52 = vrot.slane %v5299_v51, %v6336_v39  ;;  %v3245_v20 = vcombine.low %v3221_v60, %v3237_v53  ;;  %v3246_v9 = vcombine.high %v3221_v60, %v3237_v53 }
 0xcbb   :  { %v3645_v8 = vcombine.low %v3549_v61, %v3556_v62  ;;  %v5300_v56 = vcombine.high %v3549_v61, %v3556_v62  ;;  %v3261_v5 = vcombine.low %v3228_v32, %v3244_v7  ;;  %v3262_v13 = vcombine.high %v3228_v32, %v3244_v7 }
 0xcbc   :  { %v3661_v12 = vcombine.low %v3565_v63, %v3572_v0  ;;  %v5301_v17 = vcombine.high %v3565_v63, %v3572_v0  ;;  %v3145_v18 = vcombine.low %v6721_v44, %v3134_v54  ;;  %v3146_v19 = vcombine.high %v6721_v44, %v3134_v54 }
 0xcbd   :  { %v3253_v21 = vrot.slane %v3245_v20, %v6338_v46  ;;  %v3260_v23 = vrot.slane %v3246_v9, %v6338_v46  ;;  %v3269_v24 = vrot.slane %v3261_v5, %v6338_v46  ;;  %v3276_v33 = vrot.slane %v3262_v13, %v6338_v46 }
 0xcbe   :  { %v6789_v34 = vrot.slane %v3645_v8, %v6336_v39  ;;  %v6792_v31 = vrot.slane %v5300_v56, %v6336_v39  ;;  %v3161_v36 = vcombine.low %v6746_v6, %v3140_v16  ;;  %v3162_v37 = vcombine.high %v6746_v6, %v3140_v16 }
 0xcbf   :  { %v3349_v38 = vcombine.low %v3253_v21, %v3260_v23  ;;  %v5296_v44 = vcombine.high %v3253_v21, %v3260_v23  ;;  %v3365_v10 = vcombine.low %v3269_v24, %v3276_v33  ;;  %v5297_v4 = vcombine.high %v3269_v24, %v3276_v33 }
 0xcc0   :  { %v3153_v41 = vrot.slane %v3145_v18, %v6336_v39  ;;  %v3160_v42 = vrot.slane %v3146_v19, %v6336_v39  ;;  %v3169_v14 = vrot.slane %v3161_v36, %v6336_v39  ;;  %v3176_v26 = vrot.slane %v3162_v37, %v6336_v39 }
 0xcc1   :  { %v6801_v43 = vrot.slane %v3349_v38, %v6336_v39  ;;  %v6804_v45 = vrot.slane %v5296_v44, %v6336_v39  ;;  %v6807_v6 = vrot.slane %v3365_v10, %v6336_v39  ;;  %v6810_v11 = vrot.slane %v5297_v4, %v6336_v39 }
 0xcc2   :  { %v3177_v48 = vcombine.low %v3153_v41, %v3169_v14  ;;  %v3178_v29 = vcombine.high %v3153_v41, %v3169_v14  ;;  %v3193_v15 = vcombine.low %v3160_v42, %v3176_v26  ;;  %v3194_v49 = vcombine.high %v3160_v42, %v3176_v26 }
 0xcc3   :  { %v3668_v30 = vrot.slane %v3661_v12, %v6336_v39  ;;  %v3676_v40 = vrot.slane %v5301_v17, %v6336_v39  ;;  %v3609_v50 = vcombine.low %v6769_v1, %v6772_v2  ;;  %v3625_v47 = vcombine.low %v6777_v22, %v6780_v52 }
 0xcc4   :  { %v3185_v51 = vrot.slane %v3177_v48, %v6338_v46  ;;  %v3192_v54 = vrot.slane %v3178_v29, %v6338_v46  ;;  %v3201_v57 = vrot.slane %v3193_v15, %v6338_v46  ;;  %v3208_v58 = vrot.slane %v3194_v49, %v6338_v46 }
 0xcc5   :  { %v3381_v25 = vcombine.low %v6801_v43, %v6804_v45  ;;  %v3397_v27 = vcombine.low %v6807_v6, %v6810_v11  ;;  %v3617_v63 = vrot.slane %v3609_v50, %v6338_v46  ;;  %v3633_v0 = vrot.slane %v3625_v47, %v6338_v46 }
 0xcc6   :  { %v3281_v60 = vcombine.low %v3185_v51, %v3192_v54  ;;  %v5294_v32 = vcombine.high %v3185_v51, %v3192_v54  ;;  %v3297_v61 = vcombine.low %v3201_v57, %v3208_v58  ;;  %v5295_v62 = vcombine.high %v3201_v57, %v3208_v58 }
 0xcc7   :  { %v3677_v53 = vcombine.low %v6789_v34, %v6792_v31  ;;  %v3693_v7 = vcombine.low %v3668_v30, %v3676_v40  ;;  %v3641_v17 = vcombine.low %v3617_v63, %v3633_v0  ;;  %v3642_v19 = vcombine.high %v3617_v63, %v3633_v0 }
 0xcc8   :  { %v3288_v8 = vrot.slane %v3281_v60, %v6336_v39  ;;  %v3296_v56 = vrot.slane %v5294_v32, %v6336_v39  ;;  %v3304_v20 = vrot.slane %v3297_v61, %v6336_v39  ;;  %v3312_v9 = vrot.slane %v5295_v62, %v6336_v39 }
 0xcc9   :  { %v3685_v5 = vrot.slane %v3677_v53, %v6338_v46  ;;  %v3701_v13 = vrot.slane %v3693_v7, %v6338_v46  ;;  %v3389_v23 = vrot.slane %v3381_v25, %v6338_v46  ;;  %v3405_v24 = vrot.slane %v3397_v27, %v6338_v46 }
 0xcca   :  { %v3313_v16 = vcombine.low %v3288_v8, %v3296_v56  ;;  %v3329_v12 = vcombine.low %v3304_v20, %v3312_v9  ;;  %v3610_v44 = vcombine.high %v6769_v1, %v6772_v2  ;;  %v3626_v10 = vcombine.high %v6777_v22, %v6780_v52 }
 0xccb   :  { %v3709_v18 = vcombine.low %v3685_v5, %v3701_v13  ;;  %v3710_v21 = vcombine.high %v3685_v5, %v3701_v13  ;;  %v3678_v42 = vcombine.high %v6789_v34, %v6792_v31  ;;  %v3694_v14 = vcombine.high %v3668_v30, %v3676_v40 }
 0xccc   :  { %v3321_v33 = vrot.slane %v3313_v16, %v6338_v46  ;;  %v3337_v36 = vrot.slane %v3329_v12, %v6338_v46  ;;  %v3624_v29 = vrot.slane %v3610_v44, %v6338_v46  ;;  %v3640_v15 = vrot.slane %v3626_v10, %v6338_v46 }
 0xccd   :  { %v3713_v37 = vpack.c.bf16 %v3709_v18, %v3641_v17  ;;  %v3714_v38 = vpack.c.bf16 %v3710_v21, %v3642_v19  ;;  %v3413_v1 = vcombine.low %v3389_v23, %v3405_v24  ;;  %v3414_v2 = vcombine.high %v3389_v23, %v3405_v24  ;;  %v5920_v17 = vld [vmem:[%s6017_s17 + $0x8] sm:$0xff] }
 0xcce   :  { %v3345_v4 = vcombine.low %v3321_v33, %v3337_v36  ;;  %v3346_v41 = vcombine.high %v3321_v33, %v3337_v36  ;;  %v3692_v22 = vrot.slane %v3678_v42, %v6338_v46  ;;  %v3314_v52 = vcombine.high %v3288_v8, %v3296_v56  ;;  %v5919_v56 = vld [vmem:[%s6017_s17] sm:$0xff]  ;;  %s7146_s17 = sld [smem:[#allocation18_spill]] }
 0xccf   :  { %v4017_v26 = vsel %vm1825_vm2, %v3713_v37, 0  ;;  %v4064_v48 = vsel %vm1825_vm2, %v3714_v38, 0  ;;  %v3330_v49 = vcombine.high %v3304_v20, %v3312_v9  ;;  %v3708_v34 = vrot.slane %v3694_v14, %v6338_v46 }
 0xcd0   :  { %5599 = vmatpush3.bf16.xpose.msra.mxu0 %v4017_v26  ;;  %5605 = vmatpush3.bf16.xpose.msra.mxu1 %v4064_v48  ;;  %v3382_v31 = vcombine.high %v6801_v43, %v6804_v45  ;;  %v3398_v30 = vcombine.high %v6807_v6, %v6810_v11  ;;  %v3417_v40 = vpack.c.bf16 %v3413_v1, %v3345_v4 }
 0xcd1   :  { %5610 = vmatprep.subr.bf16.mxu0 %v5983_v35  ;;  %5616 = vmatprep.subr.bf16.mxu1 %v5983_v35  ;;  %v3418_v50 = vpack.c.bf16 %v3414_v2, %v3346_v41  ;;  %v3643_v47 = vcombine.low %v3624_v29, %v3640_v15  ;;  %v3711_v51 = vcombine.low %v3692_v22, %v3708_v34 }
 0xcd2   :  { %v3644_v54 = vcombine.high %v3624_v29, %v3640_v15  ;;  %v3712_v57 = vcombine.high %v3692_v22, %v3708_v34  ;;  %v3328_v58 = vrot.slane %v3314_v52, %v6338_v46  ;;  %v3344_v25 = vrot.slane %v3330_v49, %v6338_v46 }
 0xcd3   :  { %v3715_v27 = vpack.c.bf16 %v3711_v51, %v3643_v47  ;;  %v3396_v32 = vrot.slane %v3382_v31, %v6338_v46  ;;  %v3412_v61 = vrot.slane %v3398_v30, %v6338_v46 }
 0xcd4   :  { %v3716_v60 = vpack.c.bf16 %v3712_v57, %v3644_v54  ;;  %v3347_v6 = vcombine.low %v3328_v58, %v3344_v25  ;;  %v3348_v11 = vcombine.high %v3328_v58, %v3344_v25  ;;  %v5290_v34 = vld [vmem:[%s7146_s17] ss:$0 sm:$0xff] }
 0xcd5   :  { %v4111_v43 = vsel %vm1825_vm2, %v3715_v27, 0  ;;  %v3415_v62 = vcombine.low %v3396_v32, %v3412_v61  ;;  %v3416_v63 = vcombine.high %v3396_v32, %v3412_v61  ;;  %v6893_v31 = vadd.f32 %v5290_v34, %v6719_v55 }
 0xcd6   :  { %v4158_v45 = vsel %vm1825_vm2, %v3716_v60, 0  ;;  %v6900_v30 = vadd.f32 %v5290_v34, %v6723_v59 }
 0xcd7   :  { %5601 = vmatmul.mubr.msk.bf16.vlgmr.msra.gmra.mrb[32].mxu0 %vm1825_vm2, %v3417_v40  ;;  %5607 = vmatmul.mubr.msk.bf16.vlgmr.msra.gmra.mrb[48].mxu1 %vm1825_vm2, %v3418_v50  ;;  %v3419_v0 = vpack.c.bf16 %v3415_v62, %v3347_v6  ;;  %v3420_v53 = vpack.c.bf16 %v3416_v63, %v3348_v11 }
 0xcd8   :  { %5611 = vmatpush3.bf16.xpose.msra.mxu0 %v4111_v43  ;;  %5617 = vmatpush3.bf16.xpose.msra.mxu1 %v4158_v45 }
 0xcd9   :  { %5612 = vmatprep.mubr.msk.bf16.mxu0 %vm5984_vm1, %v5983_v35  ;;  %5618 = vmatprep.mubr.msk.bf16.mxu1 %vm5984_vm1, %v5983_v35 }
 0xcda   :  { %5622 = vmatprep.subr.bf16.mxu0 %v5983_v35  ;;  %5628 = vmatprep.subr.bf16.mxu1 %v5983_v35 }
 0xcdf   :  { %5613 = vmatmul.mubr.msk.bf16.vlgmr.msra.gmra.mrb[36].mxu0 %vm1825_vm2, %v3419_v0  ;;  %5619 = vmatmul.mubr.msk.bf16.vlgmr.msra.gmra.mrb[52].mxu1 %vm1825_vm2, %v3420_v53 }
 0xce0   :  { %5624 = vmatprep.mubr.msk.bf16.mxu0 %vm5984_vm1, %v5983_v35  ;;  %5630 = vmatprep.mubr.msk.bf16.mxu1 %vm5984_vm1, %v5983_v35 }
 0xdaa   :  { %v4053_v7 = vpop.f32.mrb[32].mxu0  ;;  %v4100_v8 = vpop.f32.mrb[48].mxu1 }
 0xdab   :  { %v4054_v20 = vadd.f32 %v5919_v56, %v4053_v7  ;;  %v4101_v9 = vadd.f32 %v5919_v56, %v4100_v8  ;;  %v5602_v5 = vpop.f32.mrb[33].mxu0  ;;  %v5608_v13 = vpop.f32.mrb[49].mxu1 }
 0xdac   :  { %v4056_v16 = vpop.f32.mrb[34].mxu0  ;;  %v4103_v12 = vpop.f32.mrb[50].mxu1 }
 0xdad   :  { %v4057_v18 = vadd.f32 %v5920_v17, %v4056_v16  ;;  %v5603_v19 = vpop.f32.mrb[35].mxu0  ;;  %v5609_v21 = vpop.f32.mrb[51].mxu1  ;;  %v4201_v23 = vsel %vm2014_vm3, %v4054_v20, -inf  ;;  %v4207_v24 = vsel %vm2014_vm3, %v4101_v9, -inf  ;;  %v4104_v33 = vadd.f32 %v5920_v17, %v4103_v12 }
 0xdae   :  { %4202 = vmax.xlane.f32.xlu1 %v4201_v23  ;;  %4208 = vmax.xlane.f32.xlu0 %v4207_v24 }
 0xdaf   :  { %v4204_v36 = vsel %vm2014_vm3, %v4057_v18, -inf  ;;  %v4210_v1 = vsel %vm2014_vm3, %v4104_v33, -inf }
 0xdb2   :  { %v4147_v37 = vpop.f32.mrb[36].mxu0  ;;  %4205 = vmax.xlane.f32.xlu0 %v4204_v36  ;;  %v4194_v38 = vpop.f32.mrb[52].mxu1 }
 0xdb3   :  { %v6883_v44 = vadd.f32 %v5919_v56, %v4147_v37  ;;  %v5614_v10 = vpop.f32.mrb[37].mxu0  ;;  %v5620_v4 = vpop.f32.mrb[53].mxu1  ;;  %v4195_v14 = vadd.f32 %v5919_v56, %v4194_v38 }
 0xdb4   :  { %v4150_v41 = vpop.f32.mrb[38].mxu0  ;;  %v4197_v42 = vpop.f32.mrb[54].mxu1 }
 0xdb5   :  { %v4151_v26 = vadd.f32 %v5920_v17, %v4150_v41  ;;  %v5615_v48 = vpop.f32.mrb[39].mxu0  ;;  %v5621_v29 = vpop.f32.mrb[55].mxu1  ;;  %v4213_v15 = vsel %vm2014_vm3, %v6883_v44, -inf  ;;  %v4198_v2 = vadd.f32 %v5920_v17, %v4197_v42  ;;  %v4219_v52 = vsel %vm2014_vm3, %v4195_v14, -inf }
 0xdb6   :  { %4214 = vmax.xlane.f32.xlu1 %v4213_v15  ;;  %4211 = vmax.xlane.f32.xlu0 %v4210_v1 }
 0xdb7   :  { %v4216_v22 = vsel %vm2014_vm3, %v4151_v26, -inf  ;;  %v4222_v49 = vsel %vm2014_vm3, %v4198_v2, -inf }
 0xdba   :  { %4217 = vmax.xlane.f32.xlu0 %v4216_v22  ;;  %4220 = vmax.xlane.f32.xlu1 %v4219_v52 }
 0xdbe   :  { %4223 = vmax.xlane.f32.xlu0 %v4222_v49 }
 0xdcb   :  { %3719 = vrot.lane.b32.xlu1 %v6893_v31, %s5985_s0 }
 0xdcf   :  { %3725 = vrot.lane.b32.xlu1 %v6893_v31, %s5986_s5 }
 0xdd3   :  { %3727 = vrot.lane.b32.xlu1 %v6900_v30, %s5986_s5 }
 0xdd4   :  { %3721 = vrot.lane.b32.xlu0 %v6900_v30, %s5985_s0 }
 0xdd8   :  { %3733 = vrot.lane.b32.xlu0 %v6900_v30, %s5987_s9 }
 0xe3b   :  { %v4203_v55 = vpop.xlane.xlu1 %4202  ;;  %v4209_v40 = vpop.xlane.xlu0 %4208 }
 0xe3c   :  { %v4225_v50 = vsub.f32 %v4054_v20, %v4203_v55  ;;  %v4227_v47 = vsub.f32 %v4101_v9, %v4209_v40 }
 0xe3e   :  { %v4233_v51 = vmul.f32 1.442695, %v4225_v50  ;;  %v4237_v54 = vmul.f32 1.442695, %v4227_v47 }
 0xe3f   :  { %v4206_v57 = vpop.xlane.xlu0 %4205 }
 0xe40   :  { %5877 = vpow2.f32 %v4233_v51  ;;  %v4226_v58 = vsub.f32 %v4057_v18, %v4206_v57 }
 0xe41   :  { %5879 = vpow2.f32 %v4237_v54 }
 0xe42   :  { %v4235_v59 = vmul.f32 1.442695, %v4226_v58 }
 0xe43   :  { %v4215_v25 = vpop.xlane.xlu1 %4214  ;;  %v4212_v27 = vpop.xlane.xlu0 %4211 }
 0xe44   :  { %5881 = vpow2.f32 %v4235_v59  ;;  %v4228_v60 = vsub.f32 %v4104_v33, %v4212_v27  ;;  %v4229_v24 = vsub.f32 %v6883_v44, %v4215_v25 }
 0xe46   :  { %v4239_v32 = vmul.f32 1.442695, %v4228_v60  ;;  %v4241_v33 = vmul.f32 1.442695, %v4229_v24 }
 0xe47   :  { %v4218_v61 = vpop.xlane.xlu0 %4217  ;;  %v4221_v43 = vpop.xlane.xlu1 %4220 }
 0xe48   :  { %v4230_v45 = vsub.f32 %v4151_v26, %v4218_v61  ;;  %v4231_v6 = vsub.f32 %v4195_v14, %v4221_v43  ;;  %5883 = vpow2.f32 %v4239_v32 }
 0xe4a   :  { %v6908_v11 = vpop.eup %5877  ;;  %v4245_v62 = vmul.f32 1.442695, %v4231_v6  ;;  %v4243_v7 = vmul.f32 1.442695, %v4230_v45 }
 0xe4b   :  { %v4224_v63 = vpop.xlane.xlu0 %4223  ;;  %v4249_v0 = vsel %vm2014_vm3, %v6908_v11, 0.0  ;;  %v6912_v53 = vpop.eup %5879 }
 0xe4c   :  { %v4232_v8 = vsub.f32 %v4198_v2, %v4224_v63  ;;  %4250 = vadd.xlane.f32.xlu1 %v4249_v0  ;;  %5885 = vpow2.f32 %v4245_v62  ;;  %v4255_v20 = vsel %vm2014_vm3, %v6912_v53, 0.0  ;;  %v3720_v38 = vpop.permute.xlu1 %3719 }
 0xe4d   :  { %5887 = vpow2.f32 %v4243_v7 }
 0xe4e   :  { %v6914_v56 = vpop.eup %5881  ;;  %v4247_v5 = vmul.f32 1.442695, %v4232_v8 }
 0xe4f   :  { %v4252_v9 = vsel %vm2014_vm3, %v6914_v56, 0.0  ;;  %v3722_v4 = vpop.permute.xlu0 %3721 }
 0xe50   :  { %4256 = vadd.xlane.f32.xlu1 %v4255_v20  ;;  %4253 = vadd.xlane.f32.xlu0 %v4252_v9  ;;  %5889 = vpow2.f32 %v4247_v5  ;;  %v3726_v10 = vpop.permute.xlu1 %3725 }
 0xe51   :  { %5891 = vpow2.f32 %v4241_v33  ;;  %v3737_v51 = vcombine.low %v6893_v31, %v3726_v10  ;;  %v3738_v58 = vcombine.high %v6893_v31, %v3726_v10 }
 0xe52   :  { %v6920_v13 = vpop.eup %5883 }
 0xe53   :  { %v4258_v16 = vsel %vm2014_vm3, %v6920_v13, 0.0  ;;  %v3734_v42 = vpop.permute.xlu0 %3733  ;;  %v3745_v32 = vrot.slane %v3737_v51, %v6336_v39  ;;  %v3752_v62 = vrot.slane %v3738_v58, %v6336_v39 }
 0xe54   :  { %4259 = vadd.xlane.f32.xlu0 %v4258_v16  ;;  %v3728_v41 = vpop.permute.xlu1 %3727  ;;  %v3821_v26 = vcombine.low %v3722_v4, %v3734_v42  ;;  %v3822_v29 = vcombine.high %v3722_v4, %v3734_v42 }
 0xe55   :  { %v3805_v14 = vcombine.low %v6900_v30, %v3728_v41  ;;  %v3806_v48 = vcombine.high %v6900_v30, %v3728_v41 }
 0xe56   :  { %v6924_v12 = vpop.eup %5885  ;;  %v3829_v15 = vrot.slane %v3821_v26, %v6336_v39  ;;  %v3836_v2 = vrot.slane %v3822_v29, %v6336_v39 }
 0xe57   :  { %v4267_v17 = vsel %vm2014_vm3, %v6924_v12, 0.0  ;;  %v6928_v18 = vpop.eup %5887  ;;  %v3813_v44 = vrot.slane %v3805_v14, %v6336_v39  ;;  %v3820_v1 = vrot.slane %v3806_v48, %v6336_v39 }
 0xe58   :  { %4268 = vadd.xlane.f32.xlu0 %v4267_v17  ;;  %v4264_v19 = vsel %vm2014_vm3, %v6928_v18, 0.0 }
 0xe59   :  { %v3837_v22 = vcombine.low %v3813_v44, %v3829_v15  ;;  %v3838_v52 = vcombine.high %v3813_v44, %v3829_v15  ;;  %v3853_v34 = vcombine.low %v3820_v1, %v3836_v2  ;;  %v3854_v55 = vcombine.high %v3820_v1, %v3836_v2 }
 0xe5a   :  { %v6932_v21 = vpop.eup %5889 }
 0xe5b   :  { %v4270_v23 = vsel %vm2014_vm3, %v6932_v21, 0.0  ;;  %v6939_v36 = vpop.eup %5891  ;;  %v3845_v40 = vrot.slane %v3837_v22, %v6338_v46  ;;  %v3852_v50 = vrot.slane %v3838_v52, %v6338_v46  ;;  %v3861_v54 = vrot.slane %v3853_v34, %v6338_v46 }
 0xe5c   :  { %4265 = vadd.xlane.f32.xlu0 %v4264_v19  ;;  %v4261_v37 = vsel %vm2014_vm3, %v6939_v36, 0.0  ;;  %v3868_v57 = vrot.slane %v3854_v55, %v6338_v46 }
 0xe5d   :  { %v3941_v59 = vcombine.low %v3845_v40, %v3852_v50  ;;  %v5304_v61 = vcombine.high %v3845_v40, %v3852_v50 }
 0xe5e   :  { %v3957_v43 = vcombine.low %v3861_v54, %v3868_v57  ;;  %v5305_v45 = vcombine.high %v3861_v54, %v3868_v57 }
 0xe5f   :  { %v3948_v7 = vrot.slane %v3941_v59, %v6336_v39  ;;  %v3956_v5 = vrot.slane %v5304_v61, %v6336_v39 }
 0xe60   :  { %4271 = vadd.xlane.f32.xlu0 %v4270_v23  ;;  %v3964_v16 = vrot.slane %v3957_v43, %v6336_v39  ;;  %v3972_v17 = vrot.slane %v5305_v45, %v6336_v39 }
 0xe61   :  { %3731 = vrot.lane.b32.xlu1 %v6893_v31, %s5987_s9  ;;  %v3973_v14 = vcombine.low %v3948_v7, %v3956_v5  ;;  %v3974_v52 = vcombine.high %v3948_v7, %v3956_v5 }
 0xe62   :  { %v3989_v26 = vcombine.low %v3964_v16, %v3972_v17 }
 0xe63   :  { %v3981_v50 = vrot.slane %v3973_v14, %v6338_v46 }
 0xe85   :  { %4262 = vadd.xlane.f32.xlu1 %v4261_v37 }
 0xed9   :  { %v4251_v49 = vpop.xlane.xlu1 %4250 }
 0xeda   :  { %5893 = vrcp.f32 %v4251_v49  ;;  %v3990_v49 = vcombine.high %v3964_v16, %v3972_v17 }
 0xedd   :  { %v4257_v47 = vpop.xlane.xlu1 %4256  ;;  %v4254_v30 = vpop.xlane.xlu0 %4253 }
 0xede   :  { %5895 = vrcp.f32 %v4254_v30 }
 0xee1   :  { %v3732_v25 = vpop.permute.xlu1 %3731  ;;  %v4260_v6 = vpop.xlane.xlu0 %4259 }
 0xee2   :  { %v3753_v27 = vcombine.low %v3720_v38, %v3732_v25  ;;  %v3754_v60 = vcombine.high %v3720_v38, %v3732_v25  ;;  %5897 = vrcp.f32 %v4260_v6  ;;  %v3988_v25 = vrot.slane %v3974_v52, %v6338_v46 }
 0xee3   :  { %5899 = vrcp.f32 %v4257_v47  ;;  %v3997_v47 = vrot.slane %v3989_v26, %v6338_v46 }
 0xee4   :  { %v3761_v63 = vrot.slane %v3753_v27, %v6336_v39  ;;  %v3768_v0 = vrot.slane %v3754_v60, %v6336_v39  ;;  %v5894_v1 = vpop.eup %5893  ;;  %v4004_v27 = vrot.slane %v3990_v49, %v6338_v46 }
 0xee5   :  { %v4269_v19 = vpop.xlane.xlu0 %4268  ;;  %v4005_v61 = vcombine.low %v3981_v50, %v3997_v47  ;;  %v4006_v45 = vcombine.high %v3981_v50, %v3997_v47 }
 0xee6   :  { %v3769_v31 = vcombine.low %v3745_v32, %v3761_v63  ;;  %v3770_v8 = vcombine.high %v3745_v32, %v3761_v63  ;;  %v3785_v20 = vcombine.low %v3752_v62, %v3768_v0  ;;  %v3786_v9 = vcombine.high %v3752_v62, %v3768_v0 }
 0xee7   :  { %v4008_v5 = vcombine.high %v3988_v25, %v4004_v27 }
 0xee8   :  { %v3777_v23 = vrot.slane %v3769_v31, %v6338_v46  ;;  %v3784_v24 = vrot.slane %v3770_v8, %v6338_v46  ;;  %v3793_v33 = vrot.slane %v3785_v20, %v6338_v46  ;;  %v3800_v37 = vrot.slane %v3786_v9, %v6338_v46  ;;  %v5896_v34 = vpop.eup %5895 }
 0xee9   :  { %v6967_v42 = vpop.xlane.xlu0 %4265  ;;  %v4282_v6 = vmul.f32 %v5896_v34, %v6914_v56  ;;  %v4281_v8 = vmul.f32 %v5894_v1, %v6908_v11  ;;  %v4007_v9 = vcombine.low %v3988_v25, %v4004_v27 }
 0xeea   :  { %v3873_v38 = vcombine.low %v3777_v23, %v3784_v24  ;;  %v5302_v10 = vcombine.high %v3777_v23, %v3784_v24  ;;  %v3889_v4 = vcombine.low %v3793_v33, %v3800_v37  ;;  %v5303_v41 = vcombine.high %v3793_v33, %v3800_v37 }
 0xeeb   :  { %v4289_v16 = vpack.c.bf16 %v4282_v6, %v4281_v8 }
 0xeec   :  { %v3880_v48 = vrot.slane %v3873_v38, %v6336_v39  ;;  %v3888_v29 = vrot.slane %v5302_v10, %v6336_v39  ;;  %v3896_v44 = vrot.slane %v3889_v4, %v6336_v39  ;;  %v3904_v15 = vrot.slane %v5303_v41, %v6336_v39  ;;  %v5898_v54 = vpop.eup %5897 }
 0xeed   :  { %v4272_v55 = vpop.xlane.xlu0 %4271  ;;  %v5900_v60 = vpop.eup %5899  ;;  %v4284_v62 = vmul.f32 %v5898_v54, %v6920_v13 }
 0xeee   :  { %v3905_v2 = vcombine.low %v3880_v48, %v3888_v29  ;;  %v3906_v22 = vcombine.high %v3880_v48, %v3888_v29  ;;  %v3921_v40 = vcombine.low %v3896_v44, %v3904_v15  ;;  %v3922_v30 = vcombine.high %v3896_v44, %v3904_v15 }
 0xeef   :  { %5901 = vrcp.f32 %v4272_v55  ;;  %v4283_v20 = vmul.f32 %v5900_v60, %v6912_v53 }
 0xef0   :  { %v3913_v51 = vrot.slane %v3905_v2, %v6338_v46  ;;  %5903 = vrcp.f32 %v4269_v19  ;;  %v3929_v57 = vrot.slane %v3921_v40, %v6338_v46  ;;  %v3920_v58 = vrot.slane %v3906_v22, %v6338_v46 }
 0xef1   :  { %v3936_v59 = vrot.slane %v3922_v30, %v6338_v46  ;;  %v4290_v17 = vpack.c.bf16 %v4284_v62, %v4283_v20  ;;  %5905 = vrcp.f32 %v6967_v42 }
 0xef2   :  { %v3937_v32 = vcombine.low %v3913_v51, %v3929_v57  ;;  %v3938_v43 = vcombine.high %v3913_v51, %v3929_v57 }
 0xef3   :  { %v3939_v7 = vcombine.low %v3920_v58, %v3936_v59  ;;  %v3940_v31 = vcombine.high %v3920_v58, %v3936_v59 }
 0xef4   :  { %v4009_v63 = vpack.c.bf16 %v4005_v61, %v3937_v32  ;;  %v4010_v0 = vpack.c.bf16 %v4006_v45, %v3938_v43 }
 0xef5   :  { %v4011_v56 = vpack.c.bf16 %v4007_v9, %v3939_v7  ;;  %v4012_v13 = vpack.c.bf16 %v4008_v5, %v3940_v31 }
 0xef6   :  { %5623 = vmatpush3.bf16.msra.mxu0 %v4009_v63  ;;  %5629 = vmatpush3.bf16.msra.mxu1 %v4010_v0 }
 0xef7   :  { %5634 = vmatprep.subr.bf16.mxu0 %v5983_v35  ;;  %5640 = vmatprep.subr.bf16.mxu1 %v5983_v35 }
 0xef9   :  { %v5902_v19 = vpop.eup %5901  ;;  %5625 = vmatmul.mubr.msk.bf16.vlgmr.msra.gmra.mrb[40].mxu0 %vm2014_vm3, %v4289_v16  ;;  %5631 = vmatmul.mubr.msk.bf16.vlgmr.msra.gmra.mrb[56].mxu1 %vm2014_vm3, %v4290_v17 }
 0xefa   :  { %v5904_v11 = vpop.eup %5903  ;;  %5635 = vmatpush3.bf16.msra.mxu0 %v4011_v56  ;;  %5641 = vmatpush3.bf16.msra.mxu1 %v4012_v13  ;;  %v4288_v53 = vmul.f32 %v5902_v19, %v6932_v21 }
 0xefb   :  { %5642 = vmatprep.mubr.msk.bf16.mxu1 %vm5984_vm1, %v5983_v35  ;;  %5636 = vmatprep.mubr.msk.bf16.mxu0 %vm5984_vm1, %v5983_v35  ;;  %v4287_v23 = vmul.f32 %v5904_v11, %v6924_v12  ;;  %v5906_v33 = vpop.eup %5905 }
 0xefc   :  { %5646 = vmatprep.subr.bf16.mxu0 %v5983_v35  ;;  %5654 = vmatprep.subr.bf16.mxu1 %v5983_v35  ;;  %v4286_v38 = vmul.f32 %v5906_v33, %v6928_v18 }
 0xefd   :  { %v4292_v24 = vpack.c.bf16 %v4288_v53, %v4287_v23 }
 0xf01   :  { %5643 = vmatmul.mubr.msk.bf16.vlgmr.msra.gmra.mrb[60].mxu1 %vm2014_vm3, %v4292_v24 }
 0xf02   :  { %5658 = vmatprep.mubr.msk.bf16.mxu1 %vm5984_vm1, %v5983_v35 }
 0xf12   :  { %v4263_v21 = vpop.xlane.xlu1 %4262 }
 0xf13   :  { %5907 = vrcp.f32 %v4263_v21 }
 0xf1d   :  { %v5908_v37 = vpop.eup %5907 }
 0xf1e   :  { %v4285_v10 = vmul.f32 %v5908_v37, %v6939_v36 }
 0xf20   :  { %v4291_v4 = vpack.c.bf16 %v4286_v38, %v4285_v10 }
 0xf22   :  { %5637 = vmatmul.mubr.msk.bf16.vlgmr.msra.gmra.mrb[44].mxu0 %vm2014_vm3, %v4291_v4 }
 0xf23   :  { %5650 = vmatprep.mubr.msk.bf16.mxu0 %vm5984_vm1, %v5983_v35 }
 0xfcc   :  { %v4330_v12 = vpop.f32.mrb[40].mxu0  ;;  %v4374_v41 = vpop.f32.mrb[56].mxu1 }
 0xfcd   :  { %v5626_v14 = vpop.f32.mrb[41].mxu0  ;;  %v5632_v26 = vpop.f32.mrb[57].mxu1 }
 0xfce   :  { %v4333_v48 = vpop.f32.mrb[42].mxu0  ;;  %v4377_v42 = vpop.f32.mrb[58].mxu1 }
 0xfcf   :  { %v5627_v29 = vpop.f32.mrb[43].mxu0  ;;  %v5633_v44 = vpop.f32.mrb[59].mxu1 }
 0xfd4   :  { %v4462_v15 = vpop.f32.mrb[60].mxu1 }
 0xfd5   :  { %v4485_v1 = vcombine.low %v4374_v41, %v4462_v15  ;;  %v4486_v2 = vcombine.high %v4374_v41, %v4462_v15  ;;  %v5644_v18 = vpop.f32.mrb[61].mxu1 }
 0xfd6   :  { %v4465_v22 = vpop.f32.mrb[62].mxu1 }
 0xfd7   :  { %v4553_v36 = vcombine.low %v4377_v42, %v4465_v22  ;;  %v4554_v52 = vcombine.high %v4377_v42, %v4465_v22  ;;  %v5645_v49 = vpop.f32.mrb[63].mxu1  ;;  %v4493_v47 = vrot.slane %v4485_v1, %v6336_v39  ;;  %v4500_v30 = vrot.slane %v4486_v2, %v6336_v39  ;;  %v5821_v42 = vld [vmem:[%s7147_s26] sm:$0xff]  }
 0xfd8   :  { %5647 = vmatpush3.bf16.msra.mxu0 %v5821_v42 }
 0xfd9   :  { %v4561_v43 = vrot.slane %v4553_v36, %v6336_v39  ;;  %v4568_v45 = vrot.slane %v4554_v52, %v6336_v39  ;;  %5648 = vmatprep.subr.bf16.mxu0 %v5983_v35 }
 0xff5   :  { %v4418_v34 = vpop.f32.mrb[44].mxu0 }
 0xff6   :  { %v4469_v55 = vcombine.low %v4330_v12, %v4418_v34  ;;  %v4470_v40 = vcombine.high %v4330_v12, %v4418_v34  ;;  %v5638_v50 = vpop.f32.mrb[45].mxu0 }
 0xff7   :  { %v4421_v51 = vpop.f32.mrb[46].mxu0 }
 0xff8   :  { %v4477_v54 = vrot.slane %v4469_v55, %v6336_v39  ;;  %v4484_v57 = vrot.slane %v4470_v40, %v6336_v39  ;;  %v4537_v58 = vcombine.low %v4333_v48, %v4421_v51  ;;  %v4538_v59 = vcombine.high %v4333_v48, %v4421_v51  ;;  %v5639_v25 = vpop.f32.mrb[47].mxu0 }
 0xffa   :  { %v4501_v27 = vcombine.low %v4477_v54, %v4493_v47  ;;  %v4502_v60 = vcombine.high %v4477_v54, %v4493_v47  ;;  %v4517_v32 = vcombine.low %v4484_v57, %v4500_v30  ;;  %v4518_v61 = vcombine.high %v4484_v57, %v4500_v30 }
 0xffb   :  { %v4545_v6 = vrot.slane %v4537_v58, %v6336_v39  ;;  %v4552_v62 = vrot.slane %v4538_v59, %v6336_v39  ;;  %v5822_v58 = vld [vmem:[%s7147_s26 + $0x8] sm:$0xff]  }
 0xffc   :  { %v4509_v63 = vrot.slane %v4501_v27, %v6338_v46  ;;  %v4516_v0 = vrot.slane %v4502_v60, %v6338_v46  ;;  %v4525_v7 = vrot.slane %v4517_v32, %v6338_v46  ;;  %v4532_v31 = vrot.slane %v4518_v61, %v6338_v46  ;;  %5649 = vmatpush3.bf16.msra.mxu0 %v5822_v58 }
 0xffd   :  { %v4569_v8 = vcombine.low %v4545_v6, %v4561_v43  ;;  %v4570_v20 = vcombine.high %v4545_v6, %v4561_v43  ;;  %v4585_v9 = vcombine.low %v4552_v62, %v4568_v45  ;;  %v4586_v5 = vcombine.high %v4552_v62, %v4568_v45  ;;  %5662 = vmatprep.subr.bf16.mxu0 %v5983_v35 }
 0xffe   :  { %v4605_v16 = vcombine.low %v4509_v63, %v4516_v0  ;;  %v5314_v17 = vcombine.high %v4509_v63, %v4516_v0  ;;  %v4621_v56 = vcombine.low %v4525_v7, %v4532_v31  ;;  %v5315_v13 = vcombine.high %v4525_v7, %v4532_v31 }
 0xfff   :  { %v4577_v19 = vrot.slane %v4569_v8, %v6338_v46  ;;  %v4584_v11 = vrot.slane %v4570_v20, %v6338_v46  ;;  %v4593_v53 = vrot.slane %v4585_v9, %v6338_v46  ;;  %v4600_v23 = vrot.slane %v4586_v5, %v6338_v46 }
0x1000   :  { %v4612_v24 = vrot.slane %v4605_v16, %v6336_v39  ;;  %v4620_v21 = vrot.slane %v5314_v17, %v6336_v39  ;;  %v4628_v33 = vrot.slane %v4621_v56, %v6336_v39  ;;  %v4636_v37 = vrot.slane %v5315_v13, %v6336_v39 }
0x1001   :  { %v4673_v38 = vcombine.low %v4577_v19, %v4584_v11  ;;  %v5316_v10 = vcombine.high %v4577_v19, %v4584_v11  ;;  %v4689_v4 = vcombine.low %v4593_v53, %v4600_v23  ;;  %v5317_v12 = vcombine.high %v4593_v53, %v4600_v23  ;;  %v5318_v19 = vld [vmem:[%s7148_s28] ss:$0 sm:$0xff] }
0x1002   :  { %v4638_v41 = vcombine.high %v4612_v24, %v4620_v21  ;;  %v4654_v14 = vcombine.high %v4628_v33, %v4636_v37  ;;  %v4637_v26 = vcombine.low %v4612_v24, %v4620_v21  ;;  %v4653_v48 = vcombine.low %v4628_v33, %v4636_v37 }
0x1003   :  { %v4680_v29 = vrot.slane %v4673_v38, %v6336_v39  ;;  %v4688_v44 = vrot.slane %v5316_v10, %v6336_v39  ;;  %v4696_v15 = vrot.slane %v4689_v4, %v6336_v39  ;;  %v4704_v1 = vrot.slane %v5317_v12, %v6336_v39 }
0x1004   :  { %v4652_v2 = vrot.slane %v4638_v41, %v6338_v46  ;;  %v4668_v18 = vrot.slane %v4654_v14, %v6338_v46  ;;  %v4645_v22 = vrot.slane %v4637_v26, %v6338_v46  ;;  %v4661_v36 = vrot.slane %v4653_v48, %v6338_v46  ;;  %v5823_v14 = vld [vmem:[%s7149_s1] sm:$0xff]   ;;  %v5824_v26 = vld [vmem:[%s7149_s1 + $0x8] sm:$0xff]  }
0x1005   :  { %v4706_v52 = vcombine.high %v4680_v29, %v4688_v44  ;;  %v4722_v49 = vcombine.high %v4696_v15, %v4704_v1  ;;  %v4705_v34 = vcombine.low %v4680_v29, %v4688_v44  ;;  %v4721_v55 = vcombine.low %v4696_v15, %v4704_v1  ;;  %5655 = vmatpush3.bf16.msra.mxu1 %v5823_v14 }
0x1006   :  { %v4671_v40 = vcombine.low %v4652_v2, %v4668_v18  ;;  %v4669_v50 = vcombine.low %v4645_v22, %v4661_v36  ;;  %v4670_v47 = vcombine.high %v4645_v22, %v4661_v36  ;;  %v4672_v39 = vcombine.high %v4652_v2, %v4668_v18  ;;  %5656 = vmatprep.subr.bf16.mxu1 %v5983_v35 }
0x1007   :  { %v4720_v30 = vrot.slane %v4706_v52, %v6338_v46  ;;  %v4736_v51 = vrot.slane %v4722_v49, %v6338_v46  ;;  %v4713_v54 = vrot.slane %v4705_v34, %v6338_v46  ;;  %v4729_v57 = vrot.slane %v4721_v55, %v6338_v46 }
0x1009   :  { %v4739_v59 = vcombine.low %v4720_v30, %v4736_v51  ;;  %v4738_v25 = vcombine.high %v4713_v54, %v4729_v57  ;;  %v4737_v27 = vcombine.low %v4713_v54, %v4729_v57  ;;  %v4740_v60 = vcombine.high %v4720_v30, %v4736_v51  ;;  %5657 = vmatpush3.bf16.msra.mxu1 %v5824_v26  ;;  %v5322_v30 = vld [vmem:[%s7150_s2] ss:$0 sm:$0xff] }
0x100b   :  { %v5743_v32 = vpack.i.bf16 %v4739_v59, %v4671_v40  ;;  %v5738_v61 = vpack.i.bf16 %v4738_v25, %v4670_v47  ;;  %v5748_v43 = vpack.i.bf16 %v4740_v60, %v4672_v39  ;;  %v5323_v25 = vld [vmem:[%s7151_s7] ss:$0 sm:$0xff] }
0x100d   :  { %5744 = vrot.lane.b32.xlu0 %v5743_v32, %s5990_s13  ;;  %5739 = vrot.lane.b32.xlu1 %v5738_v61, %s5991_s21 }
0x1011   :  { %5749 = vrot.lane.b32.xlu1 %v5748_v43, %s5992_s25  ;;  %v5825_v43 = vld [vmem:[%s7152_s10] sm:$0xff]  }
0x107f   :  { %v5745_v45 = vpop.permute.xlu0 %5744  ;;  %v5740_v6 = vpop.permute.xlu1 %5739 }
0x1080   :  { %v5742_v46 = vunpack.i.h.bf16 %v5740_v6  ;;  %v5741_v62 = vunpack.i.l.bf16 %v5740_v6  ;;  %v5747_v63 = vunpack.i.h.bf16 %v5745_v45  ;;  %v5746_v0 = vunpack.i.l.bf16 %v5745_v45  ;;  %v5826_v45 = vld [vmem:[%s7152_s10 + $0x8] sm:$0xff]   ;;  %v5827_v6 = vld [vmem:[%s7152_s10 + $0x10] sm:$0xff]  }
0x1082   :  { %v4765_v7 = vsel %vm1825_vm2, %v4669_v50, %v5741_v62  ;;  %v4766_v31 = vsel %vm1825_vm2, %v4737_v27, %v5742_v46  ;;  %v5828_v46 = vld [vmem:[%s7152_s10 + $0x18] sm:$0xff]   ;;  %v5324_v62 = vld [vmem:[%s7153_s11] ss:$0 sm:$0xff] }
0x1083   :  { %v5750_v8 = vpop.permute.xlu1 %5749  ;;  %v4767_v5 = vsel %vm2014_vm3, %v4765_v7, %v5746_v0  ;;  %v4768_v16 = vsel %vm2014_vm3, %v4766_v31, %v5747_v63 }
0x1084   :  { %v5752_v20 = vunpack.i.h.bf16 %v5750_v8  ;;  %v5751_v9 = vunpack.i.l.bf16 %v5750_v8 }
0x1086   :  { %v4769_v17 = vsel %vm2583_vm4, %v4767_v5, %v5751_v9  ;;  %v4770_v56 = vsel %vm2583_vm4, %v4768_v16, %v5752_v20 }
0x1087   :  { %v4771_v13 = vpack.c.bf16 %v4770_v56, %v4769_v17 }
0x1089   :  { %5651 = vmatmul.mubr.msk.bf16.vlgmr.msra.gmra.mrb[48].mxu0 %vm691_vm0, %v4771_v13 }
0x108a   :  { %5670 = vmatprep.mubr.msk.bf16.mxu0 %vm5984_vm1, %v5983_v35  ;;  %5663 = vmatpush3.bf16.msra.mxu0 %v5825_v43 }
0x108b   :  { %5664 = vmatprep.subr.bf16.mxu0 %v5983_v35 }
0x108e   :  { %5665 = vmatpush3.bf16.msra.mxu0 %v5826_v45  ;;  %v5335_v45 = vld [vmem:[%s6187_s4] ss:$0 sm:$0xff] }
0x108f   :  { %5666 = vmatprep.subr.bf16.mxu0 %v5983_v35 }
0x1092   :  { %5667 = vmatpush3.bf16.msra.mxu0 %v5827_v6 }
0x1093   :  { %5668 = vmatprep.subr.bf16.mxu0 %v5983_v35 }
0x1096   :  { %5669 = vmatpush3.bf16.msra.mxu0 %v5828_v46 }
0x115c   :  { %v4832_v11 = vpop.f32.mrb[48].mxu0 }
0x115d   :  { %v4833_v53 = vadd.f32 %v5318_v19, %v4832_v11  ;;  %v5652_v23 = vpop.f32.mrb[49].mxu0 }
0x115e   :  { %v4835_v24 = vpop.f32.mrb[50].mxu0 }
0x115f   :  { %v7056_v21 = vadd.f32 %v4833_v53, %v6678_v28  ;;  %v4836_v33 = vadd.f32 %v5318_v19, %v4835_v24  ;;  %v5653_v37 = vpop.f32.mrb[51].mxu0 }
0x1161   :  { %v7059_v38 = vadd.f32 %v4836_v33, %v6681_v3  ;;  %v4843_v10 = vsel %vm691_vm0, %v7056_v21, 0.0  ;;  %v4851_v28 = vmul.f32 %v7056_v21, %v7056_v21 }
0x1162   :  { %4844 = vadd.xlane.f32.xlu1 %v4843_v10 }
0x1163   :  { %v4846_v4 = vsel %vm691_vm0, %v7059_v38, 0.0  ;;  %v4852_v12 = vmul.f32 %v7059_v38, %v7059_v38  ;;  %v4853_v3 = vsel %vm691_vm0, %v4851_v28, 0.0 }
0x1164   :  { %4847 = vadd.xlane.f32.xlu0 %v4846_v4 }
0x1165   :  { %v4856_v41 = vsel %vm691_vm0, %v4852_v12, 0.0 }
0x1166   :  { %4857 = vadd.xlane.f32.xlu1 %v4856_v41 }
0x1168   :  { %4854 = vadd.xlane.f32.xlu0 %v4853_v3  ;;  %v5328_v3 = vld [vmem:[%s6177_s20] ss:$0 sm:$0xff]  ;;  %s5993_s20 = smov [#allocation2]  }
0x1169   :  { %s5132_s0 = sshll.u32 %s5993_s20, 4  ;;  %s5133_s0 = int_to_ptr.vmem [resolvable:$true] %s5132_s0 }
0x116a   :  { %s5921_s5 = scalar_lea.vmem %s5133_s0, 32  ;;  %p5926_p1 = scmp.lt.s32.totalorder %s5133_s0, %s5133_s0 }
0x116b   :  { %p5922_p0 = scmp.ne.s32.totalorder %s5133_s0, %s5921_s5  ;;  %p5927_p2 = scmp.lt.s32.totalorder %s5921_s5, %s5921_s5 }
0x116d   :  { %p5928_p3 = por %p5927_p2, %p5926_p1 }
0x116f   :  { %p5929_p4 = pnand %p5928_p3, %p5922_p0 }
0x11ef   :  { %v4845_v48 = vpop.xlane.xlu1 %4844 }
0x11f0   :  { %v4849_v29 = vmul.f32 0.03125, %v4845_v48 }
0x11f1   :  { %v4848_v42 = vpop.xlane.xlu0 %4847 }
0x11f2   :  { %v4850_v44 = vmul.f32 0.03125, %v4848_v42  ;;  %v4861_v22 = vmul.f32 %v4849_v29, %v4849_v29  ;;  %v4867_v51 = vsub.f32 %v7056_v21, %v4849_v29 }
0x11f3   :  { %v4858_v15 = vpop.xlane.xlu1 %4857 }
0x11f4   :  { %v4862_v1 = vmul.f32 %v4850_v44, %v4850_v44  ;;  %v4860_v2 = vmul.f32 0.03125, %v4858_v15  ;;  %v4868_v47 = vsub.f32 %v7059_v38, %v4850_v44 }
0x11f5   :  { %v4855_v18 = vpop.xlane.xlu0 %4854 }
0x11f6   :  { %v4864_v36 = vsub.f32 %v4860_v2, %v4862_v1  ;;  %v4859_v52 = vmul.f32 0.03125, %v4855_v18 }
0x11f8   :  { %v4866_v49 = vmax.f32 %v4864_v36, 0.0  ;;  %v4863_v34 = vsub.f32 %v4859_v52, %v4861_v22 }
0x11fa   :  { %v4870_v55 = vadd.f32 1e-06, %v4866_v49  ;;  %v4865_v40 = vmax.f32 %v4863_v34, 0.0 }
0x11fc   :  { %5909 = vrsqrt.f32 %v4870_v55  ;;  %v4869_v50 = vadd.f32 1e-06, %v4865_v40 }
0x11fe   :  { %5911 = vrsqrt.f32 %v4869_v50 }
0x1206   :  { %v5910_v39 = vpop.eup %5909 }
0x1207   :  { %v4874_v54 = vmul.f32 %v5910_v39, %v4868_v47 }
0x1208   :  { %v5912_v57 = vpop.eup %5911 }
0x1209   :  { %v4873_v58 = vmul.f32 %v5912_v57, %v4867_v51  ;;  %v4882_v59 = vmul.f32 %v5322_v30, %v4874_v54 }
0x120b   :  { %v4881_v27 = vmul.f32 %v5322_v30, %v4873_v58  ;;  %v4890_v32 = vadd.f32 %v5323_v25, %v4882_v59 }
0x120d   :  { %v4889_v60 = vadd.f32 %v5323_v25, %v4881_v27 }
0x120f   :  { %v4891_v61 = vpack.c.bf16 %v4890_v32, %v4889_v60  ;;  %v5334_v60 = vld [vmem:[%s6182_s27] ss:$0 sm:$0xff] }
0x1211   :  { %5659 = vmatmul.mubr.msk.bf16.vlgmr.msra.gmra.mrb[64].mxu1 %vm691_vm0, %v4891_v61 }
0x12e4   :  { %v4952_v63 = vpop.f32.mrb[64].mxu1 }
0x12e5   :  { %v4953_v0 = vadd.f32 %v5324_v62, %v4952_v63  ;;  %v5660_v7 = vpop.f32.mrb[65].mxu1 }
0x12e6   :  { %v4955_v31 = vpop.f32.mrb[66].mxu1 }
0x12e7   :  { %v4959_v8 = vmul.f32 %v4953_v0, %v4953_v0  ;;  %v4956_v20 = vadd.f32 %v5324_v62, %v4955_v31  ;;  %v5661_v9 = vpop.f32.mrb[67].mxu1 }
0x12e9   :  { %v4961_v5 = vmul.f32 %v4959_v8, %v4953_v0  ;;  %v4960_v16 = vmul.f32 %v4956_v20, %v4956_v20 }
0x12eb   :  { %v4963_v17 = vmul.f32 0.044715, %v4961_v5  ;;  %v4962_v56 = vmul.f32 %v4960_v16, %v4956_v20 }
0x12ed   :  { %v4965_v13 = vadd.f32 %v4963_v17, %v4953_v0  ;;  %v4964_v19 = vmul.f32 0.044715, %v4962_v56 }
0x12ef   :  { %v4967_v11 = vmul.f32 0.7978846, %v4965_v13  ;;  %v4966_v53 = vadd.f32 %v4964_v19, %v4956_v20 }
0x12f1   :  { %5913 = vtanh.f32 %v4967_v11  ;;  %v4968_v35 = vmul.f32 0.7978846, %v4966_v53 }
0x12f3   :  { %5915 = vtanh.f32 %v4968_v35 }
0x12fb   :  { %v5914_v23 = vpop.eup %5913 }
0x12fc   :  { %v4971_v24 = vadd.f32 1.0, %v5914_v23 }
0x12fd   :  { %v5916_v33 = vpop.eup %5915 }
0x12fe   :  { %v4973_v37 = vmul.f32 0.5, %v4971_v24  ;;  %v4972_v10 = vadd.f32 1.0, %v5916_v33 }
0x1300   :  { %v4974_v4 = vmul.f32 0.5, %v4972_v10  ;;  %v4975_v12 = vmul.f32 %v4973_v37, %v4953_v0 }
0x1302   :  { %v4976_v28 = vmul.f32 %v4974_v4, %v4956_v20 }
0x1304   :  { %v4977_v41 = vpack.c.bf16 %v4976_v28, %v4975_v12 }
0x1306   :  { %5671 = vmatmul.mubr.msk.bf16.vlgmr.msra.gmra.mrb[52].mxu0 %vm2832_vm5, %v4977_v41 }
0x13d9   :  { %v5054_v14 = vpop.f32.mrb[52].mxu0 }
0x13da   :  { %v5055_v26 = vadd.f32 %v5328_v3, %v5054_v14  ;;  %v5672_v48 = vpop.f32.mrb[53].mxu0 }
0x13db   :  { %v5057_v42 = vpop.f32.mrb[54].mxu0 }
0x13dc   :  { %v5058_v29 = vadd.f32 %v5328_v3, %v5057_v42  ;;  %v5673_v44 = vpop.f32.mrb[55].mxu0  ;;  %v5061_v15 = vadd.f32 %v5055_v26, %v7056_v21 }
0x13de   :  { %v5062_v1 = vadd.f32 %v5058_v29, %v7059_v38  ;;  %v5076_v36 = vmul.f32 %v5061_v15, %v5061_v15 }
0x13e0   :  { %v5067_v2 = vrot.slane %v5062_v1, 7  ;;  %v5077_v18 = vmul.f32 %v5062_v1, %v5062_v1 }
0x13e2   :  { %v5069_v22 = vsel %vm5068_vm6, %v5067_v2, %v5061_v15  ;;  %v5080_v52 = vrot.slane %v5077_v18, 7 }
0x13e3   :  { %v5072_v49 = vsel %vm5071_vm7, %v5069_v22, 0.0 }
0x13e4   :  { %5073 = vadd.xlane.f32.xlu0 %v5072_v49  ;;  %v5081_v34 = vsel %vm5068_vm6, %v5080_v52, %v5076_v36 }
0x13e5   :  { %v5083_v55 = vsel %vm5071_vm7, %v5081_v34, 0.0 }
0x13e6   :  { %5084 = vadd.xlane.f32.xlu1 %v5083_v55 }
0x1471   :  { %v5074_v21 = vpop.xlane.xlu0 %5073 }
0x1472   :  { %v5075_v40 = vmul.f32 0.03125, %v5074_v21 }
0x1473   :  { %v5085_v38 = vpop.xlane.xlu1 %5084 }
0x1474   :  { %v5086_v50 = vmul.f32 0.03125, %v5085_v38  ;;  %v5087_v47 = vmul.f32 %v5075_v40, %v5075_v40  ;;  %v5091_v54 = vrot.slane %v5075_v40, 1  ;;  %v5094_v57 = vsub.f32 %v5061_v15, %v5075_v40 }
0x1476   :  { %v5088_v39 = vsub.f32 %v5086_v50, %v5087_v47  ;;  %v5095_v59 = vsub.f32 %v5062_v1, %v5091_v54 }
0x1478   :  { %v5089_v30 = vmax.f32 %v5088_v39, 0.0 }
0x147a   :  { %v5096_v51 = vadd.f32 1e-06, %v5089_v30 }
0x147c   :  { %5917 = vrsqrt.f32 %v5096_v51 }
0x1486   :  { %v5918_v58 = vpop.eup %5917 }
0x1487   :  { %v5099_v25 = vrot.slane %v5918_v58, 1  ;;  %v5102_v27 = vmul.f32 %v5918_v58, %v5094_v57 }
0x1489   :  { %v5103_v32 = vmul.f32 %v5099_v25, %v5095_v59  ;;  %v5110_v61 = vmul.f32 %v5334_v60, %v5102_v27 }
0x148b   :  { %v5111_v43 = vmul.f32 %v5334_v60, %v5103_v32  ;;  %v5118_v46 = vadd.f32 %v5335_v45, %v5110_v61 }
0x148d   :  { %v5119_v6 = vadd.f32 %v5335_v45, %v5111_v43 }
0x148f   :  { %v5122_v62 = vrot.slane %v5119_v6, 7 }
0x1491   :  { %v5123_v63 = vsel %vm5068_vm6, %v5122_v62, %v5118_v46 }
0x1492   :  { %5125 = vst.msk [vmem:[#allocation2] sm:$0x3] %vm5071_vm7, %v5123_v63 }
0x1493   :  { %5932 = shalt.err (!%p5929_p4)
}
0x1494   :  { %s5933_s27 = scalar_lea.hbm %s6192_s12, 32 }
0x1495   :  { %p5934_p5 = scmp.ne.s32.totalorder %s6192_s12, %s5933_s27  ;;  %p5937_p6 = scmp.lt.u32.totalorder %s5933_s27, %s6192_s12 }
0x1497   :  { %p5939_p7 = pnand %p5937_p6, %p5934_p5 }
0x1499   :  { %5942 = shalt.err (!%p5939_p7)
}
0x149a   :  { %5135 = dma.vmem_to_hbm [thread:$0]  %s5133_s0, 32, %s6192_s12, [#allocation3]  }
0x149b   :  { %5943 = dma.done.wait [#allocation3], 32  }
0x149c   :  { %5944 = vsyncadd [#allocation3], 4294967264 }
0x149d   :  { %5139 = vsyncpa [#allocation3], 1 }

</bundles_post_ra>
